<compile_context>
chip_gen: v5e
topology: v5e:2x2
jax: 0.10.0
libtpu: 0.0.40
codegen_flags: <defaults>
</compile_context>

<pallas_src>
import jax
import jax.numpy as jnp
from jax.experimental import pallas as pl
from jax.experimental.pallas import tpu as pltpu

# ---- model dimensions (consistent with the module's constructor) ----
SELF_DIM    = 6     # self_dimension
OBJ_DIM     = 5     # object_dimension
MAX_OBJ     = 4     # max_object_num
SELF_FEAT   = 16    # self_feature_dimension
OBJ_FEAT    = 8     # object_feature_dimension
CONCAT_FEAT = SELF_FEAT + MAX_OBJ * OBJ_FEAT   # concat_feature_dimension = 48
HIDDEN      = 32    # hidden_dimension
ACT_DIM     = 3     # action_dimension

OBJ_IN_ALL  = MAX_OBJ * OBJ_DIM     # 20
OBJ_OUT_ALL = MAX_OBJ * OBJ_FEAT    # 32

TILE_B = 128        # batch rows per grid step

# ---- packed activation-slab column layout (one lane-dense slab per row) ----
X1_COL   = 0                         # 0:6    x1
X2_COL   = X1_COL + SELF_DIM         # 6:26   x2 (all object slots)
ACT_COL  = X2_COL + OBJ_IN_ALL       # 26:29  actions
MASK_COL = 32                        # 32:36  thresholded mask (0/1)
ONE_COL  = 36                        # 36     constant 1.0 (gate builder)
IN_COLS  = 40                        # cols 29:32 and 37:40 are zero padding
GSRC_COL = 32                        # gate-source slice = inp[:, 32:40]
GSRC_W   = 8

# ---- fused-feature column layout:  [action(32) | self(16) | object(32)] ----
F_ACT  = 0
F_SELF = HIDDEN                      # 32
F_OBJ  = HIDDEN + SELF_FEAT          # 48
FEAT_W = HIDDEN + CONCAT_FEAT        # 80

# ---- packed weight-slab row layout (matrix offsets are multiples of 8) ----
W1_OFF   = 0                         # (IN_COLS, FEAT_W)  fused encoders
G_OFF    = 40                        # (GSRC_W,  FEAT_W)  0/1 gate builder
WHB_OFF  = 48                        # (FEAT_W,  HIDDEN)  hidden layer (action rows zero)
WH2_OFF  = 128                       # (HIDDEN,  HIDDEN)
WOUT_OFF = 160                       # (HIDDEN,  1)
B1_ROW   = 192                       # fused encoder bias (FEAT_W wide)
BH_ROW   = 193                       # hidden_layer bias
BH2_ROW  = 194                       # hidden_layer_2 bias
BOUT_ROW = 195                       # output_layer bias
W_ROWS   = 200
W_LANES  = FEAT_W                    # 80

MATMUL_PRECISION = jax.lax.Precision.HIGHEST


def critic_kernel(inp_ref, w_ref, q_ref):
    f32 = jnp.float32
    prec = MATMUL_PRECISION

    # --- static slices into the packed weight/bias slab (lane offset 0) ---
    w1   = w_ref[W1_OFF:W1_OFF + IN_COLS, :]
    g    = w_ref[G_OFF:G_OFF + GSRC_W, :]
    whb  = w_ref[WHB_OFF:WHB_OFF + FEAT_W, 0:HIDDEN]
    wh2  = w_ref[WH2_OFF:WH2_OFF + HIDDEN, 0:HIDDEN]
    wout = w_ref[WOUT_OFF:WOUT_OFF + HIDDEN, 0:1]
    b1   = w_ref[B1_ROW:B1_ROW + 1, :]
    bh   = w_ref[BH_ROW:BH_ROW + 1, 0:HIDDEN]
    bh2  = w_ref[BH2_ROW:BH2_ROW + 1, 0:HIDDEN]
    bout = w_ref[BOUT_ROW:BOUT_ROW + 1, 0:1]

    inp = inp_ref[...]                                   # (TILE_B, 40)

    # --- fused encoders: [action | self | object] in one MXU pass, ReLU ---
    feat = jnp.maximum(
        jnp.dot(inp, w1, preferred_element_type=f32, precision=prec) + b1, 0.0)

    # --- per-object mask expanded to feature lanes via a tiny 0/1 matmul;
    #     the constant-one input column lights the self/action lanes. ---
    gate = jnp.dot(inp[:, GSRC_COL:GSRC_COL + GSRC_W], g,
                   preferred_element_type=f32, precision=prec)
    feat = feat * gate

    af = feat[:, F_ACT:F_ACT + HIDDEN]                   # action features (offset 0)

    # hidden_layer on cat(x1f, x2f): action rows of `whb` are zero, so the
    # full 80-wide feature feeds one dot with no lane slicing.
    h = jnp.maximum(
        jnp.dot(feat, whb, preferred_element_type=f32, precision=prec) + bh, 0.0)

    # features = action_features * features
    h = af * h

    # features = relu(hidden_layer_2(features))
    h2 = jnp.maximum(
        jnp.dot(h, wh2, preferred_element_type=f32, precision=prec) + bh2, 0.0)

    # qvalues = output_layer(features)
    q_ref[...] = jnp.dot(h2, wout, preferred_element_type=f32, precision=prec) + bout


def pack_params(p):
    """Pack all (pre-transposed) weights and biases into one (200, 80) slab."""
    wo_blk = jax.scipy.linalg.block_diag(*([p["wo"]] * MAX_OBJ))   # (20, 32)

    w = jnp.zeros((W_ROWS, W_LANES), jnp.float32)

    # fused encoder W1 (rows = packed input columns, cols = fused feature lanes)
    w = w.at[W1_OFF + X1_COL:W1_OFF + X1_COL + SELF_DIM,
             F_SELF:F_SELF + SELF_FEAT].set(p["ws"])
    w = w.at[W1_OFF + X2_COL:W1_OFF + X2_COL + OBJ_IN_ALL,
             F_OBJ:F_OBJ + OBJ_OUT_ALL].set(wo_blk)
    w = w.at[W1_OFF + ACT_COL:W1_OFF + ACT_COL + ACT_DIM,
             F_ACT:F_ACT + HIDDEN].set(p["wa"])

    # gate builder G: mask_i -> object slot i's 8 lanes; const 1 -> self/action
    for i in range(MAX_OBJ):
        w = w.at[G_OFF + i,
                 F_OBJ + i * OBJ_FEAT:F_OBJ + (i + 1) * OBJ_FEAT].set(1.0)
    w = w.at[G_OFF + (ONE_COL - GSRC_COL), 0:F_OBJ].set(1.0)

    # hidden layer (action-feature rows stay zero)
    w = w.at[WHB_OFF + F_SELF:WHB_OFF + F_SELF + SELF_FEAT,
             0:HIDDEN].set(p["wh"][:SELF_FEAT])
    w = w.at[WHB_OFF + F_OBJ:WHB_OFF + F_OBJ + OBJ_OUT_ALL,
             0:HIDDEN].set(p["wh"][SELF_FEAT:])

    w = w.at[WH2_OFF:WH2_OFF + HIDDEN, 0:HIDDEN].set(p["wh2"])
    w = w.at[WOUT_OFF:WOUT_OFF + HIDDEN, 0:1].set(p["wout"])

    # biases
    w = w.at[B1_ROW, F_ACT:F_ACT + HIDDEN].set(p["ba"][0])
    w = w.at[B1_ROW, F_SELF:F_SELF + SELF_FEAT].set(p["bs"][0])
    w = w.at[B1_ROW, F_OBJ:F_OBJ + OBJ_OUT_ALL].set(jnp.tile(p["bo"][0], MAX_OBJ))
    w = w.at[BH_ROW, 0:HIDDEN].set(p["bh"][0])
    w = w.at[BH2_ROW, 0:HIDDEN].set(p["bh2"][0])
    w = w.at[BOUT_ROW, 0:1].set(p["bout"][0])
    return w


def pack_inputs(x1, x2, mask, actions):
    """Pack x1 | x2 | actions | 0 | thresholded-mask | 1 | 0 into (B, 40)."""
    bn = x1.shape[0]
    mask_keep = (mask >= 0.5).astype(jnp.float32)
    cols = [
        x1.astype(jnp.float32),
        x2.astype(jnp.float32),
        actions.astype(jnp.float32),
        jnp.zeros((bn, MASK_COL - (ACT_COL + ACT_DIM)), jnp.float32),  # 29:32
        mask_keep,                                                     # 32:36
        jnp.ones((bn, 1), jnp.float32),                                # 36
        jnp.zeros((bn, IN_COLS - (ONE_COL + 1)), jnp.float32),         # 37:40
    ]
    return jnp.concatenate(cols, axis=1)


def critic_forward(x1, x2, mask, actions, params, *, tile_b=TILE_B):
    bn = x1.shape[0]
    if x2 is None:
        # matches the PyTorch `x_2 is None` branch: object features become 0
        x2 = jnp.zeros((bn, OBJ_IN_ALL), jnp.float32)
        mask = jnp.zeros((bn, MAX_OBJ), jnp.float32)

    inp = pack_inputs(x1, x2, mask, actions)
    pad = (-bn) % tile_b
    pad_b = bn + pad
    inp = jnp.pad(inp, ((0, pad), (0, 0)))
    w_slab = pack_params(params)

    grid = (pad_b // tile_b,)

    flops_per_row = 2 * (IN_COLS * FEAT_W + GSRC_W * FEAT_W + FEAT_W * HIDDEN
                         + HIDDEN * HIDDEN + HIDDEN)
    bytes_accessed = 4 * (inp.size + w_slab.size + pad_b)

    out = pl.pallas_call(
        critic_kernel,
        out_shape=jax.ShapeDtypeStruct((pad_b, 1), jnp.float32),
        grid_spec=pltpu.PrefetchScalarGridSpec(
            num_scalar_prefetch=0,
            grid=grid,
            in_specs=[
                pl.BlockSpec((tile_b, IN_COLS), lambda i: (i, 0)),   # activations
                pl.BlockSpec((W_ROWS, W_LANES), lambda i: (0, 0)),   # weight slab (VMEM-resident)
            ],
            out_specs=pl.BlockSpec((tile_b, 1), lambda i: (i, 0)),
        ),
        compiler_params=pltpu.CompilerParams(
            dimension_semantics=("parallel",)),
        cost_estimate=pl.CostEstimate(
            flops=flops_per_row * pad_b,
            transcendentals=0,
            bytes_accessed=bytes_accessed),
    )(inp, w_slab)

    return out[:bn]


def init_params(key):
    """Deterministic PyTorch-style (uniform +/- 1/sqrt(fan_in)) init.
    Weights stored transposed: (in_features, out_features); biases (1, out)."""
    def linear(key, fan_in, fan_out):
        kw, kb = jax.random.split(key)
        bound = 1.0 / jnp.sqrt(fan_in)
        w = jax.random.uniform(kw, (fan_in, fan_out), jnp.float32, -bound, bound)
        b = jax.random.uniform(kb, (1, fan_out), jnp.float32, -bound, bound)
        return w, b

    keys = jax.random.split(key, 6)
    p = {}
    p["ws"], p["bs"]     = linear(keys[0], SELF_DIM, SELF_FEAT)      # self_encoder
    p["wo"], p["bo"]     = linear(keys[1], OBJ_DIM, OBJ_FEAT)        # object_encoder
    p["wa"], p["ba"]     = linear(keys[2], ACT_DIM, HIDDEN)          # action_encoder
    p["wh"], p["bh"]     = linear(keys[3], CONCAT_FEAT, HIDDEN)      # hidden_layer
    p["wh2"], p["bh2"]   = linear(keys[4], HIDDEN, HIDDEN)           # hidden_layer_2
    p["wout"], p["bout"] = linear(keys[5], HIDDEN, 1)                # output_layer
    return p


def critic_reference(x1, x2, mask, actions, p):
    """Pure-JAX mirror of the PyTorch forward, for verification."""
    prec = MATMUL_PRECISION
    bn = x1.shape[0]
    x1f = jax.nn.relu(jnp.dot(x1, p["ws"], precision=prec) + p["bs"])
    x2r = x2.reshape(bn * MAX_OBJ, OBJ_DIM)
    x2f = jax.nn.relu(jnp.dot(x2r, p["wo"], precision=prec) + p["bo"])
    x2f = x2f.reshape(bn, MAX_OBJ, OBJ_FEAT)
    x2f = jnp.where(mask[:, :, None] < 0.5, 0.0, x2f).reshape(bn, MAX_OBJ * OBJ_FEAT)
    feats = jnp.concatenate([x1f, x2f], axis=1)
    h = jax.nn.relu(jnp.dot(feats, p["wh"], precision=prec) + p["bh"])
    af = jax.nn.relu(jnp.dot(actions, p["wa"], precision=prec) + p["ba"])
    h = af * h
    h2 = jax.nn.relu(jnp.dot(h, p["wh2"], precision=prec) + p["bh2"])
    return jnp.dot(h2, p["wout"], precision=prec) + p["bout"]


if __name__ == "__main__":
    key = jax.random.PRNGKey(0)
    k1, k2, k3, k4, kp = jax.random.split(key, 5)
    params = init_params(kp)

    # two 128-row grid steps; batch axis is "parallel" for v7x megacore
    B = 256
    x1 = jax.random.normal(k1, (B, SELF_DIM), jnp.float32)
    x2 = jax.random.normal(k2, (B, OBJ_IN_ALL), jnp.float32)
    mask = (jax.random.uniform(k3, (B, MAX_OBJ), jnp.float32) > 0.3).astype(jnp.float32)
    actions = jax.random.normal(k4, (B, ACT_DIM), jnp.float32)

    q = critic_forward(x1, x2, mask, actions, params)
    jax.block_until_ready(q)
    q_ref = critic_reference(x1, x2, mask, actions, params)
    assert q.shape == (B, 1)
    assert jnp.allclose(q, q_ref, atol=1e-4, rtol=1e-4), (q, q_ref)

    # ragged batch (exercises the padding path: 77 -> 128 rows, 1 grid step)
    Br = 77
    qr = critic_forward(x1[:Br], x2[:Br], mask[:Br], actions[:Br], params)
    jax.block_until_ready(qr)
    assert qr.shape == (Br, 1)
    assert jnp.allclose(qr, q_ref[:Br], atol=1e-4, rtol=1e-4), (qr, q_ref[:Br])

    print("KERNEL_OK")
</pallas_src>

<mosaic_0001>
module attributes {stable_mosaic.version = 11 : i64} {
  func.func @critic_kernel(%arg0: i32, %arg1: memref<128x40xf32, #tpu.memory_space<vmem>>, %arg2: memref<200x80xf32, #tpu.memory_space<vmem>>, %arg3: memref<128x1xf32, #tpu.memory_space<vmem>>) attributes {dimension_semantics = [#tpu.dimension_semantics<parallel>], iteration_bounds = array<i64: 2>, scalar_prefetch = 0 : i64, scratch_operands = 0 : i64, tpu.core_type = #tpu.core_type<tc>, window_params = [{transform_indices = @transform_0, window_bounds = array<i64: 128, 40>}, {pipeline_mode = #tpu.pipeline_mode<synchronous>, transform_indices = @transform_1, window_bounds = array<i64: 200, 80>}, {transform_indices = @transform_2, window_bounds = array<i64: 128, 1>}]} {
    %c0 = arith.constant 0 : index
    %c0_0 = arith.constant 0 : index
    %0 = vector.load %arg2[%c0, %c0_0] : memref<200x80xf32, #tpu.memory_space<vmem>>, vector<40x80xf32>
    %c40 = arith.constant 40 : index
    %c0_1 = arith.constant 0 : index
    %1 = vector.load %arg2[%c40, %c0_1] : memref<200x80xf32, #tpu.memory_space<vmem>>, vector<8x80xf32>
    %c48 = arith.constant 48 : index
    %c0_2 = arith.constant 0 : index
    %2 = vector.load %arg2[%c48, %c0_2] : memref<200x80xf32, #tpu.memory_space<vmem>>, vector<80x32xf32>
    %c128 = arith.constant 128 : index
    %c0_3 = arith.constant 0 : index
    %3 = vector.load %arg2[%c128, %c0_3] : memref<200x80xf32, #tpu.memory_space<vmem>>, vector<32x32xf32>
    %c160 = arith.constant 160 : index
    %c0_4 = arith.constant 0 : index
    %4 = vector.load %arg2[%c160, %c0_4] : memref<200x80xf32, #tpu.memory_space<vmem>>, vector<32x1xf32>
    %c192 = arith.constant 192 : index
    %c0_5 = arith.constant 0 : index
    %5 = vector.load %arg2[%c192, %c0_5] : memref<200x80xf32, #tpu.memory_space<vmem>>, vector<1x80xf32>
    %c193 = arith.constant 193 : index
    %c0_6 = arith.constant 0 : index
    %6 = vector.load %arg2[%c193, %c0_6] : memref<200x80xf32, #tpu.memory_space<vmem>>, vector<1x32xf32>
    %c194 = arith.constant 194 : index
    %c0_7 = arith.constant 0 : index
    %7 = vector.load %arg2[%c194, %c0_7] : memref<200x80xf32, #tpu.memory_space<vmem>>, vector<1x32xf32>
    %c195 = arith.constant 195 : index
    %c0_8 = arith.constant 0 : index
    %8 = vector.load %arg2[%c195, %c0_8] : memref<200x80xf32, #tpu.memory_space<vmem>>, vector<1x1xf32>
    %c0_9 = arith.constant 0 : index
    %c0_10 = arith.constant 0 : index
    %9 = vector.load %arg1[%c0_9, %c0_10] : memref<128x40xf32, #tpu.memory_space<vmem>>, vector<128x40xf32>
    %cst = arith.constant dense<0.000000e+00> : vector<128x80xf32>
    %10 = tpu.matmul %9, %0, %cst {dimension_numbers = #tpu.dot_dimension_numbers<[1], [0], [0], [1], [0, 0, 1, 1], [], []>, precision = #tpu.contract_precision<fp32>} : vector<128x40xf32>, vector<40x80xf32>, vector<128x80xf32> -> vector<128x80xf32>
    %11 = vector.broadcast %5 : vector<1x80xf32> to vector<128x80xf32>
    %12 = arith.addf %10, %11 : vector<128x80xf32>
    %cst_11 = arith.constant 0.000000e+00 : f32
    %13 = vector.broadcast %cst_11 : f32 to vector<128x80xf32>
    %14 = arith.maximumf %12, %13 : vector<128x80xf32>
    %15 = vector.extract_strided_slice %9 {offsets = [0, 32], sizes = [128, 8], strides = [1, 1]} : vector<128x40xf32> to vector<128x8xf32>
    %cst_12 = arith.constant dense<0.000000e+00> : vector<128x80xf32>
    %16 = tpu.matmul %15, %1, %cst_12 {dimension_numbers = #tpu.dot_dimension_numbers<[1], [0], [0], [1], [0, 0, 1, 1], [], []>, precision = #tpu.contract_precision<fp32>} : vector<128x8xf32>, vector<8x80xf32>, vector<128x80xf32> -> vector<128x80xf32>
    %17 = arith.mulf %14, %16 : vector<128x80xf32>
    %18 = vector.extract_strided_slice %17 {offsets = [0, 0], sizes = [128, 32], strides = [1, 1]} : vector<128x80xf32> to vector<128x32xf32>
    %cst_13 = arith.constant dense<0.000000e+00> : vector<128x32xf32>
    %19 = tpu.matmul %17, %2, %cst_13 {dimension_numbers = #tpu.dot_dimension_numbers<[1], [0], [0], [1], [0, 0, 1, 1], [], []>, precision = #tpu.contract_precision<fp32>} : vector<128x80xf32>, vector<80x32xf32>, vector<128x32xf32> -> vector<128x32xf32>
    %20 = vector.broadcast %6 : vector<1x32xf32> to vector<128x32xf32>
    %21 = arith.addf %19, %20 : vector<128x32xf32>
    %cst_14 = arith.constant 0.000000e+00 : f32
    %22 = vector.broadcast %cst_14 : f32 to vector<128x32xf32>
    %23 = arith.maximumf %21, %22 : vector<128x32xf32>
    %24 = arith.mulf %18, %23 : vector<128x32xf32>
    %cst_15 = arith.constant dense<0.000000e+00> : vector<128x32xf32>
    %25 = tpu.matmul %24, %3, %cst_15 {dimension_numbers = #tpu.dot_dimension_numbers<[1], [0], [0], [1], [0, 0, 1, 1], [], []>, precision = #tpu.contract_precision<fp32>} : vector<128x32xf32>, vector<32x32xf32>, vector<128x32xf32> -> vector<128x32xf32>
    %26 = vector.broadcast %7 : vector<1x32xf32> to vector<128x32xf32>
    %27 = arith.addf %25, %26 : vector<128x32xf32>
    %cst_16 = arith.constant 0.000000e+00 : f32
    %28 = vector.broadcast %cst_16 : f32 to vector<128x32xf32>
    %29 = arith.maximumf %27, %28 : vector<128x32xf32>
    %cst_17 = arith.constant dense<0.000000e+00> : vector<128x1xf32>
    %30 = tpu.matmul %29, %4, %cst_17 {dimension_numbers = #tpu.dot_dimension_numbers<[1], [0], [0], [1], [0, 0, 1, 1], [], []>, precision = #tpu.contract_precision<fp32>} : vector<128x32xf32>, vector<32x1xf32>, vector<128x1xf32> -> vector<128x1xf32>
    %31 = vector.broadcast %8 : vector<1x1xf32> to vector<128x1xf32>
    %32 = arith.addf %30, %31 : vector<128x1xf32>
    %c0_18 = arith.constant 0 : index
    %c0_19 = arith.constant 0 : index
    %33 = vector.load %arg3[%c0_18, %c0_19] : memref<128x1xf32, #tpu.memory_space<vmem>>, vector<128x1xf32>
    tpu.vector_store %arg3[%c0_18, %c0_19], %32 {strides = array<i32>} : memref<128x1xf32, #tpu.memory_space<vmem>>, vector<128x1xf32>,
    return
  }
  func.func @transform_0(%arg0: i32) -> (i32, i32) {
    %c0_i32 = arith.constant 0 : i32
    %c0_i32_0 = arith.constant 0 : i32
    return %arg0, %c0_i32 : i32, i32
  }
  func.func @transform_1(%arg0: i32) -> (i32, i32) {
    %c0_i32 = arith.constant 0 : i32
    %c0_i32_0 = arith.constant 0 : i32
    %c0_i32_1 = arith.constant 0 : i32
    return %c0_i32, %c0_i32_0 : i32, i32
  }
  func.func @transform_2(%arg0: i32) -> (i32, i32) {
    %c0_i32 = arith.constant 0 : i32
    %c0_i32_0 = arith.constant 0 : i32
    return %arg0, %c0_i32 : i32, i32
  }
}

</mosaic_0001>

<bundles_post_ra>
// kernel: tpu_custom_call.1
= control target key start
LH: loop header
LB: loop body
LE: loop exit
PB: predicated region body
PF: predicated region fallthrough
CT: control target
= control target key end

     0   :  { %s3968_s9 = smov 0   ;;  %s5713_s0 = inlined_call_operand.vmem [shape: f32[256,40], index: 0, kind: input, shape index: {}]   ;;  %s5714_s1 = inlined_call_operand.vmem [shape: f32[200,80], index: 1, kind: input, shape index: {}]   ;;  %s5715_s2 = inlined_call_operand.vmem [shape: f32[256,1], index: 2, kind: output, shape index: {}]  }
   0x1 LB: > { %s3910_s10 = sadd.s32 4294967295, %s3950_s9   ;;  %p3914_p0 = scmp.ge.s32.totalorder %s3950_s9, 1  ;;  %s3950_s9 = sphi %s3968_s9, %s12_s9  }
   0x2   : > { %p113_p1 = scmp.lt.s32.totalorder %s3950_s9, 3 }
   0x4   : > { %p114_p2 = pnand %p3914_p0, %p113_p1 }
   0x6   : > { %117 = sbr.rel (%p114_p2) target bundleno = 1429 (0x595), region = 28 }
   0xb   : > { %v151_v0 = vld [vmem:[%s5714_s1 + $0x20] sm:$0xff]  ;;  %v150_v1 = vld [vmem:[%s5714_s1 + $0x18] sm:$0xff]  ;;  %v149_v2 = vld [vmem:[%s5714_s1 + $0x10] sm:$0xff]  ;;  %s3915_s17 = sshll.u32 %s3910_s10, 4  ;;  %vm192_vm0 = vcmask 326656   ;;  %s3952_s26 = smov 96  }
   0xc   : > { %v3985_v3 = vand.u32 4294901760, %v151_v0  ;;  %v3987_v4 = vand.u32 4294901760, %v150_v1  ;;  %v3989_v5 = vand.u32 4294901760, %v149_v2  ;;  %v148_v6 = vld [vmem:[%s5714_s1 + $0x8] sm:$0xff]  ;;  %v147_v7 = vld [vmem:[%s5714_s1] sm:$0xff]  ;;  %p136_p3 = scmp.lt.s32.totalorder %s3915_s17, 31 }
   0xd   : > { %v3997_v8 = vand.u32 4294901760, %v148_v6  ;;  %v3999_v9 = vand.u32 4294901760, %v147_v7  ;;  %vm952_vm1 = vcmask 64512   ;;  %vm1613_vm2 = vcmask 654336  }
   0xe   : > { %253 = vmatpush.msra.mxu0 %v3985_v3  ;;  %3921 = vmatpush.msra.mxu2 %v3985_v3  ;;  %v403_v10 = vsub.f32 %v151_v0, %v3985_v3  ;;  %v4005_v11 = vsub.f32 %v150_v1, %v3987_v4  ;;  %v4008_v12 = vsub.f32 %v149_v2, %v3989_v5  ;;  %s5789_s17 = smov (!%p136_p3, %s3915_s17), 31  ;;  %vm2423_vm3 = vcmask 261120  }
   0xf   : > { %v4013_v13 = vsub.f32 %v148_v6, %v3997_v8  ;;  %v4016_v14 = vsub.f32 %v147_v7, %v3999_v9  ;;  %s3916_s22 = sshll.u32 %s5789_s17, 3  ;;  %vm3837_vm4 = vcmask 7168  }
  0x10   : > { %v404_v15 = vand.u32 4294901760, %v403_v10  ;;  %255 = vmatpush.msra.mxu0 %v3987_v4  ;;  %3922 = vmatpush.msra.mxu2 %v3987_v4  ;;  %v410_v16 = vand.u32 4294901760, %v4005_v11  ;;  %v416_v17 = vand.u32 4294901760, %v4008_v12  ;;  %s4029_s25 = scalar_lea.vmem %s5713_s0, %s3916_s22 }
  0x11   : > { %v422_v18 = vand.u32 4294901760, %v4013_v13  ;;  %v428_v19 = vand.u32 4294901760, %v4016_v14  ;;  %v175_v23 = vld [vmem:[%s4029_s25] sm:$0xff]  ;;  %v4043_v25 = vld [vmem:[%s4029_s25 + $0x8] sm:$0xff]  ;;  %v177_v33 = vld [vmem:[%s4029_s25 + $0x10] sm:$0xff] }
  0x12   : > { %v405_v20 = vsub.f32 %v403_v10, %v404_v15  ;;  %v411_v21 = vsub.f32 %v4005_v11, %v410_v16  ;;  %257 = vmatpush.msra.mxu0 %v3989_v5  ;;  %3923 = vmatpush.msra.mxu2 %v3989_v5  ;;  %v417_v22 = vsub.f32 %v4008_v12, %v416_v17  ;;  %v4040_v24 = vld [vmem:[%s4029_s25 + $0x40] sm:$0xff]  ;;  %v194_v26 = vsel %vm192_vm0, %v175_v23, 0  ;;  %v4049_v28 = vld [vmem:[%s4029_s25 + $0x48] sm:$0xff]  ;;  %v4068_v37 = vld [vmem:[%s4029_s25 + $0x50] sm:$0xff] }
  0x13   : > { %v218_v27 = vsel %vm192_vm0, %v4040_v24, 0  ;;  %920 = vrot.lane.b32.xlu0 %v175_v23, %s3952_s26  ;;  %v423_v31 = vsub.f32 %v4013_v13, %v422_v18  ;;  %v4057_v32 = vand.u32 4294901760, %v194_v26  ;;  %v429_v35 = vsub.f32 %v4016_v14, %v428_v19  ;;  %924 = vrot.lane.b32.xlu1 %v177_v33, %s3952_s26  ;;  %v178_v59 = vld [vmem:[%s4029_s25 + $0x18] sm:$0xff] }
  0x14   : > { %v406_v29 = vand.u32 4294901760, %v405_v20  ;;  %v412_v30 = vand.u32 4294901760, %v411_v21  ;;  %259 = vmatpush.msra.mxu0 %v3997_v8  ;;  %3924 = vmatpush.msra.mxu2 %v3997_v8  ;;  %v4060_v34 = vand.u32 4294901760, %v218_v27  ;;  %v197_v36 = vsel %vm192_vm0, %v4043_v25, 0  ;;  %v4111_v61 = vld [vmem:[%s4029_s25 + $0x58] sm:$0xff] }
  0x15   : > { %v418_v38 = vand.u32 4294901760, %v417_v22  ;;  %v4072_v39 = vsub.f32 %v194_v26, %v4057_v32  ;;  %v4074_v40 = vand.u32 4294901760, %v197_v36  ;;  %v221_v41 = vsel %vm192_vm0, %v4049_v28, 0 }
  0x16   : > { %407 = vmatpush.msra.mxu1 %v406_v29  ;;  %3926 = vmatpush.msra.mxu3 %v406_v29  ;;  %v4081_v42 = vsub.f32 %v218_v27, %v4060_v34  ;;  %v4083_v43 = vand.u32 4294901760, %v221_v41  ;;  %v200_v44 = vsel %vm192_vm0, %v177_v33, 0  ;;  %v424_v45 = vand.u32 4294901760, %v423_v31  ;;  %v180_v27 = vld [vmem:[%s4029_s25 + $0x28] sm:$0xff]  ;;  %v181_v29 = vld [vmem:[%s4029_s25 + $0x30] sm:$0xff] }
  0x17   : > { %261 = vmatpush.msra.mxu0 %v3999_v9  ;;  %3925 = vmatpush.msra.mxu2 %v3999_v9  ;;  %v264_v46 = vand.u32 4294901760, %v4072_v39  ;;  %v4088_v47 = vsub.f32 %v197_v36, %v4074_v40  ;;  %v224_v48 = vsel %vm192_vm0, %v4068_v37, 0  ;;  %v430_v52 = vand.u32 4294901760, %v429_v35 }
  0x18   : > { %413 = vmatpush.msra.mxu1 %v412_v30  ;;  %3927 = vmatpush.msra.mxu3 %v412_v30  ;;  %v328_v49 = vand.u32 4294901760, %v4081_v42  ;;  %v4094_v50 = vsub.f32 %v221_v41, %v4083_v43  ;;  %v4100_v54 = vand.u32 4294901760, %v200_v44  ;;  %v4107_v57 = vand.u32 4294901760, %v224_v48 }
  0x19   : > { %510 = vmatpush.msrb.mxu2 %v403_v10  ;;  %736 = vmatpush.msrb.mxu0 %v404_v15  ;;  %v265_v51 = vsub.f32 %v4072_v39, %v264_v46  ;;  %v272_v53 = vand.u32 4294901760, %v4088_v47  ;;  %v203_v2 = vsel %vm192_vm0, %v178_v59, 0  ;;  %v227_v6 = vsel %vm192_vm0, %v4111_v61, 0 }
  0x1a   : > { %419 = vmatpush.msra.mxu1 %v418_v38  ;;  %3928 = vmatpush.msra.mxu3 %v418_v38  ;;  %v329_v55 = vsub.f32 %v4081_v42, %v328_v49  ;;  %v336_v56 = vand.u32 4294901760, %v4094_v50  ;;  %v4120_v63 = vsub.f32 %v200_v44, %v4100_v54  ;;  %v4126_v1 = vsub.f32 %v224_v48, %v4107_v57  ;;  %v182_v38 = vld [vmem:[%s4029_s25 + $0x38] sm:$0xff] }
  0x1b   : > { %513 = vmatpush.msrb.mxu2 %v4005_v11  ;;  %740 = vmatpush.msrb.mxu0 %v410_v16  ;;  %v266_v58 = vand.u32 4294901760, %v265_v51  ;;  %v273_v62 = vsub.f32 %v4088_v47, %v272_v53  ;;  %v4136_v11 = vand.u32 4294901760, %v203_v2  ;;  %v4143_v16 = vand.u32 4294901760, %v227_v6 }
  0x1c   : > { %425 = vmatpush.msra.mxu1 %v424_v45  ;;  %3929 = vmatpush.msra.mxu3 %v424_v45  ;;  %v330_v60 = vand.u32 4294901760, %v329_v55  ;;  %v337_v0 = vsub.f32 %v4094_v50, %v336_v56  ;;  %v280_v10 = vand.u32 4294901760, %v4120_v63  ;;  %v344_v15 = vand.u32 4294901760, %v4126_v1  ;;  %v189_v55 = vld [vmem:[%s4029_s25 + $0x70] sm:$0xff] }
  0x1d   : > { %516 = vmatpush.msrb.mxu2 %v4008_v12  ;;  %744 = vmatpush.msrb.mxu0 %v416_v17  ;;  %v274_v7 = vand.u32 4294901760, %v273_v62  ;;  %v179_v17 = vld [vmem:[%s4029_s25 + $0x20] sm:$0xff]  ;;  %v209_v35 = vsel %vm192_vm0, %v180_v27, 0 }
  0x1e   : > { %267 = vmatmul.f32.vlgmr.msra.gmra.mxu0 %v266_v58  ;;  %431 = vmatpush.msra.mxu1 %v430_v52  ;;  %v338_v12 = vand.u32 4294901760, %v337_v0  ;;  %v4208_v45 = vand.u32 4294901760, %v209_v35  ;;  %v212_v0 = vsel %vm192_vm0, %v181_v29, 0 }
  0x1f   : > { %331 = vmatmul.f32.vlgmr.msra.gmra.mxu2 %v330_v60  ;;  %3930 = vmatpush.msra.mxu3 %v430_v52 }
  0x20   : > { %433 = vmatmul.f32.vlgmr.msra.gmra.mxu1 %v4057_v32  ;;  %465 = vmatmul.f32.vlgmr.msra.gmra.mxu3 %v4060_v34 }
  0x21   : > { %616 = vmatpush.msrb.mxu3 %v3985_v3  ;;  %519 = vmatpush.msrb.mxu2 %v4013_v13  ;;  %v281_v13 = vsub.f32 %v4120_v63, %v280_v10 }
  0x22   : > { %830 = vmatpush.msrb.mxu1 %v3985_v3  ;;  %748 = vmatpush.msrb.mxu0 %v422_v18  ;;  %v4152_v3 = vld [vmem:[%s4029_s25 + $0x60] sm:$0xff]  ;;  %v4160_v18 = vsub.f32 %v203_v2, %v4136_v11 }
  0x23   : > { %618 = vmatpush.msrb.mxu3 %v3987_v4  ;;  %522 = vmatpush.msrb.mxu2 %v4016_v14  ;;  %v4167_v14 = vsub.f32 %v227_v6, %v4143_v16  ;;  %v282_v20 = vand.u32 4294901760, %v281_v13 }
  0x24   : > { %832 = vmatpush.msrb.mxu1 %v3987_v4  ;;  %752 = vmatpush.msrb.mxu0 %v428_v19  ;;  %v345_v4 = vsub.f32 %v4126_v1, %v344_v15  ;;  %v206_v19 = vsel %vm192_vm0, %v179_v17, 0  ;;  %v288_v21 = vand.u32 4294901760, %v4160_v18 }
  0x25   : > { %620 = vmatpush.msrb.mxu3 %v3989_v5  ;;  %922 = vrot.lane.b32.xlu0 %v4043_v25, %s3952_s26  ;;  %v4178_v22 = vand.u32 4294901760, %v206_v19  ;;  %v352_v25 = vand.u32 4294901760, %v4167_v14 }
  0x26   : > { %275 = vmatmul.f32.gmra.mxu0 %v274_v7  ;;  %834 = vmatpush.msrb.mxu1 %v3989_v5  ;;  %v230_v5 = vsel %vm192_vm0, %v4152_v3, 0  ;;  %v346_v23 = vand.u32 4294901760, %v345_v4  ;;  %v289_v30 = vsub.f32 %v4160_v18, %v288_v21  ;;  %v4235_v7 = vand.u32 4294901760, %v212_v0  ;;  %v190_v4 = vld [vmem:[%s4029_s25 + $0x78] sm:$0xff] }
  0x27   : > { %339 = vmatmul.f32.gmra.mxu2 %v338_v12  ;;  %622 = vmatpush.msrb.mxu3 %v3997_v8  ;;  %v4183_v26 = vand.u32 4294901760, %v230_v5  ;;  %v4194_v31 = vsub.f32 %v206_v19, %v4178_v22  ;;  %v353_v33 = vsub.f32 %v4167_v14, %v352_v25 }
  0x28   : > { %437 = vmatmul.f32.gmra.mxu1 %v4074_v40  ;;  %469 = vmatmul.f32.gmra.mxu3 %v4083_v43  ;;  %v290_v41 = vand.u32 4294901760, %v289_v30 }
  0x29   : > { %624 = vmatpush.msrb.mxu3 %v3999_v9  ;;  %836 = vmatpush.msrb.mxu1 %v3997_v8  ;;  %v188_v8 = vld [vmem:[%s4029_s25 + $0x68] sm:$0xff]  ;;  %v296_v44 = vand.u32 4294901760, %v4194_v31  ;;  %v354_v48 = vand.u32 4294901760, %v353_v33  ;;  %s5650_s25 = scalar_lea.vmem %s5715_s2, %s3916_s22 }
  0x2a   : > { %926 = vrot.lane.b32.xlu1 %v178_v59, %s3952_s26  ;;  %928 = vrot.lane.b32.xlu2 %v179_v17, %s3952_s26  ;;  %v233_v36 = vsel %vm192_vm0, %v188_v8, 0  ;;  %v4222_v59 = vsub.f32 %v209_v35, %v4208_v45 }
  0x2b   : > { %838 = vmatpush.msrb.mxu1 %v3999_v9  ;;  %v4200_v9 = vsub.f32 %v230_v5, %v4183_v26  ;;  %v4213_v52 = vand.u32 4294901760, %v233_v36  ;;  %v297_v58 = vsub.f32 %v4194_v31, %v296_v44  ;;  %v4251_v5 = vsub.f32 %v212_v0, %v4235_v7 }
  0x2c   : > { %v304_v6 = vand.u32 4294901760, %v4222_v59 }
  0x2d   : > { %932 = vrot.lane.b32.xlu0 %v181_v29, %s3952_s26  ;;  %v360_v51 = vand.u32 4294901760, %v4200_v9  ;;  %v4228_v62 = vsub.f32 %v233_v36, %v4213_v52  ;;  %v298_v2 = vand.u32 4294901760, %v297_v58  ;;  %v312_v30 = vand.u32 4294901760, %v4251_v5 }
  0x2e   : > { %283 = vmatmul.f32.gmra.mxu0 %v282_v20  ;;  %v305_v19 = vsub.f32 %v4222_v59, %v304_v6  ;;  %v215_v20 = vsel %vm192_vm0, %v182_v38, 0 }
  0x2f   : > { %347 = vmatmul.f32.gmra.mxu2 %v346_v23  ;;  %v361_v60 = vsub.f32 %v4200_v9, %v360_v51  ;;  %v368_v17 = vand.u32 4294901760, %v4228_v62  ;;  %v239_v23 = vsel %vm192_vm0, %v190_v4, 0  ;;  %v4267_v33 = vand.u32 4294901760, %v215_v20 }
  0x30   : > { %441 = vmatmul.f32.gmra.mxu1 %v4100_v54  ;;  %473 = vmatmul.f32.gmra.mxu3 %v4107_v57  ;;  %v306_v29 = vand.u32 4294901760, %v305_v19  ;;  %v313_v58 = vsub.f32 %v4251_v5, %v312_v30 }
  0x31   : > { %v362_v12 = vand.u32 4294901760, %v361_v60 }
  0x32   : > { %934 = vrot.lane.b32.xlu1 %v182_v38, %s3952_s26  ;;  %930 = vrot.lane.b32.xlu2 %v180_v27, %s3952_s26 }
  0x35   : > { %938 = vrot.lane.b32.xlu0 %v4049_v28, %s3952_s26  ;;  %v236_v28 = vsel %vm192_vm0, %v189_v55, 0 }
  0x36   : > { %291 = vmatmul.f32.gmra.mxu0 %v290_v41  ;;  %v4242_v13 = vand.u32 4294901760, %v236_v28  ;;  %v4271_v41 = vand.u32 4294901760, %v239_v23 }
  0x37   : > { %355 = vmatmul.f32.gmra.mxu2 %v354_v48 }
  0x38   : > { %445 = vmatmul.f32.gmra.mxu1 %v4136_v11  ;;  %477 = vmatmul.f32.gmra.mxu3 %v4143_v16 }
  0x3a   : > { %940 = vrot.lane.b32.xlu1 %v4068_v37, %s3952_s26  ;;  %936 = vrot.lane.b32.xlu2 %v4040_v24, %s3952_s26  ;;  %v369_v24 = vsub.f32 %v4228_v62, %v368_v17  ;;  %v4257_v37 = vsub.f32 %v236_v28, %v4242_v13 }
  0x3c   : > { %v370_v36 = vand.u32 4294901760, %v369_v24  ;;  %v376_v38 = vand.u32 4294901760, %v4257_v37 }
  0x3d   : > { %944 = vrot.lane.b32.xlu0 %v4152_v3, %s3952_s26  ;;  %v152_v3 = vld [vmem:[%s5714_s1 + $0x28] sm:$0xff] }
  0x3e   : > { %299 = vmatmul.f32.gmra.mxu0 %v298_v2  ;;  %v1000_v27 = vand.u32 4294901760, %v152_v3  ;;  %v377_v0 = vsub.f32 %v4257_v37, %v376_v38  ;;  %v314_v2 = vand.u32 4294901760, %v313_v58 }
  0x3f   : > { %363 = vmatmul.f32.gmra.mxu2 %v362_v12 }
  0x40   : > { %449 = vmatmul.f32.gmra.mxu1 %v4178_v22  ;;  %481 = vmatmul.f32.gmra.mxu3 %v4183_v26  ;;  %v1147_v35 = vsub.f32 %v152_v3, %v1000_v27 }
  0x41   : > { %1001 = vmatpush.msra.mxu2 %v1000_v27  ;;  %1332 = vmatpush.msra.mxu1 %v1000_v27 }
  0x42   : > { %946 = vrot.lane.b32.xlu1 %v188_v8, %s3952_s26  ;;  %942 = vrot.lane.b32.xlu2 %v4111_v61, %s3952_s26  ;;  %v1148_v48 = vand.u32 4294901760, %v1147_v35  ;;  %v319_v8 = vsub.f32 %v215_v20, %v4267_v33  ;;  %v4284_v61 = vsub.f32 %v239_v23, %v4271_v41 }
  0x43   : > { %1234 = vmatpush.msra.mxu0 %v1147_v35 }
  0x44   : > { %v1149_v60 = vsub.f32 %v1147_v35, %v1148_v48  ;;  %v320_v12 = vand.u32 4294901760, %v319_v8  ;;  %v384_v19 = vand.u32 4294901760, %v4284_v61 }
  0x45   : > { %950 = vrot.lane.b32.xlu0 %v190_v4, %s3952_s26  ;;  %v378_v4 = vand.u32 4294901760, %v377_v0 }
  0x46   : > { %307 = vmatmul.f32.gmra.mxu0 %v306_v29  ;;  %v1150_v28 = vand.u32 4294901760, %v1149_v60  ;;  %v321_v24 = vsub.f32 %v319_v8, %v320_v12  ;;  %v385_v20 = vsub.f32 %v4284_v61, %v384_v19 }
  0x47   : > { %371 = vmatmul.f32.gmra.mxu2 %v370_v36 }
  0x48   : > { %453 = vmatmul.f32.gmra.mxu1 %v4208_v45  ;;  %485 = vmatmul.f32.gmra.mxu3 %v4213_v52  ;;  %v322_v3 = vand.u32 4294901760, %v321_v24  ;;  %v386_v23 = vand.u32 4294901760, %v385_v20 }
  0x49   : > { %1151 = vmatpush.msra.mxu3 %v1150_v28 }
  0x4a   : > { %948 = vrot.lane.b32.xlu2 %v189_v55, %s3952_s26 }
  0x4e   : > { %315 = vmatmul.f32.gmra.mxu0 %v314_v2 }
  0x4f   : > { %379 = vmatmul.f32.gmra.mxu2 %v378_v4 }
  0x50   : > { %457 = vmatmul.f32.gmra.mxu1 %v4235_v7  ;;  %489 = vmatmul.f32.gmra.mxu3 %v4242_v13 }
  0x56   : > { %323 = vmatmul.f32.gmra.mxu0 %v322_v3 }
  0x57   : > { %387 = vmatmul.f32.gmra.mxu2 %v386_v23 }
  0x58   : > { %461 = vmatmul.f32.gmra.mxu1 %v4267_v33  ;;  %493 = vmatmul.f32.gmra.mxu3 %v4271_v41 }
  0x5e   : > { %754 = vmatmul.f32.vlgmr.msrb.gmra.mxu0 %v4057_v32 }
  0x5f   : > { %525 = vmatmul.f32.vlgmr.msrb.gmra.mxu2 %v4072_v39 }
  0x60   : > { %628 = vmatmul.f32.vlgmr.msrb.gmra.mxu3 %v264_v46  ;;  %840 = vmatmul.f32.vlgmr.msrb.gmra.mxu1 %v4057_v32 }
  0x61   : > { %1448 = vmatpush.msrb.mxu2 %v1148_v48  ;;  %1530 = vmatpush.msrb.mxu3 %v1000_v27 }
  0x66   : > { %758 = vmatmul.f32.gmra.mxu0 %v4074_v40 }
  0x67   : > { %530 = vmatmul.f32.gmra.mxu2 %v4088_v47 }
  0x68   : > { %634 = vmatmul.f32.gmra.mxu3 %v272_v53  ;;  %844 = vmatmul.f32.gmra.mxu1 %v4074_v40  ;;  %v4342_v40 = vld [vmem:[%s5714_s1 + $0xc0] ss:$0 sm:$0xff] }
  0x6e   : > { %762 = vmatmul.f32.gmra.mxu0 %v4100_v54 }
  0x6f   : > { %535 = vmatmul.f32.gmra.mxu2 %v4120_v63 }
  0x70   : > { %640 = vmatmul.f32.gmra.mxu3 %v280_v10  ;;  %848 = vmatmul.f32.gmra.mxu1 %v4100_v54 }
  0x76   : > { %766 = vmatmul.f32.gmra.mxu0 %v4136_v11 }
  0x77   : > { %540 = vmatmul.f32.gmra.mxu2 %v4160_v18 }
  0x78   : > { %646 = vmatmul.f32.gmra.mxu3 %v288_v21  ;;  %852 = vmatmul.f32.gmra.mxu1 %v4136_v11 }
  0x7e   : > { %770 = vmatmul.f32.gmra.mxu0 %v4178_v22 }
  0x7f   : > { %545 = vmatmul.f32.gmra.mxu2 %v4194_v31 }
  0x80   : > { %652 = vmatmul.f32.gmra.mxu3 %v296_v44  ;;  %856 = vmatmul.f32.gmra.mxu1 %v4178_v22 }
  0x85   : > { %v921_v27 = vpop.permute.xlu0 %920 }
  0x86   : > { %774 = vmatmul.f32.gmra.mxu0 %v4208_v45 }
  0x87   : > { %550 = vmatmul.f32.gmra.mxu2 %v4222_v59 }
  0x88   : > { %658 = vmatmul.f32.gmra.mxu3 %v304_v6  ;;  %860 = vmatmul.f32.gmra.mxu1 %v4208_v45 }
  0x8e   : > { %778 = vmatmul.f32.gmra.mxu0 %v4235_v7 }
  0x8f   : > { %555 = vmatmul.f32.gmra.mxu2 %v4251_v5 }
  0x90   : > { %664 = vmatmul.f32.gmra.mxu3 %v312_v30  ;;  %864 = vmatmul.f32.gmra.mxu1 %v4235_v7 }
  0x96   : > { %782 = vmatmul.f32.gmra.mxu0 %v4267_v33 }
  0x97   : > { %560 = vmatmul.f32.gmra.mxu2 %v319_v8 }
  0x98   : > { %670 = vmatmul.f32.gmra.mxu3 %v320_v12  ;;  %868 = vmatmul.f32.gmra.mxu1 %v4267_v33 }
  0x9b   : > { %v4334_v32 = vpop.f32.mrf.mxu0 }
  0x9c   : > { %v269_v20 = vadd.f32 %v4342_v40, %v4334_v32 }
  0x9d   : > { %v4336_v39 = vpop.f32.mrf.mxu1 }
  0x9e   : > { %786 = vmatmul.f32.gmra.mxu0 %v4060_v34 }
  0x9f   : > { %565 = vmatmul.f32.gmra.mxu2 %v4081_v42 }
  0xa0   : > { %676 = vmatmul.f32.gmra.mxu3 %v328_v49  ;;  %872 = vmatmul.f32.gmra.mxu1 %v4060_v34 }
  0xa2   : > { %v332_v46 = vpop.f32.mrf.mxu2 }
  0xa3   : > { %v333_v47 = vadd.f32 %v4342_v40, %v332_v46  ;;  %v466_v53 = vpop.f32.mrf.mxu3  ;;  %v4349_v54 = vpop.f32.mrf.mxu0 }
  0xa5   : > { %v4351_v63 = vadd.f32 %v466_v53, %v333_v47  ;;  %v4353_v10 = vpop.f32.mrf.mxu1 }
  0xa6   : > { %790 = vmatmul.f32.gmra.mxu0 %v4083_v43 }
  0xa7   : > { %570 = vmatmul.f32.gmra.mxu2 %v4094_v50 }
  0xa8   : > { %682 = vmatmul.f32.gmra.mxu3 %v336_v56  ;;  %876 = vmatmul.f32.gmra.mxu1 %v4083_v43 }
  0xaa   : > { %v340_v34 = vpop.f32.mrf.mxu2 }
  0xab   : > { %v341_v42 = vadd.f32 %v4342_v40, %v340_v34  ;;  %v470_v49 = vpop.f32.mrf.mxu3  ;;  %v4361_v11 = vpop.f32.mrf.mxu0 }
  0xad   : > { %v4363_v18 = vadd.f32 %v470_v49, %v341_v42  ;;  %v4365_v21 = vpop.f32.mrf.mxu1 }
  0xae   : > { %794 = vmatmul.f32.gmra.mxu0 %v4107_v57 }
  0xaf   : > { %575 = vmatmul.f32.gmra.mxu2 %v4126_v1 }
  0xb0   : > { %688 = vmatmul.f32.gmra.mxu3 %v344_v15  ;;  %880 = vmatmul.f32.gmra.mxu1 %v4107_v57 }
  0xb2   : > { %v348_v43 = vpop.f32.mrf.mxu2 }
  0xb3   : > { %v349_v50 = vadd.f32 %v4342_v40, %v348_v43  ;;  %v474_v56 = vpop.f32.mrf.mxu3  ;;  %v4373_v22 = vpop.f32.mrf.mxu0 }
  0xb5   : > { %v4375_v31 = vadd.f32 %v474_v56, %v349_v50  ;;  %v4377_v44 = vpop.f32.mrf.mxu1  ;;  %v277_v56 = vadd.f32 %v4342_v40, %v4349_v54 }
  0xb6   : > { %798 = vmatmul.f32.gmra.mxu0 %v4143_v16 }
  0xb7   : > { %580 = vmatmul.f32.gmra.mxu2 %v4167_v14 }
  0xb8   : > { %694 = vmatmul.f32.gmra.mxu3 %v352_v25  ;;  %884 = vmatmul.f32.gmra.mxu1 %v4143_v16 }
  0xba   : > { %v356_v57 = vpop.f32.mrf.mxu2 }
  0xbb   : > { %v357_v1 = vadd.f32 %v4342_v40, %v356_v57  ;;  %v478_v15 = vpop.f32.mrf.mxu3  ;;  %v4385_v45 = vpop.f32.mrf.mxu0 }
  0xbd   : > { %v4387_v55 = vadd.f32 %v478_v15, %v357_v1  ;;  %v4389_v59 = vpop.f32.mrf.mxu1 }
  0xbe   : > { %802 = vmatmul.f32.gmra.mxu0 %v4183_v26 }
  0xbf   : > { %585 = vmatmul.f32.gmra.mxu2 %v4200_v9  ;;  %v953_v9 = vsel %vm952_vm1, %v921_v27, 0 }
  0xc0   : > { %700 = vmatmul.f32.gmra.mxu3 %v360_v51  ;;  %888 = vmatmul.f32.gmra.mxu1 %v4183_v26  ;;  %v4416_v36 = vand.u32 4294901760, %v953_v9 }
  0xc2   : > { %v364_v16 = vpop.f32.mrf.mxu2 }
  0xc3   : > { %v365_v14 = vadd.f32 %v4342_v40, %v364_v16  ;;  %v482_v25 = vpop.f32.mrf.mxu3  ;;  %v4397_v6 = vpop.f32.mrf.mxu0 }
  0xc5   : > { %v4399_v7 = vadd.f32 %v482_v25, %v365_v14  ;;  %v4401_v5 = vpop.f32.mrf.mxu1 }
  0xc6   : > { %806 = vmatmul.f32.gmra.mxu0 %v4213_v52 }
  0xc7   : > { %590 = vmatmul.f32.gmra.mxu2 %v4228_v62  ;;  %v923_v62 = vpop.permute.xlu0 %922 }
  0xc8   : > { %706 = vmatmul.f32.gmra.mxu3 %v368_v17  ;;  %892 = vmatmul.f32.gmra.mxu1 %v4213_v52  ;;  %v1003_v52 = vsub.f32 %v953_v9, %v4416_v36  ;;  %v955_v48 = vsel %vm952_vm1, %v923_v62, 0  ;;  %v439_v9 = vadd.f32 %v4353_v10, %v277_v56 }
  0xc9   : > { %v4432_v12 = vand.u32 4294901760, %v955_v48 }
  0xca   : > { %v372_v26 = vpop.f32.mrf.mxu2  ;;  %v1004_v0 = vand.u32 4294901760, %v1003_v52 }
  0xcb   : > { %v373_v51 = vadd.f32 %v4342_v40, %v372_v26  ;;  %v486_v29 = vpop.f32.mrf.mxu3  ;;  %v4410_v30 = vpop.f32.mrf.mxu0 }
  0xcc   : > { %v929_v26 = vpop.permute.xlu2 %928 }
  0xcd   : > { %v4412_v33 = vadd.f32 %v486_v29, %v373_v51  ;;  %v4414_v35 = vpop.f32.mrf.mxu1 }
  0xce   : > { %810 = vmatmul.f32.gmra.mxu0 %v4242_v13 }
  0xcf   : > { %595 = vmatmul.f32.gmra.mxu2 %v4257_v37  ;;  %v925_v37 = vpop.permute.xlu1 %924 }
  0xd0   : > { %712 = vmatmul.f32.gmra.mxu3 %v376_v38  ;;  %896 = vmatmul.f32.gmra.mxu1 %v4242_v13  ;;  %v1005_v13 = vsub.f32 %v1003_v52, %v1004_v0  ;;  %v1011_v38 = vsub.f32 %v955_v48, %v4432_v12  ;;  %v957_v24 = vsel %vm952_vm1, %v925_v37, 0  ;;  %v285_v48 = vadd.f32 %v4342_v40, %v4361_v11 }
  0xd2   : > { %v380_v17 = vpop.f32.mrf.mxu2  ;;  %v1006_v47 = vand.u32 4294901760, %v1005_v13  ;;  %v1012_v53 = vand.u32 4294901760, %v1011_v38 }
  0xd3   : > { %v381_v58 = vadd.f32 %v4342_v40, %v380_v17  ;;  %v490_v8 = vpop.f32.mrf.mxu3  ;;  %v4426_v60 = vpop.f32.mrf.mxu0  ;;  %v961_v17 = vsel %vm952_vm1, %v929_v26, 0  ;;  %v301_v26 = vadd.f32 %v4342_v40, %v4385_v45 }
  0xd4   : > { %v1013_v49 = vsub.f32 %v1011_v38, %v1012_v53  ;;  %v4464_v13 = vand.u32 4294901760, %v961_v17 }
  0xd5   : > { %v4428_v28 = vadd.f32 %v490_v8, %v381_v58  ;;  %v4430_v2 = vpop.f32.mrf.mxu1 }
  0xd6   : > { %814 = vmatmul.f32.gmra.mxu0 %v4271_v41  ;;  %v1014_v27 = vand.u32 4294901760, %v1013_v49  ;;  %v1035_v11 = vsub.f32 %v961_v17, %v4464_v13  ;;  %v451_v17 = vadd.f32 %v4389_v59, %v301_v26 }
  0xd7   : > { %600 = vmatmul.f32.gmra.mxu2 %v4284_v61  ;;  %v927_v42 = vpop.permute.xlu1 %926 }
  0xd8   : > { %718 = vmatmul.f32.gmra.mxu3 %v384_v19  ;;  %900 = vmatmul.f32.gmra.mxu1 %v4271_v41  ;;  %v4446_v19 = vand.u32 4294901760, %v957_v24  ;;  %v435_v41 = vadd.f32 %v4336_v39, %v269_v20  ;;  %v959_v50 = vsel %vm952_vm1, %v927_v42, 0 }
  0xd9   : > { %v4454_v25 = vand.u32 4294901760, %v959_v50 }
  0xda   : > { %v388_v4 = vpop.f32.mrf.mxu2  ;;  %v1019_v32 = vsub.f32 %v957_v24, %v4446_v19  ;;  %v443_v24 = vadd.f32 %v4365_v21, %v285_v48  ;;  %v1036_v21 = vand.u32 4294901760, %v1035_v11 }
  0xdb   : > { %v389_v3 = vadd.f32 %v4342_v40, %v388_v4  ;;  %v494_v23 = vpop.f32.mrf.mxu3  ;;  %v755_v46 = vpop.f32.mrf.mxu0  ;;  %v1027_v54 = vsub.f32 %v959_v50, %v4454_v25 }
  0xdc   : > { %v1020_v16 = vand.u32 4294901760, %v1019_v32 }
  0xdd   : > { %v4444_v34 = vadd.f32 %v494_v23, %v389_v3  ;;  %v841_v61 = vpop.f32.mrf.mxu1  ;;  %v1028_v10 = vand.u32 4294901760, %v1027_v54  ;;  %v931_v3 = vpop.permute.xlu2 %930 }
  0xde   : > { %1237 = vmatmul.f32.vlgmr.msra.gmra.mxu0 %v1003_v52  ;;  %v1021_v62 = vsub.f32 %v1019_v32, %v1020_v16 }
  0xdf   : > { %1007 = vmatmul.f32.vlgmr.msra.gmra.mxu2 %v1006_v47 }
  0xe0   : > { %1153 = vmatmul.f32.vlgmr.msra.gmra.mxu3 %v4416_v36  ;;  %1336 = vmatmul.f32.vlgmr.msra.gmra.mxu1 %v1004_v0 }
  0xe2   : > { %v526_v43 = vpop.f32.mrf.mxu2 }
  0xe3   : > { %v527_v57 = vadd.f32 %v526_v43, %v435_v41  ;;  %v629_v1 = vpop.f32.mrf.mxu3  ;;  %v759_v15 = vpop.f32.mrf.mxu0 }
  0xe5   : > { %v630_v14 = vadd.f32 %v629_v1, %v527_v57  ;;  %v845_v39 = vpop.f32.mrf.mxu1  ;;  %v933_v1 = vpop.permute.xlu0 %932 }
  0xe6   : > { %1242 = vmatmul.f32.gmra.mxu0 %v1011_v38  ;;  %v1022_v38 = vand.u32 4294901760, %v1021_v62 }
  0xe7   : > { %v756_v51 = vadd.f32 %v755_v46, %v630_v14  ;;  %1015 = vmatmul.f32.gmra.mxu2 %v1014_v27  ;;  %v1029_v46 = vsub.f32 %v1027_v54, %v1028_v10  ;;  %v1037_v14 = vsub.f32 %v1035_v11, %v1036_v21  ;;  %v965_v27 = vsel %vm952_vm1, %v933_v1, 0 }
  0xe8   : > { %1157 = vmatmul.f32.gmra.mxu3 %v4432_v12  ;;  %1342 = vmatmul.f32.gmra.mxu1 %v1012_v53  ;;  %v963_v53 = vsel %vm952_vm1, %v931_v3, 0  ;;  %v4484_v62 = vand.u32 4294901760, %v965_v27 }
  0xe9   : > { %v4458_v29 = vadd.f32 %v841_v61, %v756_v51  ;;  %v293_v61 = vadd.f32 %v4342_v40, %v4373_v22  ;;  %v4474_v49 = vand.u32 4294901760, %v963_v53  ;;  %v1030_v43 = vand.u32 4294901760, %v1029_v46 }
  0xea   : > { %v531_v52 = vpop.f32.mrf.mxu2  ;;  %v1051_v45 = vsub.f32 %v965_v27, %v4484_v62 }
  0xeb   : > { %v532_v58 = vadd.f32 %v531_v52, %v439_v9  ;;  %v635_v8 = vpop.f32.mrf.mxu3  ;;  %v763_v0 = vpop.f32.mrf.mxu0  ;;  %v447_v56 = vadd.f32 %v4377_v44, %v293_v61  ;;  %v1043_v22 = vsub.f32 %v963_v53, %v4474_v49  ;;  %v1038_v52 = vand.u32 4294901760, %v1037_v14 }
  0xec   : > { %v1052_v3 = vand.u32 4294901760, %v1051_v45 }
  0xed   : > { %v636_v37 = vadd.f32 %v635_v8, %v532_v58  ;;  %v849_v4 = vpop.f32.mrf.mxu1  ;;  %v1044_v51 = vand.u32 4294901760, %v1043_v22  ;;  %v935_v58 = vpop.permute.xlu1 %934 }
  0xee   : > { %1247 = vmatmul.f32.gmra.mxu0 %v1019_v32 }
  0xef   : > { %v760_v20 = vadd.f32 %v759_v15, %v636_v37  ;;  %1023 = vmatmul.f32.gmra.mxu2 %v1022_v38 }
  0xf0   : > { %1161 = vmatmul.f32.gmra.mxu3 %v4446_v19  ;;  %1348 = vmatmul.f32.gmra.mxu1 %v1020_v16 }
  0xf1   : > { %v4468_v23 = vadd.f32 %v845_v39, %v760_v20 }
  0xf2   : > { %v536_v47 = vpop.f32.mrf.mxu2 }
  0xf3   : > { %v537_v41 = vadd.f32 %v536_v47, %v443_v24  ;;  %v641_v42 = vpop.f32.mrf.mxu3  ;;  %v767_v50 = vpop.f32.mrf.mxu0  ;;  %v309_v24 = vadd.f32 %v4342_v40, %v4397_v6 }
  0xf5   : > { %v642_v32 = vadd.f32 %v641_v42, %v537_v41  ;;  %v853_v15 = vpop.f32.mrf.mxu1  ;;  %v455_v53 = vadd.f32 %v4401_v5, %v309_v24  ;;  %v937_v41 = vpop.permute.xlu2 %936 }
  0xf6   : > { %1252 = vmatmul.f32.gmra.mxu0 %v1027_v54 }
  0xf7   : > { %v764_v57 = vadd.f32 %v763_v0, %v642_v32  ;;  %1031 = vmatmul.f32.gmra.mxu2 %v1030_v43 }
  0xf8   : > { %1165 = vmatmul.f32.gmra.mxu3 %v4454_v25  ;;  %1354 = vmatmul.f32.gmra.mxu1 %v1028_v10  ;;  %v1045_v10 = vsub.f32 %v1043_v22, %v1044_v51 }
  0xf9   : > { %v4478_v16 = vadd.f32 %v849_v4, %v764_v57  ;;  %v967_v4 = vsel %vm952_vm1, %v935_v58, 0 }
  0xfa   : > { %v541_v39 = vpop.f32.mrf.mxu2  ;;  %v4494_v46 = vand.u32 4294901760, %v967_v4  ;;  %v1046_v47 = vand.u32 4294901760, %v1045_v10 }
  0xfb   : > { %v542_v9 = vadd.f32 %v541_v39, %v447_v56  ;;  %v647_v44 = vpop.f32.mrf.mxu3  ;;  %v771_v8 = vpop.f32.mrf.mxu0  ;;  %v317_v56 = vadd.f32 %v4342_v40, %v4410_v30 }
  0xfc   : > { %v1059_v6 = vsub.f32 %v967_v4, %v4494_v46 }
  0xfd   : > { %v648_v54 = vadd.f32 %v647_v44, %v542_v9  ;;  %v857_v37 = vpop.f32.mrf.mxu1  ;;  %v459_v27 = vadd.f32 %v4414_v35, %v317_v56  ;;  %v939_v9 = vpop.permute.xlu0 %938 }
  0xfe   : > { %1257 = vmatmul.f32.gmra.mxu0 %v1035_v11 }
  0xff   : > { %v768_v48 = vadd.f32 %v767_v50, %v648_v54  ;;  %1039 = vmatmul.f32.gmra.mxu2 %v1038_v52  ;;  %v969_v50 = vsel %vm952_vm1, %v937_v41, 0  ;;  %v971_v52 = vsel %vm952_vm1, %v939_v9, 0 }
 0x100   : > { %1169 = vmatmul.f32.gmra.mxu3 %v4464_v13  ;;  %1360 = vmatmul.f32.gmra.mxu1 %v1036_v21  ;;  %v1053_v21 = vsub.f32 %v1051_v45, %v1052_v3  ;;  %v4504_v14 = vand.u32 4294901760, %v969_v50  ;;  %v4514_v10 = vand.u32 4294901760, %v971_v52 }
 0x101   : > { %v4488_v0 = vadd.f32 %v853_v15, %v768_v48  ;;  %v1060_v15 = vand.u32 4294901760, %v1059_v6 }
 0x102   : > { %v546_v38 = vpop.f32.mrf.mxu2  ;;  %v1054_v39 = vand.u32 4294901760, %v1053_v21  ;;  %v1067_v30 = vsub.f32 %v969_v50, %v4504_v14 }
 0x103   : > { %v547_v59 = vadd.f32 %v546_v38, %v451_v17  ;;  %v653_v20 = vpop.f32.mrf.mxu3  ;;  %v775_v32 = vpop.f32.mrf.mxu0  ;;  %v325_v17 = vadd.f32 %v4342_v40, %v4426_v60  ;;  %v1075_v40 = vsub.f32 %v971_v52, %v4514_v10 }
 0x105   : > { %v654_v11 = vadd.f32 %v653_v20, %v547_v59  ;;  %v861_v1 = vpop.f32.mrf.mxu1  ;;  %v463_v4 = vadd.f32 %v4430_v2, %v325_v17  ;;  %v941_v59 = vpop.permute.xlu1 %940 }
 0x106   : > { %1262 = vmatmul.f32.gmra.mxu0 %v1043_v22 }
 0x107   : > { %v772_v61 = vadd.f32 %v771_v8, %v654_v11  ;;  %1047 = vmatmul.f32.gmra.mxu2 %v1046_v47  ;;  %v1068_v8 = vand.u32 4294901760, %v1067_v30  ;;  %v973_v11 = vsel %vm952_vm1, %v941_v59, 0 }
 0x108   : > { %1173 = vmatmul.f32.gmra.mxu3 %v4474_v49  ;;  %1366 = vmatmul.f32.gmra.mxu1 %v1044_v51  ;;  %v1061_v51 = vsub.f32 %v1059_v6, %v1060_v15 }
 0x109   : > { %v4498_v42 = vadd.f32 %v857_v37, %v772_v61  ;;  %v1069_v60 = vsub.f32 %v1067_v30, %v1068_v8  ;;  %v1076_v61 = vand.u32 4294901760, %v1075_v40 }
 0x10a   : > { %v551_v43 = vpop.f32.mrf.mxu2  ;;  %v1062_v37 = vand.u32 4294901760, %v1061_v51  ;;  %v945_v51 = vpop.permute.xlu0 %944 }
 0x10b   : > { %v552_v57 = vadd.f32 %v551_v43, %v455_v53  ;;  %v659_v5 = vpop.f32.mrf.mxu3  ;;  %v779_v35 = vpop.f32.mrf.mxu0  ;;  %v1070_v2 = vand.u32 4294901760, %v1069_v60 }
 0x10c   : > { %v943_v43 = vpop.permute.xlu2 %942 }
 0x10d   : > { %v660_v22 = vadd.f32 %v659_v5, %v552_v57  ;;  %v865_v38 = vpop.f32.mrf.mxu1  ;;  %v1077_v5 = vsub.f32 %v1075_v40, %v1076_v61 }
 0x10e   : > { %1267 = vmatmul.f32.gmra.mxu0 %v1051_v45 }
 0x10f   : > { %v776_v26 = vadd.f32 %v775_v32, %v660_v22  ;;  %1055 = vmatmul.f32.gmra.mxu2 %v1054_v39 }
 0x110   : > { %1177 = vmatmul.f32.gmra.mxu3 %v4484_v62  ;;  %1372 = vmatmul.f32.gmra.mxu1 %v1052_v3 }
 0x111   : > { %v4508_v44 = vadd.f32 %v861_v1, %v776_v26 }
 0x112   : > { %v556_v54 = vpop.f32.mrf.mxu2 }
 0x113   : > { %v557_v48 = vadd.f32 %v556_v54, %v459_v27  ;;  %v665_v58 = vpop.f32.mrf.mxu3  ;;  %v783_v21 = vpop.f32.mrf.mxu0 }
 0x115   : > { %v666_v45 = vadd.f32 %v665_v58, %v557_v48  ;;  %v869_v50 = vpop.f32.mrf.mxu1  ;;  %v977_v48 = vsel %vm952_vm1, %v945_v51, 0 }
 0x116   : > { %1272 = vmatmul.f32.gmra.mxu0 %v1059_v6  ;;  %v4522_v6 = vand.u32 4294901760, %v973_v11 }
 0x117   : > { %v780_v24 = vadd.f32 %v779_v35, %v666_v45  ;;  %1063 = vmatmul.f32.gmra.mxu2 %v1062_v37  ;;  %v4540_v45 = vand.u32 4294901760, %v977_v48 }
 0x118   : > { %1181 = vmatmul.f32.gmra.mxu3 %v4494_v46  ;;  %1378 = vmatmul.f32.gmra.mxu1 %v1060_v15  ;;  %v1083_v57 = vsub.f32 %v973_v11, %v4522_v6  ;;  %v975_v15 = vsel %vm952_vm1, %v943_v43, 0 }
 0x119   : > { %v4518_v20 = vadd.f32 %v865_v38, %v780_v24  ;;  %v4532_v9 = vand.u32 4294901760, %v975_v15  ;;  %v947_v38 = vpop.permute.xlu1 %946 }
 0x11a   : > { %v561_v3 = vpop.f32.mrf.mxu2  ;;  %v1084_v27 = vand.u32 4294901760, %v1083_v57 }
 0x11b   : > { %v562_v47 = vadd.f32 %v561_v3, %v463_v4  ;;  %v671_v53 = vpop.f32.mrf.mxu3  ;;  %v1091_v54 = vsub.f32 %v975_v15, %v4532_v9  ;;  %v1099_v4 = vsub.f32 %v977_v48, %v4540_v45  ;;  %v951_v15 = vpop.permute.xlu0 %950 }
 0x11c   : > { %v1085_v52 = vsub.f32 %v1083_v57, %v1084_v27 }
 0x11d   : > { %v672_v41 = vadd.f32 %v671_v53, %v562_v47  ;;  %v1092_v35 = vand.u32 4294901760, %v1091_v54  ;;  %v1100_v3 = vand.u32 4294901760, %v1099_v4 }
 0x11e   : > { %1277 = vmatmul.f32.gmra.mxu0 %v1067_v30  ;;  %v1078_v30 = vand.u32 4294901760, %v1077_v5  ;;  %v1086_v37 = vand.u32 4294901760, %v1085_v52 }
 0x11f   : > { %v784_v32 = vadd.f32 %v783_v21, %v672_v41  ;;  %1071 = vmatmul.f32.gmra.mxu2 %v1070_v2  ;;  %v1093_v24 = vsub.f32 %v1091_v54, %v1092_v35  ;;  %v1101_v2 = vsub.f32 %v1099_v4, %v1100_v3 }
 0x120   : > { %1185 = vmatmul.f32.gmra.mxu3 %v4504_v14  ;;  %1384 = vmatmul.f32.gmra.mxu1 %v1068_v8 }
 0x121   : > { %v4525_v56 = vadd.f32 %v869_v50, %v784_v32  ;;  %v1094_v53 = vand.u32 4294901760, %v1093_v24 }
 0x122   : > { %v566_v1 = vpop.f32.mrf.mxu2 }
 0x123   : > { %v567_v22 = vadd.f32 %v566_v1, %v4351_v63  ;;  %v677_v39 = vpop.f32.mrf.mxu3  ;;  %v1102_v1 = vand.u32 4294901760, %v1101_v2 }
 0x125   : > { %v4530_v26 = vadd.f32 %v677_v39, %v567_v22 }
 0x126   : > { %1282 = vmatmul.f32.gmra.mxu0 %v1075_v40  ;;  %v979_v40 = vsel %vm952_vm1, %v947_v38, 0 }
 0x127   : > { %1079 = vmatmul.f32.gmra.mxu2 %v1078_v30  ;;  %v4548_v47 = vand.u32 4294901760, %v979_v40  ;;  %v983_v30 = vsel %vm952_vm1, %v951_v15, 0 }
 0x128   : > { %1189 = vmatmul.f32.gmra.mxu3 %v4514_v10  ;;  %1390 = vmatmul.f32.gmra.mxu1 %v1076_v61  ;;  %v949_v61 = vpop.permute.xlu2 %948 }
 0x129   : > { %v1107_v41 = vsub.f32 %v979_v40, %v4548_v47  ;;  %v981_v32 = vsel %vm952_vm1, %v949_v61, 0 }
 0x12a   : > { %v571_v17 = vpop.f32.mrf.mxu2  ;;  %v4556_v5 = vand.u32 4294901760, %v981_v32 }
 0x12b   : > { %v572_v63 = vadd.f32 %v571_v17, %v4363_v18  ;;  %v683_v58 = vpop.f32.mrf.mxu3  ;;  %v1108_v50 = vand.u32 4294901760, %v1107_v41  ;;  %v4564_v17 = vand.u32 4294901760, %v983_v30 }
 0x12c   : > { %v1115_v22 = vsub.f32 %v981_v32, %v4556_v5 }
 0x12d   : > { %v4538_v8 = vadd.f32 %v683_v58, %v572_v63  ;;  %v1109_v39 = vsub.f32 %v1107_v41, %v1108_v50  ;;  %v1123_v63 = vsub.f32 %v983_v30, %v4564_v17 }
 0x12e   : > { %1287 = vmatmul.f32.gmra.mxu0 %v1083_v57 }
 0x12f   : > { %1087 = vmatmul.f32.gmra.mxu2 %v1086_v37  ;;  %v1110_v48 = vand.u32 4294901760, %v1109_v39 }
 0x130   : > { %1193 = vmatmul.f32.gmra.mxu3 %v4522_v6  ;;  %1396 = vmatmul.f32.gmra.mxu1 %v1084_v27 }
 0x132   : > { %v576_v59 = vpop.f32.mrf.mxu2 }
 0x133   : > { %v577_v18 = vadd.f32 %v576_v59, %v4375_v31  ;;  %v689_v60 = vpop.f32.mrf.mxu3 }
 0x135   : > { %v4546_v11 = vadd.f32 %v689_v60, %v577_v18 }
 0x136   : > { %1292 = vmatmul.f32.gmra.mxu0 %v1091_v54  ;;  %v1116_v54 = vand.u32 4294901760, %v1115_v22 }
 0x137   : > { %1095 = vmatmul.f32.gmra.mxu2 %v1094_v53 }
 0x138   : > { %1197 = vmatmul.f32.gmra.mxu3 %v4532_v9  ;;  %1402 = vmatmul.f32.gmra.mxu1 %v1092_v35  ;;  %v1117_v58 = vsub.f32 %v1115_v22, %v1116_v54 }
 0x13a   : > { %v581_v21 = vpop.f32.mrf.mxu2  ;;  %v1118_v24 = vand.u32 4294901760, %v1117_v58 }
 0x13b   : > { %v582_v31 = vadd.f32 %v581_v21, %v4387_v55  ;;  %v695_v43 = vpop.f32.mrf.mxu3 }
 0x13d   : > { %v4554_v57 = vadd.f32 %v695_v43, %v582_v31 }
 0x13e   : > { %1297 = vmatmul.f32.gmra.mxu0 %v1099_v4 }
 0x13f   : > { %5727 = vst [vmem:[#allocation2_spill] sm:$0xff] %v4554_v57  ;;  %1103 = vmatmul.f32.gmra.mxu2 %v1102_v1 }
 0x140   : > { %1201 = vmatmul.f32.gmra.mxu3 %v4540_v45  ;;  %1408 = vmatmul.f32.gmra.mxu1 %v1100_v3 }
 0x142   : > { %v586_v27 = vpop.f32.mrf.mxu2 }
 0x143   : > { %v587_v55 = vadd.f32 %v586_v27, %v4399_v7  ;;  %v701_v51 = vpop.f32.mrf.mxu3  ;;  %v1124_v7 = vand.u32 4294901760, %v1123_v63 }
 0x145   : > { %v4562_v52 = vadd.f32 %v701_v51, %v587_v55  ;;  %v1125_v59 = vsub.f32 %v1123_v63, %v1124_v7 }
 0x146   : > { %1302 = vmatmul.f32.gmra.mxu0 %v1107_v41 }
 0x147   : > { %5728 = vst [vmem:[#allocation3_spill] sm:$0xff] %v4562_v52  ;;  %1111 = vmatmul.f32.gmra.mxu2 %v1110_v48  ;;  %v1126_v53 = vand.u32 4294901760, %v1125_v59  ;;  %v154_v52 = vld [vmem:[%s5714_s1 + $0x38] sm:$0xff] }
 0x148   : > { %1205 = vmatmul.f32.gmra.mxu3 %v4548_v47  ;;  %1414 = vmatmul.f32.gmra.mxu1 %v1108_v50 }
 0x14a   : > { %v591_v35 = vpop.f32.mrf.mxu2 }
 0x14b   : > { %v592_v37 = vadd.f32 %v591_v35, %v4412_v33  ;;  %v707_v38 = vpop.f32.mrf.mxu3  ;;  %v162_v33 = vld [vmem:[%s5714_s1 + $0x78] sm:$0xff] }
 0x14c   : > { %v4578_v61 = vand.u32 4294901760, %v162_v33 }
 0x14d   : > { %v4569_v4 = vadd.f32 %v707_v38, %v592_v37  ;;  %v4631_v37 = vpop.f32.mrf.mxu1 }
 0x14e   : > { %1307 = vmatmul.f32.gmra.mxu0 %v1115_v22  ;;  %v4583_v41 = vsub.f32 %v162_v33, %v4578_v61  ;;  %2072 = vmatpush.msra.mxu3 %v4578_v61 }
 0x14f   : > { %5729 = vst [vmem:[#allocation4_spill] sm:$0xff] %v4569_v4  ;;  %1119 = vmatmul.f32.gmra.mxu2 %v1118_v24  ;;  %1669 = vmatpush.msrb.mxu0 %v4578_v61 }
 0x150   : > { %1209 = vmatmul.f32.gmra.mxu3 %v4556_v5  ;;  %1420 = vmatmul.f32.gmra.mxu1 %v1116_v54  ;;  %v5721_v32 = vand.u32 4294901760, %v4583_v41 }
 0x151   : > { %1956 = vmatpush.msra.mxu2 %v4583_v41 }
 0x152   : > { %v596_v40 = vpop.f32.mrf.mxu2  ;;  %v1826_v43 = vsub.f32 %v4583_v41, %v5721_v32 }
 0x153   : > { %v597_v18 = vadd.f32 %v596_v40, %v4428_v28  ;;  %v713_v60 = vpop.f32.mrf.mxu3 }
 0x154   : > { %v1827_v50 = vand.u32 4294901760, %v1826_v43 }
 0x155   : > { %v4573_v3 = vadd.f32 %v713_v60, %v597_v18  ;;  %v4644_v33 = vpop.f32.mrf.mxu1 }
 0x156   : > { %1312 = vmatmul.f32.gmra.mxu0 %v1123_v63  ;;  %1828 = vmatpush.msrb.mxu1 %v1827_v50  ;;  %v4617_v63 = vpop.f32.mrf.mxu0 }
 0x157   : > { %5730 = vst [vmem:[#allocation5_spill] sm:$0xff] %v4573_v3  ;;  %1127 = vmatmul.f32.gmra.mxu2 %v1126_v53 }
 0x158   : > { %1213 = vmatmul.f32.gmra.mxu3 %v4564_v17  ;;  %1426 = vmatmul.f32.gmra.mxu1 %v1124_v7 }
 0x15a   : > { %v601_v28 = vpop.f32.mrf.mxu2 }
 0x15b   : > { %v602_v2 = vadd.f32 %v601_v28, %v4444_v34  ;;  %v719_v21 = vpop.f32.mrf.mxu3  ;;  %v161_v34 = vld [vmem:[%s5714_s1 + $0x70] sm:$0xff] }
 0x15c   : > { %v4599_v1 = vand.u32 4294901760, %v161_v34 }
 0x15d   : > { %v4589_v31 = vadd.f32 %v719_v21, %v602_v2  ;;  %v159_v2 = vld [vmem:[%s5714_s1 + $0x60] sm:$0xff] }
 0x15e   : > { %1671 = vmatpush.msrb.mxu0 %v4599_v1  ;;  %2074 = vmatpush.msra.mxu3 %v4599_v1  ;;  %v4606_v27 = vsub.f32 %v161_v34, %v4599_v1  ;;  %v4641_v18 = vpop.f32.mrf.mxu0  ;;  %v4652_v21 = vand.u32 4294901760, %v159_v2 }
 0x15f   : > { %5731 = vst [vmem:[#allocation6_spill] sm:$0xff] %v4589_v31  ;;  %1450 = vmatmul.f32.vlgmr.msrb.gmra.mxu2 %v4416_v36 }
 0x160   : > { %1532 = vmatmul.f32.vlgmr.msrb.gmra.mxu3 %v4416_v36  ;;  %v5720_v36 = vand.u32 4294901760, %v4606_v27  ;;  %1959 = vmatpush.msra.mxu2 %v4606_v27 }
 0x162   : > { %v1008_v15 = vpop.f32.mrf.mxu2  ;;  %v1832_v55 = vsub.f32 %v4606_v27, %v5720_v36 }
 0x163   : > { %v1154_v22 = vpop.f32.mrf.mxu3 }
 0x164   : > { %v4603_v39 = vadd.f32 %v1154_v22, %v1008_v15  ;;  %v1833_v48 = vand.u32 4294901760, %v1832_v55 }
 0x166   : > { %1834 = vmatpush.msrb.mxu1 %v1833_v48  ;;  %v4660_v43 = vpop.f32.mrf.mxu0 }
 0x167   : > { %1454 = vmatmul.f32.gmra.mxu2 %v4432_v12  ;;  %5732 = vst [vmem:[#allocation7_spill] sm:$0xff] %v4660_v43 }
 0x168   : > { %1536 = vmatmul.f32.gmra.mxu3 %v4432_v12  ;;  %v160_v12 = vld [vmem:[%s5714_s1 + $0x68] sm:$0xff] }
 0x169   : > { %v4623_v58 = vand.u32 4294901760, %v160_v12 }
 0x16a   : > { %v1016_v30 = vpop.f32.mrf.mxu2 }
 0x16b   : > { %v1158_v51 = vpop.f32.mrf.mxu3  ;;  %1673 = vmatpush.msrb.mxu0 %v4623_v58  ;;  %v4628_v35 = vsub.f32 %v160_v12, %v4623_v58  ;;  %2076 = vmatpush.msra.mxu3 %v4623_v58 }
 0x16c   : > { %v4615_v54 = vadd.f32 %v1158_v51, %v1016_v30  ;;  %v4669_v30 = vpop.f32.mrf.mxu1  ;;  %v158_v51 = vld [vmem:[%s5714_s1 + $0x58] sm:$0xff] }
 0x16d   : > { %v5718_v24 = vand.u32 4294901760, %v4628_v35  ;;  %1962 = vmatpush.msra.mxu2 %v4628_v35  ;;  %1675 = vmatpush.msrb.mxu0 %v4652_v21  ;;  %5733 = vst [vmem:[#allocation8_spill] sm:$0xff] %v4669_v30  ;;  %v4676_v48 = vand.u32 4294901760, %v158_v51 }
 0x16e   : > { %2078 = vmatpush.msra.mxu3 %v4652_v21 }
 0x16f   : > { %1458 = vmatmul.f32.gmra.mxu2 %v4446_v19  ;;  %1677 = vmatpush.msrb.mxu0 %v4676_v48 }
 0x170   : > { %1540 = vmatmul.f32.gmra.mxu3 %v4446_v19  ;;  %v1838_v19 = vsub.f32 %v4628_v35, %v5718_v24 }
 0x171   : > { %2080 = vmatpush.msra.mxu3 %v4676_v48 }
 0x172   : > { %v1024_v38 = vpop.f32.mrf.mxu2  ;;  %v1839_v40 = vand.u32 4294901760, %v1838_v19  ;;  %v4683_v19 = vpop.f32.mrf.mxu0 }
 0x173   : > { %v1162_v7 = vpop.f32.mrf.mxu3  ;;  %5734 = vst [vmem:[#allocation9_spill] sm:$0xff] %v4683_v19 }
 0x174   : > { %v4635_v59 = vadd.f32 %v1162_v7, %v1024_v38  ;;  %1840 = vmatpush.msrb.mxu1 %v1839_v40  ;;  %v4680_v7 = vsub.f32 %v158_v51, %v4676_v48  ;;  %v157_v51 = vld [vmem:[%s5714_s1 + $0x50] sm:$0xff] }
 0x177   : > { %1462 = vmatmul.f32.gmra.mxu2 %v4454_v25 }
 0x178   : > { %1544 = vmatmul.f32.gmra.mxu3 %v4454_v25  ;;  %v4657_v25 = vsub.f32 %v159_v2, %v4652_v21 }
 0x17a   : > { %v1032_v60 = vpop.f32.mrf.mxu2  ;;  %v5717_v15 = vand.u32 4294901760, %v4657_v25  ;;  %1965 = vmatpush.msra.mxu2 %v4657_v25 }
 0x17b   : > { %v1166_v53 = vpop.f32.mrf.mxu3 }
 0x17c   : > { %v4646_v28 = vadd.f32 %v1166_v53, %v1032_v60  ;;  %1968 = vmatpush.msra.mxu2 %v4680_v7  ;;  %v4693_v53 = vpop.f32.mrf.mxu1 }
 0x17d   : > { %5735 = vst [vmem:[#allocation10_spill] sm:$0xff] %v4693_v53 }
 0x17f   : > { %1466 = vmatmul.f32.gmra.mxu2 %v4464_v13 }
 0x180   : > { %1548 = vmatmul.f32.gmra.mxu3 %v4464_v13  ;;  %v1844_v13 = vsub.f32 %v4657_v25, %v5717_v15  ;;  %v156_v15 = vld [vmem:[%s5714_s1 + $0x48] sm:$0xff] }
 0x181   : > { %v4728_v24 = vand.u32 4294901760, %v156_v15 }
 0x182   : > { %v1040_v50 = vpop.f32.mrf.mxu2  ;;  %v1845_v55 = vand.u32 4294901760, %v1844_v13 }
 0x183   : > { %v1170_v34 = vpop.f32.mrf.mxu3 }
 0x184   : > { %v4664_v22 = vadd.f32 %v1170_v34, %v1040_v50  ;;  %1846 = vmatpush.msrb.mxu1 %v1845_v55  ;;  %v4698_v55 = vpop.f32.mrf.mxu0 }
 0x185   : > { %5736 = vst [vmem:[#allocation11_spill] sm:$0xff] %v4698_v55 }
 0x187   : > { %1470 = vmatmul.f32.gmra.mxu2 %v4474_v49 }
 0x188   : > { %1552 = vmatmul.f32.gmra.mxu3 %v4474_v49  ;;  %v5716_v49 = vand.u32 4294901760, %v4680_v7 }
 0x18a   : > { %v1048_v12 = vpop.f32.mrf.mxu2  ;;  %v1850_v60 = vsub.f32 %v4680_v7, %v5716_v49 }
 0x18b   : > { %v1174_v38 = vpop.f32.mrf.mxu3 }
 0x18c   : > { %v4685_v40 = vadd.f32 %v1174_v38, %v1048_v12  ;;  %v1851_v2 = vand.u32 4294901760, %v1850_v60  ;;  %v4704_v12 = vand.u32 4294901760, %v157_v51  ;;  %v4712_v38 = vpop.f32.mrf.mxu1  ;;  %v4722_v49 = vpop.f32.mrf.mxu0 }
 0x18d   : > { %5737 = vst [vmem:[#allocation12_spill] sm:$0xff] %v4712_v38 }
 0x18e   : > { %1852 = vmatpush.msrb.mxu1 %v1851_v2  ;;  %1679 = vmatpush.msrb.mxu0 %v4704_v12  ;;  %5738 = vst [vmem:[#allocation13_spill] sm:$0xff] %v4722_v49 }
 0x18f   : > { %1474 = vmatmul.f32.gmra.mxu2 %v4484_v62  ;;  %2082 = vmatpush.msra.mxu3 %v4704_v12 }
 0x190   : > { %1556 = vmatmul.f32.gmra.mxu3 %v4484_v62  ;;  %v4709_v62 = vsub.f32 %v157_v51, %v4704_v12  ;;  %1681 = vmatpush.msrb.mxu0 %v4728_v24 }
 0x191   : > { %2084 = vmatpush.msra.mxu3 %v4728_v24 }
 0x192   : > { %v1056_v50 = vpop.f32.mrf.mxu2  ;;  %1971 = vmatpush.msra.mxu2 %v4709_v62 }
 0x193   : > { %v1178_v34 = vpop.f32.mrf.mxu3 }
 0x194   : > { %v4696_v13 = vadd.f32 %v1178_v34, %v1056_v50  ;;  %v5719_v50 = vand.u32 4294901760, %v4709_v62 }
 0x197   : > { %1478 = vmatmul.f32.gmra.mxu2 %v4494_v46 }
 0x198   : > { %1560 = vmatmul.f32.gmra.mxu3 %v4494_v46  ;;  %v1856_v46 = vsub.f32 %v4709_v62, %v5719_v50  ;;  %v4739_v50 = vsub.f32 %v156_v15, %v4728_v24 }
 0x19a   : > { %v1064_v60 = vpop.f32.mrf.mxu2  ;;  %v1857_v51 = vand.u32 4294901760, %v1856_v46  ;;  %v4736_v46 = vpop.f32.mrf.mxu1  ;;  %1974 = vmatpush.msra.mxu2 %v4739_v50 }
 0x19b   : > { %v1182_v2 = vpop.f32.mrf.mxu3  ;;  %5739 = vst [vmem:[#allocation14_spill] sm:$0xff] %v4736_v46 }
 0x19c   : > { %v4716_v34 = vadd.f32 %v1182_v2, %v1064_v60  ;;  %1858 = vmatpush.msrb.mxu1 %v1857_v51  ;;  %v4745_v51 = vpop.f32.mrf.mxu0 }
 0x19d   : > { %5740 = vst [vmem:[#allocation15_spill] sm:$0xff] %v4745_v51 }
 0x19f   : > { %1482 = vmatmul.f32.gmra.mxu2 %v4504_v14 }
 0x1a0   : > { %1564 = vmatmul.f32.gmra.mxu3 %v4504_v14  ;;  %v5722_v14 = vand.u32 4294901760, %v4739_v50 }
 0x1a2   : > { %v4730_v60 = vpop.f32.mrf.mxu2  ;;  %v1862_v32 = vsub.f32 %v4739_v50, %v5722_v14  ;;  %v4754_v3 = vpop.f32.mrf.mxu1 }
 0x1a3   : > { %v4732_v2 = vpop.f32.mrf.mxu3  ;;  %5741 = vst [vmem:[#allocation16_spill] sm:$0xff] %v4754_v3 }
 0x1a4   : > { %v1863_v15 = vand.u32 4294901760, %v1862_v32  ;;  %v4774_v51 = vpop.f32.mrf.mxu0 }
 0x1a5   : > { %5742 = vst [vmem:[#allocation17_spill] sm:$0xff] %v4774_v51 }
 0x1a6   : > { %1864 = vmatpush.msrb.mxu1 %v1863_v15 }
 0x1a7   : > { %1486 = vmatmul.f32.gmra.mxu2 %v4514_v10 }
 0x1a8   : > { %1568 = vmatmul.f32.gmra.mxu3 %v4514_v10  ;;  %v155_v10 = vld [vmem:[%s5714_s1 + $0x40] sm:$0xff] }
 0x1a9   : > { %v4760_v46 = vand.u32 4294901760, %v155_v10 }
 0x1aa   : > { %v4747_v36 = vpop.f32.mrf.mxu2  ;;  %v4778_v4 = vpop.f32.mrf.mxu1 }
 0x1ab   : > { %v4752_v31 = vpop.f32.mrf.mxu3  ;;  %1683 = vmatpush.msrb.mxu0 %v4760_v46  ;;  %v4765_v14 = vsub.f32 %v155_v10, %v4760_v46  ;;  %2086 = vmatpush.msra.mxu3 %v4760_v46  ;;  %5743 = vst [vmem:[#allocation18_spill] sm:$0xff] %v4778_v4 }
 0x1ac   : > { %v1238_v55 = vpop.f32.mrf.mxu0 }
 0x1ad   : > { %v1867_v3 = vand.u32 4294901760, %v4765_v14  ;;  %1977 = vmatpush.msra.mxu2 %v4765_v14 }
 0x1af   : > { %1490 = vmatmul.f32.gmra.mxu2 %v4522_v6  ;;  %v1868_v49 = vsub.f32 %v4765_v14, %v1867_v3  ;;  %v1684_v14 = vand.u32 4294901760, %v154_v52 }
 0x1b0   : > { %1572 = vmatmul.f32.gmra.mxu3 %v4522_v6 }
 0x1b1   : > { %v1869_v6 = vand.u32 4294901760, %v1868_v49  ;;  %v153_v49 = vld [vmem:[%s5714_s1 + $0x30] sm:$0xff]  ;;  %1685 = vmatpush.msrb.mxu0 %v1684_v14  ;;  %2088 = vmatpush.msra.mxu3 %v1684_v14 }
 0x1b2   : > { %v4768_v32 = vpop.f32.mrf.mxu2  ;;  %v1337_v4 = vpop.f32.mrf.mxu1 }
 0x1b3   : > { %v4770_v15 = vpop.f32.mrf.mxu3  ;;  %1870 = vmatpush.msrb.mxu1 %v1869_v6  ;;  %v1686_v6 = vand.u32 4294901760, %v153_v49 }
 0x1b4   : > { %v1243_v43 = vpop.f32.mrf.mxu0 }
 0x1b5   : > { %1687 = vmatpush.msrb.mxu0 %v1686_v6  ;;  %v1878_v57 = vsub.f32 %v153_v49, %v1686_v6  ;;  %2090 = vmatpush.msra.mxu3 %v1686_v6  ;;  %v5750_v49 = vand.u32 4294901760, %v4628_v35  ;;  %v5754_v35 = vand.u32 4294901760, %v4739_v50 }
 0x1b7   : > { %1494 = vmatmul.f32.gmra.mxu2 %v4532_v9 }
 0x1b8   : > { %1576 = vmatmul.f32.gmra.mxu3 %v4532_v9  ;;  %v1872_v9 = vsub.f32 %v154_v52, %v1684_v14  ;;  %v5749_v52 = vand.u32 4294901760, %v4606_v27 }
 0x1ba   : > { %v4781_v10 = vpop.f32.mrf.mxu2  ;;  %v1873_v19 = vand.u32 4294901760, %v1872_v9  ;;  %1980 = vmatpush.msra.mxu2 %v1872_v9  ;;  %v1343_v27 = vpop.f32.mrf.mxu1 }
 0x1bb   : > { %5744 = vst [vmem:[#allocation19_spill] sm:$0xff] %v4781_v10  ;;  %v4783_v38 = vpop.f32.mrf.mxu3  ;;  %v1879_v10 = vand.u32 4294901760, %v1878_v57 }
 0x1bc   : > { %5745 = vst [vmem:[#allocation20_spill] sm:$0xff] %v4783_v38  ;;  %v1874_v38 = vsub.f32 %v1872_v9, %v1873_v19  ;;  %1983 = vmatpush.msra.mxu2 %v1878_v57  ;;  %v5751_v9 = vand.u32 4294901760, %v4657_v25  ;;  %v1248_v25 = vpop.f32.mrf.mxu0 }
 0x1be   : > { %v1875_v30 = vand.u32 4294901760, %v1874_v38 }
 0x1bf   : > { %1498 = vmatmul.f32.gmra.mxu2 %v4540_v45 }
 0x1c0   : > { %1580 = vmatmul.f32.gmra.mxu3 %v4540_v45  ;;  %v5748_v45 = vand.u32 4294901760, %v4583_v41  ;;  %1876 = vmatpush.msrb.mxu1 %v1875_v30 }
 0x1c2   : > { %v4793_v51 = vpop.f32.mrf.mxu2  ;;  %2197 = vmatpush.msra.mxu0 %v5748_v45 }
 0x1c3   : > { %5746 = vst [vmem:[#allocation21_spill] sm:$0xff] %v4793_v51  ;;  %v4795_v53 = vpop.f32.mrf.mxu3  ;;  %v1880_v51 = vsub.f32 %v1878_v57, %v1879_v10  ;;  %v5752_v57 = vand.u32 4294901760, %v4680_v7 }
 0x1c4   : > { %5747 = vst [vmem:[#allocation22_spill] sm:$0xff] %v4795_v53  ;;  %2201 = vmatpush.msra.mxu0 %v5749_v52 }
 0x1c5   : > { %v1881_v53 = vand.u32 4294901760, %v1880_v51 }
 0x1c6   : > { %2205 = vmatpush.msra.mxu0 %v5750_v49 }
 0x1c7   : > { %1502 = vmatmul.f32.gmra.mxu2 %v4548_v47  ;;  %1882 = vmatpush.msrb.mxu1 %v1881_v53 }
 0x1c8   : > { %1584 = vmatmul.f32.gmra.mxu3 %v4548_v47  ;;  %2209 = vmatpush.msra.mxu0 %v5751_v9  ;;  %v5753_v47 = vand.u32 4294901760, %v4709_v62 }
 0x1c9   : > { %2306 = vmatpush.msra.mxu1 %v4578_v61 }
 0x1ca   : > { %v4805_v41 = vpop.f32.mrf.mxu2  ;;  %2213 = vmatpush.msra.mxu0 %v5752_v57 }
 0x1cb   : > { %v4809_v45 = vpop.f32.mrf.mxu3  ;;  %2308 = vmatpush.msra.mxu1 %v4599_v1  ;;  %v1349_v1 = vpop.f32.mrf.mxu1 }
 0x1cc   : > { %2217 = vmatpush.msra.mxu0 %v5753_v47 }
 0x1cd   : > { %2310 = vmatpush.msra.mxu1 %v4623_v58 }
 0x1ce   : > { %2221 = vmatpush.msra.mxu0 %v5754_v35 }
 0x1cf   : > { %1506 = vmatmul.f32.gmra.mxu2 %v4556_v5  ;;  %2312 = vmatpush.msra.mxu1 %v4652_v21  ;;  %v1239_v21 = vadd.f32 %v1238_v55, %v4603_v39 }
 0x1d0   : > { %1588 = vmatmul.f32.gmra.mxu3 %v4556_v5  ;;  %2225 = vmatpush.msra.mxu0 %v1867_v3  ;;  %v1253_v3 = vpop.f32.mrf.mxu0 }
 0x1d1   : > { %2314 = vmatpush.msra.mxu1 %v4676_v48  ;;  %v1338_v7 = vadd.f32 %v1337_v4, %v1239_v21 }
 0x1d2   : > { %v4822_v30 = vpop.f32.mrf.mxu2  ;;  %2229 = vmatpush.msra.mxu0 %v1873_v19 }
 0x1d3   : > { %v4825_v61 = vpop.f32.mrf.mxu3  ;;  %2316 = vmatpush.msra.mxu1 %v4704_v12  ;;  %v1355_v48 = vpop.f32.mrf.mxu1 }
 0x1d4   : > { %2233 = vmatpush.msra.mxu0 %v1879_v10 }
 0x1d5   : > { %2318 = vmatpush.msra.mxu1 %v4728_v24  ;;  %v904_v24 = vmax.f32 %v4458_v29, 0.0  ;;  %v1249_v29 = vadd.f32 %v1248_v25, %v4635_v59 }
 0x1d7   : > { %1510 = vmatmul.f32.gmra.mxu2 %v4564_v17  ;;  %2320 = vmatpush.msra.mxu1 %v4760_v46  ;;  %v1350_v47 = vadd.f32 %v1349_v1, %v1249_v29 }
 0x1d8   : > { %1592 = vmatmul.f32.gmra.mxu3 %v4564_v17  ;;  %v1244_v17 = vadd.f32 %v1243_v43, %v4615_v54  ;;  %v1258_v38 = vpop.f32.mrf.mxu0  ;;  %v905_v54 = vmax.f32 %v4468_v23, 0.0 }
 0x1d9   : > { %2322 = vmatpush.msra.mxu1 %v1684_v14 }
 0x1da   : > { %v4832_v5 = vpop.f32.mrf.mxu2  ;;  %v1344_v51 = vadd.f32 %v1343_v27, %v1244_v17 }
 0x1db   : > { %v4835_v58 = vpop.f32.mrf.mxu3  ;;  %2324 = vmatpush.msra.mxu1 %v1686_v6  ;;  %v1361_v39 = vpop.f32.mrf.mxu1 }
 0x1e0   : > { %v1263_v9 = vpop.f32.mrf.mxu0 }
 0x1e2   : > { %v1451_v19 = vpop.f32.mrf.mxu2 }
 0x1e3   : > { %v1452_v53 = vadd.f32 %v1451_v19, %v1338_v7  ;;  %v1533_v12 = vpop.f32.mrf.mxu3  ;;  %v1367_v25 = vpop.f32.mrf.mxu1 }
 0x1e5   : > { %v1534_v62 = vadd.f32 %v1533_v12, %v1452_v53  ;;  %v1254_v53 = vadd.f32 %v1253_v3, %v4646_v28  ;;  %v906_v12 = vmax.f32 %v4478_v16, 0.0  ;;  %v1259_v3 = vadd.f32 %v1258_v38, %v4664_v22 }
 0x1e7   : > { %v4840_v50 = vmul.f32 %v1534_v62, %v904_v24 }
 0x1e9   : > { %v1615_v46 = vsel %vm1613_vm2, %v4840_v50, 0 }
 0x1ea   : > { %v4844_v55 = vand.u32 4294901760, %v1615_v46  ;;  %v1455_v4 = vpop.f32.mrf.mxu2 }
 0x1eb   : > { %v1456_v10 = vadd.f32 %v1455_v4, %v1344_v51  ;;  %v1537_v14 = vpop.f32.mrf.mxu3  ;;  %v1356_v51 = vadd.f32 %v1355_v48, %v1254_v53  ;;  %v1268_v4 = vpop.f32.mrf.mxu0  ;;  %v1264_v53 = vadd.f32 %v1263_v9, %v4685_v40 }
 0x1ec   : > { %v1689_v6 = vsub.f32 %v1615_v46, %v4844_v55  ;;  %1884 = vmatmul.f32.vlgmr.msrb.gmra.mxu1 %v4844_v55  ;;  %v1269_v9 = vadd.f32 %v1268_v4, %v4696_v13 }
 0x1ed   : > { %v1538_v43 = vadd.f32 %v1537_v14, %v1456_v10 }
 0x1ee   : > { %v1690_v52 = vand.u32 4294901760, %v1689_v6  ;;  %1986 = vmatmul.f32.vlgmr.msra.gmra.mxu2 %v1689_v6 }
 0x1ef   : > { %v4850_v49 = vmul.f32 %v1538_v43, %v905_v54  ;;  %v907_v54 = vmax.f32 %v4488_v0, 0.0 }
 0x1f0   : > { %v1691_v27 = vsub.f32 %v1689_v6, %v1690_v52  ;;  %2094 = vmatmul.f32.vlgmr.msra.gmra.mxu3 %v1690_v52  ;;  %v1373_v52 = vpop.f32.mrf.mxu1 }
 0x1f1   : > { %v1618_v57 = vsel %vm1613_vm2, %v4850_v49, 0 }
 0x1f2   : > { %v1692_v35 = vand.u32 4294901760, %v1691_v27  ;;  %v4854_v21 = vand.u32 4294901760, %v1618_v57  ;;  %v1459_v7 = vpop.f32.mrf.mxu2 }
 0x1f3   : > { %v1460_v19 = vadd.f32 %v1459_v7, %v1350_v47  ;;  %v1541_v59 = vpop.f32.mrf.mxu3  ;;  %v1273_v38 = vpop.f32.mrf.mxu0 }
 0x1f4   : > { %1693 = vmatmul.f32.vlgmr.msrb.gmra.mxu0 %v1692_v35  ;;  %1888 = vmatmul.f32.gmra.mxu1 %v4854_v21  ;;  %v1697_v23 = vsub.f32 %v1618_v57, %v4854_v21  ;;  %v1362_v35 = vadd.f32 %v1361_v39, %v1259_v3  ;;  %v909_v3 = vmax.f32 %v4508_v44, 0.0 }
 0x1f5   : > { %v1542_v17 = vadd.f32 %v1541_v59, %v1460_v19 }
 0x1f6   : > { %1991 = vmatmul.f32.gmra.mxu2 %v1697_v23  ;;  %v1698_v24 = vand.u32 4294901760, %v1697_v23 }
 0x1f7   : > { %v4860_v1 = vmul.f32 %v1542_v17, %v906_v12  ;;  %v908_v12 = vmax.f32 %v4498_v42, 0.0 }
 0x1f8   : > { %2100 = vmatmul.f32.gmra.mxu3 %v1698_v24  ;;  %v1699_v62 = vsub.f32 %v1697_v23, %v1698_v24 }
 0x1f9   : > { %v1621_v46 = vsel %vm1613_vm2, %v4860_v1, 0 }
 0x1fa   : > { %v4864_v10 = vand.u32 4294901760, %v1621_v46  ;;  %v1463_v14 = vpop.f32.mrf.mxu2  ;;  %v1700_v6 = vand.u32 4294901760, %v1699_v62  ;;  %v1379_v62 = vpop.f32.mrf.mxu1 }
 0x1fb   : > { %v1464_v29 = vadd.f32 %v1463_v14, %v1356_v51  ;;  %v1545_v28 = vpop.f32.mrf.mxu3  ;;  %v1368_v14 = vadd.f32 %v1367_v25, %v1264_v53  ;;  %v910_v53 = vmax.f32 %v4518_v20, 0.0 }
 0x1fc   : > { %1701 = vmatmul.f32.gmra.mxu0 %v1700_v6  ;;  %1892 = vmatmul.f32.gmra.mxu1 %v4864_v10  ;;  %v1705_v16 = vsub.f32 %v1621_v46, %v4864_v10 }
 0x1fd   : > { %v1546_v43 = vadd.f32 %v1545_v28, %v1464_v29 }
 0x1fe   : > { %1996 = vmatmul.f32.gmra.mxu2 %v1705_v16  ;;  %v1706_v48 = vand.u32 4294901760, %v1705_v16 }
 0x1ff   : > { %v4870_v27 = vmul.f32 %v1546_v43, %v907_v54  ;;  %v1278_v43 = vpop.f32.mrf.mxu0 }
 0x200   : > { %2106 = vmatmul.f32.gmra.mxu3 %v1706_v48  ;;  %v1707_v57 = vsub.f32 %v1705_v16, %v1706_v48 }
 0x201   : > { %v1624_v47 = vsel %vm1613_vm2, %v4870_v27, 0 }
 0x202   : > { %v4874_v7 = vand.u32 4294901760, %v1624_v47  ;;  %v1467_v19 = vpop.f32.mrf.mxu2  ;;  %v1708_v59 = vand.u32 4294901760, %v1707_v57 }
 0x203   : > { %v1468_v23 = vadd.f32 %v1467_v19, %v1362_v35  ;;  %v1549_v22 = vpop.f32.mrf.mxu3  ;;  %v1374_v35 = vadd.f32 %v1373_v52, %v1269_v9  ;;  %v1385_v19 = vpop.f32.mrf.mxu1  ;;  %v788_v9 = vadd.f32 %v4617_v63, %v4530_v26 }
 0x204   : > { %1709 = vmatmul.f32.gmra.mxu0 %v1708_v59  ;;  %1896 = vmatmul.f32.gmra.mxu1 %v4874_v7  ;;  %v1713_v0 = vsub.f32 %v1624_v47, %v4874_v7 }
 0x205   : > { %v1550_v17 = vadd.f32 %v1549_v22, %v1468_v23 }
 0x206   : > { %2001 = vmatmul.f32.gmra.mxu2 %v1713_v0  ;;  %v1714_v24 = vand.u32 4294901760, %v1713_v0 }
 0x207   : > { %v4880_v39 = vmul.f32 %v1550_v17, %v908_v12 }
 0x208   : > { %2112 = vmatmul.f32.gmra.mxu3 %v1714_v24  ;;  %v1715_v46 = vsub.f32 %v1713_v0, %v1714_v24  ;;  %v1274_v0 = vadd.f32 %v1273_v38, %v4716_v34  ;;  %v1283_v24 = vpop.f32.mrf.mxu0 }
 0x209   : > { %v1627_v51 = vsel %vm1613_vm2, %v4880_v39, 0 }
 0x20a   : > { %v4884_v6 = vand.u32 4294901760, %v1627_v51  ;;  %v1471_v29 = vpop.f32.mrf.mxu2  ;;  %v1716_v28 = vand.u32 4294901760, %v1715_v46 }
 0x20b   : > { %v1472_v16 = vadd.f32 %v1471_v29, %v1368_v14  ;;  %v1553_v40 = vpop.f32.mrf.mxu3  ;;  %v1380_v29 = vadd.f32 %v1379_v62, %v1274_v0 }
 0x20c   : > { %1717 = vmatmul.f32.gmra.mxu0 %v1716_v28  ;;  %1900 = vmatmul.f32.gmra.mxu1 %v4884_v6  ;;  %v1721_v42 = vsub.f32 %v1627_v51, %v4884_v6  ;;  %v1187_v51 = vadd.f32 %v4732_v2, %v4730_v60  ;;  %v911_v2 = vmax.f32 %v4525_v56, 0.0 }
 0x20d   : > { %v1554_v54 = vadd.f32 %v1553_v40, %v1472_v16  ;;  %v1391_v40 = vpop.f32.mrf.mxu1 }
 0x20e   : > { %2006 = vmatmul.f32.gmra.mxu2 %v1721_v42  ;;  %v1722_v48 = vand.u32 4294901760, %v1721_v42  ;;  %v1279_v60 = vadd.f32 %v1278_v43, %v1187_v51 }
 0x20f   : > { %v4890_v25 = vmul.f32 %v1554_v54, %v909_v3 }
 0x210   : > { %2118 = vmatmul.f32.gmra.mxu3 %v1722_v48  ;;  %v1723_v57 = vsub.f32 %v1721_v42, %v1722_v48  ;;  %v1288_v26 = vpop.f32.mrf.mxu0 }
 0x211   : > { %v1630_v47 = vsel %vm1613_vm2, %v4890_v25, 0 }
 0x212   : > { %v4894_v59 = vand.u32 4294901760, %v1630_v47  ;;  %v1475_v23 = vpop.f32.mrf.mxu2  ;;  %v1724_v22 = vand.u32 4294901760, %v1723_v57  ;;  %v874_v57 = vadd.f32 %v4631_v37, %v788_v9  ;;  %v792_v37 = vadd.f32 %v4641_v18, %v4538_v8 }
 0x213   : > { %v1476_v13 = vadd.f32 %v1475_v23, %v1374_v35  ;;  %v1557_v4 = vpop.f32.mrf.mxu3  ;;  %v1386_v23 = vadd.f32 %v1385_v19, %v1279_v60 }
 0x214   : > { %1725 = vmatmul.f32.gmra.mxu0 %v1724_v22  ;;  %1904 = vmatmul.f32.gmra.mxu1 %v4894_v59  ;;  %v1729_v44 = vsub.f32 %v1630_v47, %v4894_v59  ;;  %v1191_v47 = vadd.f32 %v4752_v31, %v4747_v36  ;;  %v912_v36 = vmax.f32 %v874_v57, 0.0  ;;  %v5758_v57 = vld [vmem:[#allocation20_spill] sm:$0xff] }
 0x215   : > { %v1558_v12 = vadd.f32 %v1557_v4, %v1476_v13  ;;  %v1397_v0 = vpop.f32.mrf.mxu1 }
 0x216   : > { %2011 = vmatmul.f32.gmra.mxu2 %v1729_v44  ;;  %v1730_v17 = vand.u32 4294901760, %v1729_v44  ;;  %v1284_v31 = vadd.f32 %v1283_v24, %v1191_v47 }
 0x217   : > { %v4900_v52 = vmul.f32 %v1558_v12, %v910_v53 }
 0x218   : > { %2124 = vmatmul.f32.gmra.mxu3 %v1730_v17  ;;  %v1731_v46 = vsub.f32 %v1729_v44, %v1730_v17  ;;  %v878_v17 = vadd.f32 %v4644_v33, %v792_v37  ;;  %v5755_v33 = vld [vmem:[#allocation7_spill] sm:$0xff]  ;;  %v5760_v37 = vld [vmem:[#allocation9_spill] sm:$0xff] }
 0x219   : > { %v1633_v14 = vsel %vm1613_vm2, %v4900_v52, 0 }
 0x21a   : > { %v4906_v28 = vand.u32 4294901760, %v1633_v14  ;;  %v1479_v34 = vpop.f32.mrf.mxu2  ;;  %v1732_v38 = vand.u32 4294901760, %v1731_v46  ;;  %v1195_v46 = vadd.f32 %v4770_v15, %v4768_v32  ;;  %v913_v15 = vmax.f32 %v878_v17, 0.0 }
 0x21b   : > { %v1480_v20 = vadd.f32 %v1479_v34, %v1380_v29  ;;  %v1561_v16 = vpop.f32.mrf.mxu3 }
 0x21c   : > { %1733 = vmatmul.f32.gmra.mxu0 %v1732_v38  ;;  %1908 = vmatmul.f32.gmra.mxu1 %v4906_v28  ;;  %v1737_v42 = vsub.f32 %v1633_v14, %v4906_v28  ;;  %v1392_v14 = vadd.f32 %v1391_v40, %v1284_v31  ;;  %v1293_v38 = vpop.f32.mrf.mxu0  ;;  %v1289_v32 = vadd.f32 %v1288_v26, %v1195_v46 }
 0x21d   : > { %v1562_v3 = vadd.f32 %v1561_v16, %v1480_v20  ;;  %v796_v16 = vadd.f32 %v5755_v33, %v4546_v11  ;;  %v1403_v60 = vpop.f32.mrf.mxu1 }
 0x21e   : > { %2016 = vmatmul.f32.gmra.mxu2 %v1737_v42  ;;  %v1738_v62 = vand.u32 4294901760, %v1737_v42 }
 0x21f   : > { %v4913_v54 = vmul.f32 %v1562_v3, %v911_v2  ;;  %v5756_v3 = vld [vmem:[#allocation8_spill] sm:$0xff] }
 0x220   : > { %2130 = vmatmul.f32.gmra.mxu3 %v1738_v62  ;;  %v1739_v48 = vsub.f32 %v1737_v42, %v1738_v62  ;;  %v882_v62 = vadd.f32 %v5756_v3, %v796_v16  ;;  %v5765_v3 = vld [vmem:[#allocation11_spill] sm:$0xff] }
 0x221   : > { %v1636_v35 = vsel %vm1613_vm2, %v4913_v54, 0 }
 0x222   : > { %v4920_v63 = vand.u32 4294901760, %v1636_v35  ;;  %v1483_v56 = vpop.f32.mrf.mxu2  ;;  %v1740_v43 = vand.u32 4294901760, %v1739_v48  ;;  %v5757_v48 = vld [vmem:[#allocation19_spill] sm:$0xff] }
 0x223   : > { %v1484_v22 = vadd.f32 %v1483_v56, %v1386_v23  ;;  %v1565_v13 = vpop.f32.mrf.mxu3  ;;  %v1199_v47 = vadd.f32 %v5758_v57, %v5757_v48  ;;  %v1398_v23 = vadd.f32 %v1397_v0, %v1289_v32 }
 0x224   : > { %1741 = vmatmul.f32.gmra.mxu0 %v1740_v43  ;;  %1912 = vmatmul.f32.gmra.mxu1 %v4920_v63  ;;  %v1745_v4 = vsub.f32 %v1636_v35, %v4920_v63 }
 0x225   : > { %v1566_v44 = vadd.f32 %v1565_v13, %v1484_v22  ;;  %v1409_v33 = vpop.f32.mrf.mxu1 }
 0x226   : > { %2021 = vmatmul.f32.gmra.mxu2 %v1745_v4  ;;  %v1746_v19 = vand.u32 4294901760, %v1745_v4 }
 0x227   : > { %v4926_v53 = vmul.f32 %v1566_v44, %v912_v36  ;;  %v1294_v36 = vadd.f32 %v1293_v38, %v1199_v47  ;;  %v914_v44 = vmax.f32 %v882_v62, 0.0 }
 0x228   : > { %2136 = vmatmul.f32.gmra.mxu3 %v1746_v19  ;;  %v1747_v12 = vsub.f32 %v1745_v4, %v1746_v19  ;;  %v5759_v4 = vld [vmem:[#allocation2_spill] sm:$0xff] }
 0x229   : > { %v1639_v51 = vsel %vm1613_vm2, %v4926_v53, 0  ;;  %v800_v31 = vadd.f32 %v5760_v37, %v5759_v4 }
 0x22a   : > { %v4933_v8 = vand.u32 4294901760, %v1639_v51  ;;  %v1487_v18 = vpop.f32.mrf.mxu2  ;;  %v1748_v24 = vand.u32 4294901760, %v1747_v12  ;;  %v1298_v12 = vpop.f32.mrf.mxu0 }
 0x22b   : > { %v1488_v29 = vadd.f32 %v1487_v18, %v1392_v14  ;;  %v1569_v34 = vpop.f32.mrf.mxu3  ;;  %v5762_v18 = vld [vmem:[#allocation21_spill] sm:$0xff] }
 0x22c   : > { %1749 = vmatmul.f32.gmra.mxu0 %v1748_v24  ;;  %1916 = vmatmul.f32.gmra.mxu1 %v4933_v8  ;;  %v1753_v20 = vsub.f32 %v1639_v51, %v4933_v8  ;;  %v5761_v51 = vld [vmem:[#allocation10_spill] sm:$0xff] }
 0x22d   : > { %v1570_v42 = vadd.f32 %v1569_v34, %v1488_v29  ;;  %v886_v14 = vadd.f32 %v5761_v51, %v800_v31  ;;  %v5763_v24 = vld [vmem:[#allocation22_spill] sm:$0xff]  ;;  %v5768_v51 = vld [vmem:[#allocation13_spill] sm:$0xff] }
 0x22e   : > { %2026 = vmatmul.f32.gmra.mxu2 %v1753_v20  ;;  %v1754_v40 = vand.u32 4294901760, %v1753_v20  ;;  %v1203_v29 = vadd.f32 %v5763_v24, %v5762_v18 }
 0x22f   : > { %v4939_v9 = vmul.f32 %v1570_v42, %v913_v15  ;;  %v915_v57 = vmax.f32 %v886_v14, 0.0 }
 0x230   : > { %2142 = vmatmul.f32.gmra.mxu3 %v1754_v40  ;;  %v1755_v2 = vsub.f32 %v1753_v20, %v1754_v40  ;;  %v1404_v20 = vadd.f32 %v1403_v60, %v1294_v36  ;;  %v1299_v48 = vadd.f32 %v1298_v12, %v1203_v29  ;;  %v1415_v12 = vpop.f32.mrf.mxu1 }
 0x231   : > { %v1642_v35 = vsel %vm1613_vm2, %v4939_v9, 0 }
 0x232   : > { %v4946_v11 = vand.u32 4294901760, %v1642_v35  ;;  %v1491_v26 = vpop.f32.mrf.mxu2  ;;  %v1756_v56 = vand.u32 4294901760, %v1755_v2  ;;  %v5764_v2 = vld [vmem:[#allocation3_spill] sm:$0xff]  ;;  %v1410_v4 = vadd.f32 %v1409_v33, %v1299_v48 }
 0x233   : > { %v1492_v43 = vadd.f32 %v1491_v26, %v1398_v23  ;;  %v1573_v22 = vpop.f32.mrf.mxu3  ;;  %v804_v62 = vadd.f32 %v5765_v3, %v5764_v2  ;;  %v1303_v23 = vpop.f32.mrf.mxu0 }
 0x234   : > { %1757 = vmatmul.f32.gmra.mxu0 %v1756_v56  ;;  %1920 = vmatmul.f32.gmra.mxu1 %v4946_v11  ;;  %v1761_v13 = vsub.f32 %v1642_v35, %v4946_v11  ;;  %v5766_v56 = vld [vmem:[#allocation12_spill] sm:$0xff] }
 0x235   : > { %v1574_v19 = vadd.f32 %v1573_v22, %v1492_v43  ;;  %v890_v43 = vadd.f32 %v5766_v56, %v804_v62  ;;  %v1207_v22 = vadd.f32 %v4809_v45, %v4805_v41 }
 0x236   : > { %2031 = vmatmul.f32.gmra.mxu2 %v1761_v13  ;;  %v1762_v0 = vand.u32 4294901760, %v1761_v13 }
 0x237   : > { %v4952_v17 = vmul.f32 %v1574_v19, %v914_v44  ;;  %v1304_v41 = vadd.f32 %v1303_v23, %v1207_v22  ;;  %v916_v45 = vmax.f32 %v890_v43, 0.0 }
 0x238   : > { %2148 = vmatmul.f32.gmra.mxu3 %v1762_v0  ;;  %v1763_v46 = vsub.f32 %v1761_v13, %v1762_v0  ;;  %v1421_v56 = vpop.f32.mrf.mxu1 }
 0x239   : > { %v1645_v34 = vsel %vm1613_vm2, %v4952_v17, 0 }
 0x23a   : > { %v4959_v38 = vand.u32 4294901760, %v1645_v34  ;;  %v1495_v16 = vpop.f32.mrf.mxu2  ;;  %v1764_v32 = vand.u32 4294901760, %v1763_v46  ;;  %v5767_v46 = vld [vmem:[#allocation4_spill] sm:$0xff] }
 0x23b   : > { %v1496_v15 = vadd.f32 %v1495_v16, %v1404_v20  ;;  %v1577_v42 = vpop.f32.mrf.mxu3  ;;  %v808_v14 = vadd.f32 %v5768_v51, %v5767_v46  ;;  %v5770_v20 = vld [vmem:[#allocation14_spill] sm:$0xff]  ;;  %v1211_v16 = vadd.f32 %v4825_v61, %v4822_v30 }
 0x23c   : > { %1765 = vmatmul.f32.gmra.mxu0 %v1764_v32  ;;  %1924 = vmatmul.f32.gmra.mxu1 %v4959_v38  ;;  %v1769_v40 = vsub.f32 %v1645_v34, %v4959_v38 }
 0x23d   : > { %v1578_v47 = vadd.f32 %v1577_v42, %v1496_v15  ;;  %v894_v33 = vadd.f32 %v5770_v20, %v808_v14  ;;  %v1416_v15 = vadd.f32 %v1415_v12, %v1304_v41  ;;  %v1308_v42 = vpop.f32.mrf.mxu0 }
 0x23e   : > { %2036 = vmatmul.f32.gmra.mxu2 %v1769_v40  ;;  %v1770_v60 = vand.u32 4294901760, %v1769_v40  ;;  %v1309_v30 = vadd.f32 %v1308_v42, %v1211_v16  ;;  %v5778_v42 = vld [vmem:[#allocation18_spill] sm:$0xff] }
 0x23f   : > { %v4965_v35 = vmul.f32 %v1578_v47, %v915_v57  ;;  %v5771_v47 = vld [vmem:[#allocation5_spill] sm:$0xff]  ;;  %v917_v61 = vmax.f32 %v894_v33, 0.0 }
 0x240   : > { %2154 = vmatmul.f32.gmra.mxu3 %v1770_v60  ;;  %v1771_v26 = vsub.f32 %v1769_v40, %v1770_v60  ;;  %v5772_v60 = vld [vmem:[#allocation15_spill] sm:$0xff] }
 0x241   : > { %v1648_v13 = vsel %vm1613_vm2, %v4965_v35, 0  ;;  %v812_v23 = vadd.f32 %v5772_v60, %v5771_v47 }
 0x242   : > { %v4972_v37 = vand.u32 4294901760, %v1648_v13  ;;  %v1499_v31 = vpop.f32.mrf.mxu2  ;;  %v1772_v36 = vand.u32 4294901760, %v1771_v26 }
 0x243   : > { %v1500_v44 = vadd.f32 %v1499_v31, %v1410_v4  ;;  %v1581_v19 = vpop.f32.mrf.mxu3  ;;  %v5774_v4 = vld [vmem:[#allocation16_spill] sm:$0xff] }
 0x244   : > { %1773 = vmatmul.f32.gmra.mxu0 %v1772_v36  ;;  %1928 = vmatmul.f32.gmra.mxu1 %v4972_v37  ;;  %v1777_v0 = vsub.f32 %v1648_v13, %v4972_v37  ;;  %v898_v31 = vadd.f32 %v5774_v4, %v812_v23  ;;  %v1215_v36 = vadd.f32 %v4835_v58, %v4832_v5 }
 0x245   : > { %v1582_v18 = vadd.f32 %v1581_v19, %v1500_v44  ;;  %v1422_v19 = vadd.f32 %v1421_v56, %v1309_v30  ;;  %v1313_v41 = vpop.f32.mrf.mxu0 }
 0x246   : > { %2041 = vmatmul.f32.gmra.mxu2 %v1777_v0  ;;  %v1778_v24 = vand.u32 4294901760, %v1777_v0  ;;  %v1314_v5 = vadd.f32 %v1313_v41, %v1215_v36  ;;  %v918_v58 = vmax.f32 %v898_v31, 0.0 }
 0x247   : > { %v4978_v29 = vmul.f32 %v1582_v18, %v916_v45  ;;  %v5775_v18 = vld [vmem:[#allocation6_spill] sm:$0xff] }
 0x248   : > { %2160 = vmatmul.f32.gmra.mxu3 %v1778_v24  ;;  %v1779_v34 = vsub.f32 %v1777_v0, %v1778_v24  ;;  %v5776_v24 = vld [vmem:[#allocation17_spill] sm:$0xff] }
 0x249   : > { %5769 = vst [vmem:[#allocation7_spill] sm:$0xff] %v4978_v29  ;;  %v1651_v32 = vsel %vm1613_vm2, %v4978_v29, 0 }
 0x24a   : > { %v4985_v40 = vand.u32 4294901760, %v1651_v32  ;;  %v1503_v2 = vpop.f32.mrf.mxu2  ;;  %v1780_v3 = vand.u32 4294901760, %v1779_v34  ;;  %v816_v34 = vadd.f32 %v5776_v24, %v5775_v18 }
 0x24b   : > { %v1504_v62 = vadd.f32 %v1503_v2, %v1416_v15  ;;  %v1585_v48 = vpop.f32.mrf.mxu3 }
 0x24c   : > { %1781 = vmatmul.f32.gmra.mxu0 %v1780_v3  ;;  %1932 = vmatmul.f32.gmra.mxu1 %v4985_v40  ;;  %v1785_v57 = vsub.f32 %v1651_v32, %v4985_v40  ;;  %v1427_v32 = vpop.f32.mrf.mxu1  ;;  %v902_v2 = vadd.f32 %v5778_v42, %v816_v34 }
 0x24d   : > { %v1586_v26 = vadd.f32 %v1585_v48, %v1504_v62  ;;  %v1428_v62 = vadd.f32 %v1427_v32, %v1314_v5 }
 0x24e   : > { %2046 = vmatmul.f32.gmra.mxu2 %v1785_v57  ;;  %v1786_v43 = vand.u32 4294901760, %v1785_v57 }
 0x24f   : > { %v4991_v22 = vmul.f32 %v1586_v26, %v917_v61  ;;  %v919_v61 = vmax.f32 %v902_v2, 0.0 }
 0x250   : > { %2166 = vmatmul.f32.gmra.mxu3 %v1786_v43  ;;  %v1787_v13 = vsub.f32 %v1785_v57, %v1786_v43 }
 0x251   : > { %5773 = vst [vmem:[#allocation8_spill] sm:$0xff] %v4991_v22  ;;  %v1654_v44 = vsel %vm1613_vm2, %v4991_v22, 0 }
 0x252   : > { %v4998_v12 = vand.u32 4294901760, %v1654_v44  ;;  %v1507_v0 = vpop.f32.mrf.mxu2  ;;  %v1788_v46 = vand.u32 4294901760, %v1787_v13 }
 0x253   : > { %v1508_v51 = vadd.f32 %v1507_v0, %v1422_v19  ;;  %v1589_v14 = vpop.f32.mrf.mxu3 }
 0x254   : > { %1789 = vmatmul.f32.gmra.mxu0 %v1788_v46  ;;  %1936 = vmatmul.f32.gmra.mxu1 %v4998_v12  ;;  %v1793_v45 = vsub.f32 %v1654_v44, %v4998_v12  ;;  %v166_v46 = vld [vmem:[%s5714_s1 + $0x98] sm:$0xff] }
 0x255   : > { %v1590_v20 = vadd.f32 %v1589_v14, %v1508_v51  ;;  %v5026_v14 = vand.u32 4294901760, %v166_v46 }
 0x256   : > { %2051 = vmatmul.f32.gmra.mxu2 %v1793_v45  ;;  %v1794_v33 = vand.u32 4294901760, %v1793_v45 }
 0x257   : > { %v5004_v16 = vmul.f32 %v1590_v20, %v918_v58  ;;  %2485 = vmatpush.msrb.mxu2 %v5026_v14  ;;  %2840 = vmatpush.msrb.mxu1 %v5026_v14 }
 0x258   : > { %2172 = vmatmul.f32.gmra.mxu3 %v1794_v33  ;;  %v1795_v15 = vsub.f32 %v1793_v45, %v1794_v33  ;;  %v5030_v45 = vsub.f32 %v166_v46, %v5026_v14 }
 0x259   : > { %5777 = vst [vmem:[#allocation19_spill] sm:$0xff] %v5004_v16  ;;  %v1657_v3 = vsel %vm1613_vm2, %v5004_v16, 0 }
 0x25a   : > { %v5009_v48 = vand.u32 4294901760, %v1657_v3  ;;  %v1511_v57 = vpop.f32.mrf.mxu2  ;;  %v1796_v47 = vand.u32 4294901760, %v1795_v15  ;;  %v2635_v18 = vand.u32 4294901760, %v5030_v45  ;;  %2736 = vmatpush.msrb.mxu0 %v5030_v45 }
 0x25b   : > { %v1512_v60 = vadd.f32 %v1511_v57, %v1428_v62  ;;  %v1593_v23 = vpop.f32.mrf.mxu3 }
 0x25c   : > { %1797 = vmatmul.f32.gmra.mxu0 %v1796_v47  ;;  %1940 = vmatmul.f32.gmra.mxu1 %v5009_v48  ;;  %v1801_v30 = vsub.f32 %v1657_v3, %v5009_v48  ;;  %v2636_v24 = vsub.f32 %v5030_v45, %v2635_v18 }
 0x25d   : > { %v1594_v26 = vadd.f32 %v1593_v23, %v1512_v60 }
 0x25e   : > { %2056 = vmatmul.f32.gmra.mxu2 %v1801_v30  ;;  %v1802_v56 = vand.u32 4294901760, %v1801_v30  ;;  %v2637_v58 = vand.u32 4294901760, %v2636_v24 }
 0x25f   : > { %v5013_v43 = vmul.f32 %v1594_v26, %v919_v61 }
 0x260   : > { %2178 = vmatmul.f32.gmra.mxu3 %v1802_v56  ;;  %v1803_v13 = vsub.f32 %v1801_v30, %v1802_v56 }
 0x261   : > { %5779 = vst [vmem:[#allocation20_spill] sm:$0xff] %v5013_v43  ;;  %v1660_v4 = vsel %vm1613_vm2, %v5013_v43, 0  ;;  %2638 = vmatpush.msrb.mxu3 %v2637_v58 }
 0x262   : > { %v5017_v31 = vand.u32 4294901760, %v1660_v4  ;;  %v1804_v36 = vand.u32 4294901760, %v1803_v13 }
 0x264   : > { %1805 = vmatmul.f32.gmra.mxu0 %v1804_v36  ;;  %1944 = vmatmul.f32.gmra.mxu1 %v5017_v31  ;;  %v1809_v44 = vsub.f32 %v1660_v4, %v5017_v31 }
 0x266   : > { %2061 = vmatmul.f32.gmra.mxu2 %v1809_v44  ;;  %v1810_v19 = vand.u32 4294901760, %v1809_v44 }
 0x268   : > { %2184 = vmatmul.f32.gmra.mxu3 %v1810_v19  ;;  %v1811_v0 = vsub.f32 %v1809_v44, %v1810_v19 }
 0x269   : > { %v5024_v51 = vpop.f32.mrf.mxu1 }
 0x26a   : > { %v1812_v41 = vand.u32 4294901760, %v1811_v0 }
 0x26c   : > { %1813 = vmatmul.f32.gmra.mxu0 %v1812_v41  ;;  %2326 = vmatmul.f32.vlgmr.msra.gmra.mxu1 %v4844_v55 }
 0x271   : > { %v5039_v34 = vpop.f32.mrf.mxu0  ;;  %v5041_v5 = vpop.f32.mrf.mxu1 }
 0x274   : > { %2235 = vmatmul.f32.vlgmr.msra.gmra.mxu0 %v4844_v55  ;;  %2330 = vmatmul.f32.gmra.mxu1 %v4854_v21  ;;  %v165_v55 = vld [vmem:[%s5714_s1 + $0x90] sm:$0xff] }
 0x275   : > { %v5064_v3 = vand.u32 4294901760, %v165_v55 }
 0x277   : > { %2487 = vmatpush.msrb.mxu2 %v5064_v3  ;;  %2842 = vmatpush.msrb.mxu1 %v5064_v3 }
 0x279   : > { %v5045_v20 = vpop.f32.mrf.mxu0  ;;  %v5047_v33 = vpop.f32.mrf.mxu1 }
 0x27c   : > { %2239 = vmatmul.f32.gmra.mxu0 %v4854_v21  ;;  %2334 = vmatmul.f32.gmra.mxu1 %v4864_v10  ;;  %v2640_v21 = vsub.f32 %v165_v55, %v5064_v3 }
 0x27e   : > { %2739 = vmatpush.msrb.mxu0 %v2640_v21 }
 0x281   : > { %v5051_v32 = vpop.f32.mrf.mxu0  ;;  %v5053_v15 = vpop.f32.mrf.mxu1 }
 0x284   : > { %2243 = vmatmul.f32.gmra.mxu0 %v4864_v10  ;;  %2338 = vmatmul.f32.gmra.mxu1 %v4874_v7  ;;  %v2641_v10 = vand.u32 4294901760, %v2640_v21 }
 0x286   : > { %v2642_v62 = vsub.f32 %v2640_v21, %v2641_v10  ;;  %v1987_v21 = vpop.f32.mrf.mxu2 }
 0x288   : > { %v2643_v60 = vand.u32 4294901760, %v2642_v62 }
 0x289   : > { %v5060_v42 = vpop.f32.mrf.mxu0  ;;  %v5062_v2 = vpop.f32.mrf.mxu1 }
 0x28a   : > { %2644 = vmatpush.msrb.mxu3 %v2643_v60  ;;  %v2095_v60 = vpop.f32.mrf.mxu3 }
 0x28c   : > { %2247 = vmatmul.f32.gmra.mxu0 %v4874_v7  ;;  %2342 = vmatmul.f32.gmra.mxu1 %v4884_v6 }
 0x291   : > { %v5071_v57 = vpop.f32.mrf.mxu0  ;;  %v5073_v47 = vpop.f32.mrf.mxu1 }
 0x294   : > { %2251 = vmatmul.f32.gmra.mxu0 %v4884_v6  ;;  %2346 = vmatmul.f32.gmra.mxu1 %v4894_v59  ;;  %v164_v6 = vld [vmem:[%s5714_s1 + $0x88] sm:$0xff] }
 0x295   : > { %v2488_v13 = vand.u32 4294901760, %v164_v6 }
 0x297   : > { %2489 = vmatpush.msrb.mxu2 %v2488_v13  ;;  %2844 = vmatpush.msrb.mxu1 %v2488_v13 }
 0x299   : > { %v5077_v23 = vpop.f32.mrf.mxu0  ;;  %v5079_v30 = vpop.f32.mrf.mxu1 }
 0x29c   : > { %2255 = vmatmul.f32.gmra.mxu0 %v4894_v59  ;;  %2350 = vmatmul.f32.gmra.mxu1 %v4906_v28  ;;  %v2646_v59 = vsub.f32 %v164_v6, %v2488_v13 }
 0x29e   : > { %v2647_v4 = vand.u32 4294901760, %v2646_v59  ;;  %2742 = vmatpush.msrb.mxu0 %v2646_v59 }
 0x2a1   : > { %v5083_v7 = vpop.f32.mrf.mxu0  ;;  %v5085_v61 = vpop.f32.mrf.mxu1 }
 0x2a4   : > { %2259 = vmatmul.f32.gmra.mxu0 %v4906_v28  ;;  %2354 = vmatmul.f32.gmra.mxu1 %v4920_v63  ;;  %v2648_v28 = vsub.f32 %v2646_v59, %v2647_v4 }
 0x2a6   : > { %v2649_v19 = vand.u32 4294901760, %v2648_v28 }
 0x2a8   : > { %2650 = vmatpush.msrb.mxu3 %v2649_v19 }
 0x2a9   : > { %v5092_v26 = vpop.f32.mrf.mxu0  ;;  %v5094_v56 = vpop.f32.mrf.mxu1 }
 0x2ac   : > { %2263 = vmatmul.f32.gmra.mxu0 %v4920_v63  ;;  %2358 = vmatmul.f32.gmra.mxu1 %v4933_v8 }
 0x2b1   : > { %v5098_v36 = vpop.f32.mrf.mxu0  ;;  %v5100_v44 = vpop.f32.mrf.mxu1 }
 0x2b4   : > { %2267 = vmatmul.f32.gmra.mxu0 %v4933_v8  ;;  %2362 = vmatmul.f32.gmra.mxu1 %v4946_v11  ;;  %v163_v8 = vld [vmem:[%s5714_s1 + $0x80] sm:$0xff] }
 0x2b5   : > { %v2490_v55 = vand.u32 4294901760, %v163_v8 }
 0x2b7   : > { %2491 = vmatpush.msrb.mxu2 %v2490_v55  ;;  %2846 = vmatpush.msrb.mxu1 %v2490_v55 }
 0x2b9   : > { %v5104_v0 = vpop.f32.mrf.mxu0  ;;  %v5106_v46 = vpop.f32.mrf.mxu1  ;;  %2959 = vmatpush.msra.mxu2 %v2635_v18 }
 0x2bb   : > { %2963 = vmatpush.msra.mxu2 %v2641_v10  ;;  %v2101_v10 = vpop.f32.mrf.mxu3 }
 0x2bc   : > { %2271 = vmatmul.f32.gmra.mxu0 %v4946_v11  ;;  %2366 = vmatmul.f32.gmra.mxu1 %v4959_v38  ;;  %v2652_v11 = vsub.f32 %v163_v8, %v2490_v55 }
 0x2bd   : > { %2967 = vmatpush.msra.mxu2 %v2647_v4 }
 0x2be   : > { %2745 = vmatpush.msrb.mxu0 %v2652_v11 }
 0x2c1   : > { %v5110_v63 = vpop.f32.mrf.mxu0  ;;  %v5112_v41 = vpop.f32.mrf.mxu1 }
 0x2c4   : > { %2275 = vmatmul.f32.gmra.mxu0 %v4959_v38  ;;  %2370 = vmatmul.f32.gmra.mxu1 %v4972_v37  ;;  %v2653_v38 = vand.u32 4294901760, %v2652_v11 }
 0x2c6   : > { %v2654_v62 = vsub.f32 %v2652_v11, %v2653_v38  ;;  %2971 = vmatpush.msra.mxu2 %v2653_v38 }
 0x2c8   : > { %v2655_v28 = vand.u32 4294901760, %v2654_v62 }
 0x2c9   : > { %v5119_v24 = vpop.f32.mrf.mxu0  ;;  %v5121_v58 = vpop.f32.mrf.mxu1 }
 0x2ca   : > { %2656 = vmatpush.msrb.mxu3 %v2655_v28 }
 0x2cc   : > { %2279 = vmatmul.f32.gmra.mxu0 %v4972_v37  ;;  %2374 = vmatmul.f32.gmra.mxu1 %v4985_v40  ;;  %v1992_v37 = vpop.f32.mrf.mxu2 }
 0x2cd   : > { %3050 = vmatpush.msra.mxu3 %v5026_v14 }
 0x2cf   : > { %3052 = vmatpush.msra.mxu3 %v5064_v3 }
 0x2d1   : > { %v5127_v6 = vpop.f32.mrf.mxu0  ;;  %v5129_v59 = vpop.f32.mrf.mxu1  ;;  %3054 = vmatpush.msra.mxu3 %v2488_v13 }
 0x2d2   : > { %v2107_v13 = vpop.f32.mrf.mxu3 }
 0x2d3   : > { %3056 = vmatpush.msra.mxu3 %v2490_v55 }
 0x2d4   : > { %2283 = vmatmul.f32.gmra.mxu0 %v4985_v40  ;;  %2378 = vmatmul.f32.gmra.mxu1 %v4998_v12  ;;  %v5144_v40 = vld [vmem:[%s5714_s1 + $0xc1] ss:$0 sm:$0xff]  ;;  %v1997_v14 = vpop.f32.mrf.mxu2 }
 0x2d5   : > { %v1695_v19 = vadd.f32 %v5144_v40, %v5039_v34  ;;  %v1703_v62 = vadd.f32 %v5144_v40, %v5045_v20 }
 0x2d7   : > { %v1890_v34 = vadd.f32 %v5041_v5, %v1703_v62 }
 0x2d9   : > { %v5135_v45 = vpop.f32.mrf.mxu0  ;;  %v5137_v18 = vpop.f32.mrf.mxu1 }
 0x2da   : > { %v2113_v28 = vpop.f32.mrf.mxu3 }
 0x2dc   : > { %2287 = vmatmul.f32.gmra.mxu0 %v4998_v12  ;;  %2382 = vmatmul.f32.gmra.mxu1 %v5009_v48  ;;  %v1886_v12 = vadd.f32 %v5024_v51, %v1695_v19  ;;  %v2002_v11 = vpop.f32.mrf.mxu2  ;;  %v1711_v51 = vadd.f32 %v5144_v40, %v5051_v32  ;;  %v1719_v32 = vadd.f32 %v5144_v40, %v5060_v42 }
 0x2de   : > { %v1988_v38 = vadd.f32 %v1987_v21, %v1886_v12  ;;  %v1894_v20 = vadd.f32 %v5047_v33, %v1711_v51 }
 0x2e0   : > { %v2096_v43 = vadd.f32 %v2095_v60, %v1988_v38 }
 0x2e1   : > { %v5146_v4 = vpop.f32.mrf.mxu0  ;;  %v5148_v3 = vpop.f32.mrf.mxu1 }
 0x2e2   : > { %5780 = vst [vmem:[#allocation2_spill] sm:$0xff] %v5148_v3  ;;  %v1993_v3 = vadd.f32 %v1992_v37, %v1890_v34  ;;  %v2119_v12 = vpop.f32.mrf.mxu3 }
 0x2e4   : > { %2291 = vmatmul.f32.gmra.mxu0 %v5009_v48  ;;  %2386 = vmatmul.f32.gmra.mxu1 %v5017_v31  ;;  %v2007_v19 = vpop.f32.mrf.mxu2  ;;  %v2102_v21 = vadd.f32 %v2101_v10, %v1993_v3  ;;  %v1898_v3 = vadd.f32 %v5053_v15, %v1719_v32 }
 0x2e9   : > { %v5155_v8 = vpop.f32.mrf.mxu0  ;;  %v2327_v55 = vpop.f32.mrf.mxu1 }
 0x2ea   : > { %5781 = vst [vmem:[#allocation9_spill] sm:$0xff] %v5155_v8  ;;  %v2125_v51 = vpop.f32.mrf.mxu3 }
 0x2ec   : > { %2295 = vmatmul.f32.gmra.mxu0 %v5017_v31  ;;  %v2012_v33 = vpop.f32.mrf.mxu2 }
 0x2f1   : > { %v2236_v16 = vpop.f32.mrf.mxu0  ;;  %v2331_v48 = vpop.f32.mrf.mxu1 }
 0x2f2   : > { %v2237_v22 = vadd.f32 %v2236_v16, %v2096_v43  ;;  %v1998_v43 = vadd.f32 %v1997_v14, %v1894_v20 }
 0x2f4   : > { %v2328_v8 = vadd.f32 %v2327_v55, %v2237_v22  ;;  %v2017_v32 = vpop.f32.mrf.mxu2 }
 0x2f6   : > { %v2390_v29 = vmax.f32 %v2328_v8, 0.0 }
 0x2f8   : > { %v2406_v31 = vmul.f32 %v2390_v29, %v4840_v50  ;;  %v2108_v29 = vadd.f32 %v2107_v13, %v1998_v43 }
 0x2f9   : > { %v2240_v60 = vpop.f32.mrf.mxu0  ;;  %v2335_v38 = vpop.f32.mrf.mxu1 }
 0x2fa   : > { %v2425_v5 = vsel %vm2423_vm3, %v2406_v31, 0  ;;  %v2241_v62 = vadd.f32 %v2240_v60, %v2102_v21  ;;  %v2003_v31 = vadd.f32 %v2002_v11, %v1898_v3  ;;  %v1727_v60 = vadd.f32 %v5144_v40, %v5071_v57 }
 0x2fb   : > { %v5166_v16 = vand.u32 4294901760, %v2425_v5 }
 0x2fc   : > { %v2332_v22 = vadd.f32 %v2331_v48, %v2241_v62  ;;  %v2114_v62 = vadd.f32 %v2113_v28, %v2003_v31  ;;  %v1902_v43 = vadd.f32 %v5062_v2, %v1727_v60  ;;  %v2131_v28 = vpop.f32.mrf.mxu3 }
 0x2fd   : > { %v2493_v37 = vsub.f32 %v2425_v5, %v5166_v16  ;;  %2658 = vmatmul.f32.vlgmr.msrb.gmra.mxu3 %v5166_v16 }
 0x2fe   : > { %v2391_v10 = vmax.f32 %v2332_v22, 0.0  ;;  %v2008_v3 = vadd.f32 %v2007_v19, %v1902_v43 }
 0x2ff   : > { %2748 = vmatmul.f32.vlgmr.msrb.gmra.mxu0 %v2493_v37  ;;  %v2494_v50 = vand.u32 4294901760, %v2493_v37 }
 0x300   : > { %v2407_v8 = vmul.f32 %v2391_v10, %v4850_v49 }
 0x301   : > { %v2244_v55 = vpop.f32.mrf.mxu0  ;;  %v2339_v34 = vpop.f32.mrf.mxu1  ;;  %2850 = vmatmul.f32.vlgmr.msrb.gmra.mxu1 %v2494_v50  ;;  %v2495_v14 = vsub.f32 %v2493_v37, %v2494_v50 }
 0x302   : > { %v2428_v42 = vsel %vm2423_vm3, %v2407_v8, 0  ;;  %v2245_v48 = vadd.f32 %v2244_v55, %v2108_v29  ;;  %v1735_v8 = vadd.f32 %v5144_v40, %v5077_v23  ;;  %v2022_v23 = vpop.f32.mrf.mxu2 }
 0x303   : > { %v2496_v21 = vand.u32 4294901760, %v2495_v14  ;;  %v5175_v20 = vand.u32 4294901760, %v2428_v42 }
 0x304   : > { %v2336_v13 = vadd.f32 %v2335_v38, %v2245_v48  ;;  %v1906_v48 = vadd.f32 %v5073_v47, %v1735_v8  ;;  %v2137_v47 = vpop.f32.mrf.mxu3 }
 0x305   : > { %2497 = vmatmul.f32.vlgmr.msrb.gmra.mxu2 %v2496_v21  ;;  %2662 = vmatmul.f32.gmra.mxu3 %v5175_v20  ;;  %v2501_v49 = vsub.f32 %v2428_v42, %v5175_v20  ;;  %v2120_v42 = vadd.f32 %v2119_v12, %v2008_v3 }
 0x306   : > { %v2392_v15 = vmax.f32 %v2336_v13, 0.0 }
 0x307   : > { %2753 = vmatmul.f32.gmra.mxu0 %v2501_v49  ;;  %v2502_v5 = vand.u32 4294901760, %v2501_v49 }
 0x308   : > { %v2408_v22 = vmul.f32 %v2392_v15, %v4860_v1 }
 0x309   : > { %v2248_v37 = vpop.f32.mrf.mxu0  ;;  %v2343_v11 = vpop.f32.mrf.mxu1  ;;  %2856 = vmatmul.f32.gmra.mxu1 %v2502_v5  ;;  %v2503_v10 = vsub.f32 %v2501_v49, %v2502_v5  ;;  %v2013_v5 = vadd.f32 %v2012_v33, %v1906_v48 }
 0x30a   : > { %v2431_v57 = vsel %vm2423_vm3, %v2408_v22, 0  ;;  %v2249_v38 = vadd.f32 %v2248_v37, %v2114_v62  ;;  %v1743_v62 = vadd.f32 %v5144_v40, %v5083_v7 }
 0x30b   : > { %v2504_v50 = vand.u32 4294901760, %v2503_v10  ;;  %v5184_v29 = vand.u32 4294901760, %v2431_v57  ;;  %v2126_v37 = vadd.f32 %v2125_v51, %v2013_v5 }
 0x30c   : > { %v2340_v55 = vadd.f32 %v2339_v34, %v2249_v38  ;;  %v1910_v10 = vadd.f32 %v5079_v30, %v1743_v62  ;;  %v1759_v62 = vadd.f32 %v5144_v40, %v5098_v36 }
 0x30d   : > { %2505 = vmatmul.f32.gmra.mxu2 %v2504_v50  ;;  %2666 = vmatmul.f32.gmra.mxu3 %v5184_v29  ;;  %v2509_v1 = vsub.f32 %v2431_v57, %v5184_v29 }
 0x30e   : > { %v2393_v2 = vmax.f32 %v2340_v55, 0.0  ;;  %v2018_v55 = vadd.f32 %v2017_v32, %v1910_v10 }
 0x30f   : > { %2758 = vmatmul.f32.gmra.mxu0 %v2509_v1  ;;  %v2510_v14 = vand.u32 4294901760, %v2509_v1 }
 0x310   : > { %v2409_v21 = vmul.f32 %v2393_v2, %v4870_v27  ;;  %v2027_v2 = vpop.f32.mrf.mxu2 }
 0x311   : > { %v2252_v31 = vpop.f32.mrf.mxu0  ;;  %v2347_v19 = vpop.f32.mrf.mxu1  ;;  %2862 = vmatmul.f32.gmra.mxu1 %v2510_v14  ;;  %v2511_v60 = vsub.f32 %v2509_v1, %v2510_v14  ;;  %v1751_v1 = vadd.f32 %v5144_v40, %v5092_v26 }
 0x312   : > { %v2434_v34 = vsel %vm2423_vm3, %v2409_v21, 0  ;;  %v2253_v13 = vadd.f32 %v2252_v31, %v2120_v42  ;;  %v2132_v42 = vadd.f32 %v2131_v28, %v2018_v55  ;;  %v2143_v21 = vpop.f32.mrf.mxu3 }
 0x313   : > { %v2512_v49 = vand.u32 4294901760, %v2511_v60  ;;  %v5193_v15 = vand.u32 4294901760, %v2434_v34  ;;  %v1914_v48 = vadd.f32 %v5085_v61, %v1751_v1 }
 0x314   : > { %v2344_v12 = vadd.f32 %v2343_v11, %v2253_v13 }
 0x315   : > { %2513 = vmatmul.f32.gmra.mxu2 %v2512_v49  ;;  %2670 = vmatmul.f32.gmra.mxu3 %v5193_v15  ;;  %v2517_v27 = vsub.f32 %v2434_v34, %v5193_v15  ;;  %v2023_v5 = vadd.f32 %v2022_v23, %v1914_v48 }
 0x316   : > { %v2394_v43 = vmax.f32 %v2344_v12, 0.0 }
 0x317   : > { %2763 = vmatmul.f32.gmra.mxu0 %v2517_v27  ;;  %v2518_v22 = vand.u32 4294901760, %v2517_v27 }
 0x318   : > { %v2410_v57 = vmul.f32 %v2394_v43, %v4880_v39  ;;  %v2032_v61 = vpop.f32.mrf.mxu2  ;;  %v2138_v43 = vadd.f32 %v2137_v47, %v2023_v5 }
 0x319   : > { %v2256_v38 = vpop.f32.mrf.mxu0  ;;  %v2351_v33 = vpop.f32.mrf.mxu1  ;;  %2868 = vmatmul.f32.gmra.mxu1 %v2518_v22  ;;  %v2519_v50 = vsub.f32 %v2517_v27, %v2518_v22  ;;  %v1918_v22 = vadd.f32 %v5094_v56, %v1759_v62 }
 0x31a   : > { %v2437_v7 = vsel %vm2423_vm3, %v2410_v57, 0  ;;  %v2257_v11 = vadd.f32 %v2256_v38, %v2126_v37 }
 0x31b   : > { %v2520_v3 = vand.u32 4294901760, %v2519_v50  ;;  %v5202_v8 = vand.u32 4294901760, %v2437_v7 }
 0x31c   : > { %v2348_v51 = vadd.f32 %v2347_v19, %v2257_v11  ;;  %v2028_v11 = vadd.f32 %v2027_v2, %v1918_v22 }
 0x31d   : > { %2521 = vmatmul.f32.gmra.mxu2 %v2520_v3  ;;  %2674 = vmatmul.f32.gmra.mxu3 %v5202_v8  ;;  %v2525_v39 = vsub.f32 %v2437_v7, %v5202_v8  ;;  %v1767_v3 = vadd.f32 %v5144_v40, %v5104_v0 }
 0x31e   : > { %v2395_v30 = vmax.f32 %v2348_v51, 0.0  ;;  %v2144_v1 = vadd.f32 %v2143_v21, %v2028_v11 }
 0x31f   : > { %2768 = vmatmul.f32.gmra.mxu0 %v2525_v39  ;;  %v2526_v14 = vand.u32 4294901760, %v2525_v39  ;;  %v1922_v51 = vadd.f32 %v5100_v44, %v1767_v3 }
 0x320   : > { %v2411_v31 = vmul.f32 %v2395_v30, %v4890_v25 }
 0x321   : > { %v2260_v32 = vpop.f32.mrf.mxu0  ;;  %v2355_v60 = vpop.f32.mrf.mxu1  ;;  %2874 = vmatmul.f32.gmra.mxu1 %v2526_v14  ;;  %v2527_v26 = vsub.f32 %v2525_v39, %v2526_v14 }
 0x322   : > { %v2440_v19 = vsel %vm2423_vm3, %v2411_v31, 0  ;;  %v2261_v34 = vadd.f32 %v2260_v32, %v2132_v42  ;;  %v2037_v39 = vpop.f32.mrf.mxu2 }
 0x323   : > { %v2528_v13 = vand.u32 4294901760, %v2527_v26  ;;  %v5211_v49 = vand.u32 4294901760, %v2440_v19  ;;  %v1775_v26 = vadd.f32 %v5144_v40, %v5110_v63 }
 0x324   : > { %v2352_v28 = vadd.f32 %v2351_v33, %v2261_v34  ;;  %v2149_v33 = vpop.f32.mrf.mxu3 }
 0x325   : > { %2529 = vmatmul.f32.gmra.mxu2 %v2528_v13  ;;  %2678 = vmatmul.f32.gmra.mxu3 %v5211_v49  ;;  %v2533_v25 = vsub.f32 %v2440_v19, %v5211_v49  ;;  %v1926_v5 = vadd.f32 %v5106_v46, %v1775_v26 }
 0x326   : > { %v2396_v12 = vmax.f32 %v2352_v28, 0.0 }
 0x327   : > { %2773 = vmatmul.f32.gmra.mxu0 %v2533_v25  ;;  %v2534_v27 = vand.u32 4294901760, %v2533_v25 }
 0x328   : > { %v2412_v37 = vmul.f32 %v2396_v12, %v4900_v52 }
 0x329   : > { %v2264_v10 = vpop.f32.mrf.mxu0  ;;  %v2359_v23 = vpop.f32.mrf.mxu1  ;;  %2880 = vmatmul.f32.gmra.mxu1 %v2534_v27  ;;  %v2535_v57 = vsub.f32 %v2533_v25, %v2534_v27 }
 0x32a   : > { %v2443_v36 = vsel %vm2423_vm3, %v2412_v37, 0  ;;  %v2265_v38 = vadd.f32 %v2264_v10, %v2138_v43  ;;  %v2042_v27 = vpop.f32.mrf.mxu2  ;;  %v2038_v37 = vadd.f32 %v2037_v39, %v1926_v5  ;;  %v1783_v10 = vadd.f32 %v5144_v40, %v5119_v24 }
 0x32b   : > { %v2536_v50 = vand.u32 4294901760, %v2535_v57  ;;  %v5220_v7 = vand.u32 4294901760, %v2443_v36 }
 0x32c   : > { %v2356_v47 = vadd.f32 %v2355_v60, %v2265_v38  ;;  %v2033_v60 = vadd.f32 %v2032_v61, %v1922_v51  ;;  %v2155_v19 = vpop.f32.mrf.mxu3  ;;  %v1791_v51 = vadd.f32 %v5144_v40, %v5127_v6 }
 0x32d   : > { %2537 = vmatmul.f32.gmra.mxu2 %v2536_v50  ;;  %2682 = vmatmul.f32.gmra.mxu3 %v5220_v7  ;;  %v2541_v52 = vsub.f32 %v2443_v36, %v5220_v7  ;;  %v2156_v38 = vadd.f32 %v2155_v19, %v2038_v37 }
 0x32e   : > { %v2397_v56 = vmax.f32 %v2356_v47, 0.0  ;;  %v2150_v13 = vadd.f32 %v2149_v33, %v2033_v60  ;;  %v1930_v33 = vadd.f32 %v5112_v41, %v1783_v10 }
 0x32f   : > { %2778 = vmatmul.f32.gmra.mxu0 %v2541_v52  ;;  %v2542_v55 = vand.u32 4294901760, %v2541_v52 }
 0x330   : > { %v2413_v30 = vmul.f32 %v2397_v56, %v4913_v54 }
 0x331   : > { %v2268_v14 = vpop.f32.mrf.mxu0  ;;  %v2363_v2 = vpop.f32.mrf.mxu1  ;;  %2886 = vmatmul.f32.gmra.mxu1 %v2542_v55  ;;  %v2543_v42 = vsub.f32 %v2541_v52, %v2542_v55 }
 0x332   : > { %v2446_v0 = vsel %vm2423_vm3, %v2413_v30, 0  ;;  %v2269_v48 = vadd.f32 %v2268_v14, %v2144_v1  ;;  %v2043_v1 = vadd.f32 %v2042_v27, %v1930_v33  ;;  %v2047_v30 = vpop.f32.mrf.mxu2 }
 0x333   : > { %v2544_v31 = vand.u32 4294901760, %v2543_v42  ;;  %v5229_v32 = vand.u32 4294901760, %v2446_v0  ;;  %v1934_v42 = vadd.f32 %v5121_v58, %v1791_v51 }
 0x334   : > { %v2360_v21 = vadd.f32 %v2359_v23, %v2269_v48  ;;  %v2161_v57 = vpop.f32.mrf.mxu3 }
 0x335   : > { %2545 = vmatmul.f32.gmra.mxu2 %v2544_v31  ;;  %2686 = vmatmul.f32.gmra.mxu3 %v5229_v32  ;;  %v2549_v54 = vsub.f32 %v2446_v0, %v5229_v32 }
 0x336   : > { %v2398_v44 = vmax.f32 %v2360_v21, 0.0 }
 0x337   : > { %2783 = vmatmul.f32.gmra.mxu0 %v2549_v54  ;;  %v2550_v34 = vand.u32 4294901760, %v2549_v54 }
 0x338   : > { %v2414_v62 = vmul.f32 %v2398_v44, %v4926_v53  ;;  %v1799_v44 = vadd.f32 %v5144_v40, %v5135_v45 }
 0x339   : > { %v2272_v28 = vpop.f32.mrf.mxu0  ;;  %v2367_v25 = vpop.f32.mrf.mxu1  ;;  %2892 = vmatmul.f32.gmra.mxu1 %v2550_v34  ;;  %v2551_v61 = vsub.f32 %v2549_v54, %v2550_v34  ;;  %v2048_v54 = vadd.f32 %v2047_v30, %v1934_v42 }
 0x33a   : > { %v2449_v63 = vsel %vm2423_vm3, %v2414_v62, 0  ;;  %v2273_v12 = vadd.f32 %v2272_v28, %v2150_v13  ;;  %v2052_v5 = vpop.f32.mrf.mxu2 }
 0x33b   : > { %v2552_v43 = vand.u32 4294901760, %v2551_v61  ;;  %v5238_v22 = vand.u32 4294901760, %v2449_v63 }
 0x33c   : > { %v2364_v23 = vadd.f32 %v2363_v2, %v2273_v12  ;;  %v2162_v2 = vadd.f32 %v2161_v57, %v2043_v1  ;;  %v2167_v48 = vpop.f32.mrf.mxu3 }
 0x33d   : > { %2553 = vmatmul.f32.gmra.mxu2 %v2552_v43  ;;  %2690 = vmatmul.f32.gmra.mxu3 %v5238_v22  ;;  %v2557_v53 = vsub.f32 %v2449_v63, %v5238_v22  ;;  %v2168_v28 = vadd.f32 %v2167_v48, %v2048_v54 }
 0x33e   : > { %v2399_v46 = vmax.f32 %v2364_v23, 0.0 }
 0x33f   : > { %2788 = vmatmul.f32.gmra.mxu0 %v2557_v53  ;;  %v2558_v36 = vand.u32 4294901760, %v2557_v53 }
 0x340   : > { %v2415_v50 = vmul.f32 %v2399_v46, %v4939_v9 }
 0x341   : > { %v2276_v11 = vpop.f32.mrf.mxu0  ;;  %2898 = vmatmul.f32.gmra.mxu1 %v2558_v36  ;;  %v2559_v3 = vsub.f32 %v2557_v53, %v2558_v36  ;;  %v2371_v52 = vpop.f32.mrf.mxu1  ;;  %v1807_v53 = vadd.f32 %v5144_v40, %v5146_v4 }
 0x342   : > { %v2452_v24 = vsel %vm2423_vm3, %v2415_v50, 0  ;;  %v2277_v47 = vadd.f32 %v2276_v11, %v2156_v38  ;;  %v5782_v50 = vld [vmem:[#allocation7_spill] sm:$0xff] }
 0x343   : > { %v2560_v56 = vand.u32 4294901760, %v2559_v3  ;;  %v5247_v55 = vand.u32 4294901760, %v2452_v24  ;;  %v1942_v33 = vadd.f32 %v5137_v18, %v1807_v53  ;;  %v2057_v3 = vpop.f32.mrf.mxu2 }
 0x344   : > { %v2368_v39 = vadd.f32 %v2367_v25, %v2277_v47  ;;  %v1938_v25 = vadd.f32 %v5129_v59, %v1799_v44  ;;  %v2173_v43 = vpop.f32.mrf.mxu3 }
 0x345   : > { %2561 = vmatmul.f32.gmra.mxu2 %v2560_v56  ;;  %2694 = vmatmul.f32.gmra.mxu3 %v5247_v55  ;;  %v2565_v9 = vsub.f32 %v2452_v24, %v5247_v55  ;;  %v2058_v51 = vadd.f32 %v2057_v3, %v1942_v33 }
 0x346   : > { %v2400_v41 = vmax.f32 %v2368_v39, 0.0  ;;  %v2053_v23 = vadd.f32 %v2052_v5, %v1938_v25  ;;  %v5783_v39 = vld [vmem:[#allocation9_spill] sm:$0xff] }
 0x347   : > { %2793 = vmatmul.f32.gmra.mxu0 %v2565_v9  ;;  %v2566_v14 = vand.u32 4294901760, %v2565_v9  ;;  %v1815_v30 = vadd.f32 %v5144_v40, %v5783_v39 }
 0x348   : > { %v2416_v0 = vmul.f32 %v2400_v41, %v4952_v17  ;;  %v2174_v38 = vadd.f32 %v2173_v43, %v2053_v23 }
 0x349   : > { %v2280_v31 = vpop.f32.mrf.mxu0  ;;  %2904 = vmatmul.f32.gmra.mxu1 %v2566_v14  ;;  %v2567_v60 = vsub.f32 %v2565_v9, %v2566_v14  ;;  %v2375_v13 = vpop.f32.mrf.mxu1 }
 0x34a   : > { %v2455_v6 = vsel %vm2423_vm3, %v2416_v0, 0  ;;  %v2281_v26 = vadd.f32 %v2280_v31, %v2162_v2  ;;  %v5784_v0 = vld [vmem:[#allocation2_spill] sm:$0xff]  ;;  %v5785_v31 = vld [vmem:[#allocation8_spill] sm:$0xff] }
 0x34b   : > { %v2568_v21 = vand.u32 4294901760, %v2567_v60  ;;  %v5256_v19 = vand.u32 4294901760, %v2455_v6  ;;  %v1946_v48 = vadd.f32 %v5784_v0, %v1815_v30  ;;  %v2062_v44 = vpop.f32.mrf.mxu2 }
 0x34c   : > { %v2372_v34 = vadd.f32 %v2371_v52, %v2281_v26  ;;  %v2179_v41 = vpop.f32.mrf.mxu3 }
 0x34d   : > { %2569 = vmatmul.f32.gmra.mxu2 %v2568_v21  ;;  %2698 = vmatmul.f32.gmra.mxu3 %v5256_v19  ;;  %v2573_v17 = vsub.f32 %v2455_v6, %v5256_v19  ;;  %v2180_v42 = vadd.f32 %v2179_v41, %v2058_v51  ;;  %v170_v51 = vld [vmem:[%s5714_s1 + $0xb8] sm:$0xff] }
 0x34e   : > { %v2401_v58 = vmax.f32 %v2372_v34, 0.0  ;;  %v5302_v39 = vand.u32 4294901760, %v170_v51 }
 0x34f   : > { %2798 = vmatmul.f32.gmra.mxu0 %v2573_v17  ;;  %v2574_v62 = vand.u32 4294901760, %v2573_v17 }
 0x350   : > { %v2417_v61 = vmul.f32 %v2401_v58, %v4965_v35  ;;  %3200 = vmatpush.msra.mxu0 %v5302_v39  ;;  %v5307_v30 = vsub.f32 %v170_v51, %v5302_v39  ;;  %3555 = vmatpush.msrb.mxu3 %v5302_v39 }
 0x351   : > { %v2284_v63 = vpop.f32.mrf.mxu0  ;;  %2910 = vmatmul.f32.gmra.mxu1 %v2574_v62  ;;  %v2575_v12 = vsub.f32 %v2573_v17, %v2574_v62  ;;  %v2379_v57 = vpop.f32.mrf.mxu1  ;;  %v2063_v17 = vadd.f32 %v2062_v44, %v1946_v48 }
 0x352   : > { %v2458_v45 = vsel %vm2423_vm3, %v2417_v61, 0  ;;  %v2285_v27 = vadd.f32 %v2284_v63, %v2168_v28  ;;  %v5786_v63 = vld [vmem:[#allocation19_spill] sm:$0xff]  ;;  %v3350_v41 = vand.u32 4294901760, %v5307_v30  ;;  %3451 = vmatpush.msrb.mxu2 %v5307_v30 }
 0x353   : > { %v2576_v37 = vand.u32 4294901760, %v2575_v12  ;;  %v5265_v10 = vand.u32 4294901760, %v2458_v45 }
 0x354   : > { %v2376_v46 = vadd.f32 %v2375_v13, %v2285_v27  ;;  %v2185_v28 = vpop.f32.mrf.mxu3 }
 0x355   : > { %2577 = vmatmul.f32.gmra.mxu2 %v2576_v37  ;;  %2702 = vmatmul.f32.gmra.mxu3 %v5265_v10  ;;  %v2581_v35 = vsub.f32 %v2458_v45, %v5265_v10  ;;  %v2186_v61 = vadd.f32 %v2185_v28, %v2063_v17 }
 0x356   : > { %v2402_v59 = vmax.f32 %v2376_v46, 0.0 }
 0x357   : > { %2803 = vmatmul.f32.gmra.mxu0 %v2581_v35  ;;  %v2582_v36 = vand.u32 4294901760, %v2581_v35 }
 0x358   : > { %v2418_v11 = vmul.f32 %v2402_v59, %v5782_v50 }
 0x359   : > { %v2288_v24 = vpop.f32.mrf.mxu0  ;;  %2916 = vmatmul.f32.gmra.mxu1 %v2582_v36  ;;  %v2583_v47 = vsub.f32 %v2581_v35, %v2582_v36  ;;  %v2383_v6 = vpop.f32.mrf.mxu1 }
 0x35a   : > { %v2461_v4 = vsel %vm2423_vm3, %v2418_v11, 0  ;;  %v2289_v52 = vadd.f32 %v2288_v24, %v2174_v38  ;;  %v5787_v38 = vld [vmem:[#allocation20_spill] sm:$0xff] }
 0x35b   : > { %v2584_v56 = vand.u32 4294901760, %v2583_v47  ;;  %v5274_v1 = vand.u32 4294901760, %v2461_v4 }
 0x35c   : > { %v2380_v9 = vadd.f32 %v2379_v57, %v2289_v52 }
 0x35d   : > { %2585 = vmatmul.f32.gmra.mxu2 %v2584_v56  ;;  %2706 = vmatmul.f32.gmra.mxu3 %v5274_v1  ;;  %v2589_v18 = vsub.f32 %v2461_v4, %v5274_v1 }
 0x35e   : > { %v2403_v14 = vmax.f32 %v2380_v9, 0.0 }
 0x35f   : > { %2808 = vmatmul.f32.gmra.mxu0 %v2589_v18  ;;  %v2590_v2 = vand.u32 4294901760, %v2589_v18 }
 0x360   : > { %v2419_v60 = vmul.f32 %v2403_v14, %v5785_v31 }
 0x361   : > { %v2292_v26 = vpop.f32.mrf.mxu0  ;;  %2922 = vmatmul.f32.gmra.mxu1 %v2590_v2  ;;  %v2591_v21 = vsub.f32 %v2589_v18, %v2590_v2  ;;  %v2387_v23 = vpop.f32.mrf.mxu1  ;;  %v3351_v18 = vsub.f32 %v5307_v30, %v3350_v41  ;;  %v5320_v2 = vld [vmem:[%s5714_s1 + $0xc2] ss:$0 sm:$0xff] }
 0x362   : > { %v2464_v40 = vsel %vm2423_vm3, %v2419_v60, 0  ;;  %v2293_v54 = vadd.f32 %v2292_v26, %v2180_v42 }
 0x363   : > { %v2592_v34 = vand.u32 4294901760, %v2591_v21  ;;  %v5283_v13 = vand.u32 4294901760, %v2464_v40  ;;  %v3352_v14 = vand.u32 4294901760, %v3351_v18 }
 0x364   : > { %v2384_v58 = vadd.f32 %v2383_v6, %v2293_v54 }
 0x365   : > { %2593 = vmatmul.f32.gmra.mxu2 %v2592_v34  ;;  %2710 = vmatmul.f32.gmra.mxu3 %v5283_v13  ;;  %v2597_v5 = vsub.f32 %v2464_v40, %v5283_v13 }
 0x366   : > { %v2404_v62 = vmax.f32 %v2384_v58, 0.0  ;;  %3353 = vmatpush.msra.mxu1 %v3352_v14 }
 0x367   : > { %2813 = vmatmul.f32.gmra.mxu0 %v2597_v5  ;;  %v2598_v25 = vand.u32 4294901760, %v2597_v5 }
 0x368   : > { %v2420_v12 = vmul.f32 %v2404_v62, %v5786_v63 }
 0x369   : > { %v2296_v45 = vpop.f32.mrf.mxu0  ;;  %2928 = vmatmul.f32.gmra.mxu1 %v2598_v25  ;;  %v2599_v27 = vsub.f32 %v2597_v5, %v2598_v25 }
 0x36a   : > { %v2467_v43 = vsel %vm2423_vm3, %v2420_v12, 0  ;;  %v2297_v37 = vadd.f32 %v2296_v45, %v2186_v61 }
 0x36b   : > { %v2600_v53 = vand.u32 4294901760, %v2599_v27  ;;  %v5289_v46 = vand.u32 4294901760, %v2467_v43 }
 0x36c   : > { %v2388_v35 = vadd.f32 %v2387_v23, %v2297_v37 }
 0x36d   : > { %2601 = vmatmul.f32.gmra.mxu2 %v2600_v53  ;;  %2714 = vmatmul.f32.gmra.mxu3 %v5289_v46  ;;  %v2605_v59 = vsub.f32 %v2467_v43, %v5289_v46 }
 0x36e   : > { %v2405_v57 = vmax.f32 %v2388_v35, 0.0 }
 0x36f   : > { %2818 = vmatmul.f32.gmra.mxu0 %v2605_v59  ;;  %v2606_v36 = vand.u32 4294901760, %v2605_v59 }
 0x370   : > { %v2421_v33 = vmul.f32 %v2405_v57, %v5787_v38 }
 0x371   : > { %2934 = vmatmul.f32.gmra.mxu1 %v2606_v36  ;;  %v2607_v50 = vsub.f32 %v2605_v59, %v2606_v36 }
 0x372   : > { %v2470_v11 = vsel %vm2423_vm3, %v2421_v33, 0 }
 0x373   : > { %v2608_v3 = vand.u32 4294901760, %v2607_v50  ;;  %v5295_v24 = vand.u32 4294901760, %v2470_v11 }
 0x375   : > { %2609 = vmatmul.f32.gmra.mxu2 %v2608_v3  ;;  %2718 = vmatmul.f32.gmra.mxu3 %v5295_v24  ;;  %v2613_v47 = vsub.f32 %v2470_v11, %v5295_v24 }
 0x377   : > { %2823 = vmatmul.f32.gmra.mxu0 %v2613_v47  ;;  %v2614_v4 = vand.u32 4294901760, %v2613_v47 }
 0x379   : > { %2940 = vmatmul.f32.gmra.mxu1 %v2614_v4  ;;  %v2615_v52 = vsub.f32 %v2613_v47, %v2614_v4 }
 0x37b   : > { %v2616_v56 = vand.u32 4294901760, %v2615_v52 }
 0x37d   : > { %2617 = vmatmul.f32.gmra.mxu2 %v2616_v56  ;;  %3058 = vmatmul.f32.vlgmr.msra.gmra.mxu3 %v5166_v16 }
 0x37e   : > { %v2851_v30 = vpop.f32.mrf.mxu1 }
 0x380   : > { %v2659_v9 = vpop.f32.mrf.mxu3 }
 0x385   : > { %2973 = vmatmul.f32.vlgmr.msra.gmra.mxu2 %v5166_v16  ;;  %3062 = vmatmul.f32.gmra.mxu3 %v5175_v20 }
 0x388   : > { %v2498_v42 = vpop.f32.mrf.mxu2  ;;  %v2663_v0 = vpop.f32.mrf.mxu3 }
 0x389   : > { %v2499_v48 = vadd.f32 %v5320_v2, %v2498_v42 }
 0x38b   : > { %v5323_v31 = vadd.f32 %v2659_v9, %v2499_v48  ;;  %v167_v9 = vld [vmem:[%s5714_s1 + $0xa0] sm:$0xff]  ;;  %v2749_v48 = vpop.f32.mrf.mxu0 }
 0x38c   : > { %v3205_v18 = vand.u32 4294901760, %v167_v9 }
 0x38d   : > { %2977 = vmatmul.f32.gmra.mxu2 %v5175_v20  ;;  %3066 = vmatmul.f32.gmra.mxu3 %v5184_v29  ;;  %v169_v20 = vld [vmem:[%s5714_s1 + $0xb0] sm:$0xff] }
 0x38e   : > { %v5338_v34 = vand.u32 4294901760, %v169_v20 }
 0x390   : > { %v2506_v60 = vpop.f32.mrf.mxu2  ;;  %v2667_v16 = vpop.f32.mrf.mxu3  ;;  %3202 = vmatpush.msra.mxu0 %v5338_v34  ;;  %3557 = vmatpush.msrb.mxu3 %v5338_v34 }
 0x391   : > { %v2507_v6 = vadd.f32 %v5320_v2, %v2506_v60 }
 0x393   : > { %v5328_v26 = vadd.f32 %v2663_v0, %v2507_v6 }
 0x395   : > { %2981 = vmatmul.f32.gmra.mxu2 %v5184_v29  ;;  %3070 = vmatmul.f32.gmra.mxu3 %v5193_v15  ;;  %v5344_v29 = vsub.f32 %v169_v20, %v5338_v34 }
 0x397   : > { %v3356_v5 = vand.u32 4294901760, %v5344_v29  ;;  %3454 = vmatpush.msrb.mxu2 %v5344_v29 }
 0x398   : > { %v2514_v21 = vpop.f32.mrf.mxu2  ;;  %v2671_v40 = vpop.f32.mrf.mxu3 }
 0x399   : > { %v2515_v54 = vadd.f32 %v5320_v2, %v2514_v21  ;;  %v2857_v21 = vpop.f32.mrf.mxu1 }
 0x39b   : > { %v5333_v44 = vadd.f32 %v2667_v16, %v2515_v54  ;;  %v2754_v16 = vpop.f32.mrf.mxu0 }
 0x39d   : > { %2985 = vmatmul.f32.gmra.mxu2 %v5193_v15  ;;  %3074 = vmatmul.f32.gmra.mxu3 %v5202_v8  ;;  %v3357_v15 = vsub.f32 %v5344_v29, %v3356_v5 }
 0x39f   : > { %v3358_v25 = vand.u32 4294901760, %v3357_v15 }
 0x3a0   : > { %v2522_v17 = vpop.f32.mrf.mxu2  ;;  %v2675_v58 = vpop.f32.mrf.mxu3 }
 0x3a1   : > { %v2523_v62 = vadd.f32 %v5320_v2, %v2522_v17  ;;  %3359 = vmatpush.msra.mxu1 %v3358_v25  ;;  %v2863_v20 = vpop.f32.mrf.mxu1  ;;  %v2750_v17 = vadd.f32 %v2749_v48, %v5323_v31 }
 0x3a3   : > { %v5353_v28 = vadd.f32 %v2671_v40, %v2523_v62 }
 0x3a5   : > { %2989 = vmatmul.f32.gmra.mxu2 %v5202_v8  ;;  %3078 = vmatmul.f32.gmra.mxu3 %v5211_v49 }
 0x3a8   : > { %v2530_v61 = vpop.f32.mrf.mxu2  ;;  %v2679_v63 = vpop.f32.mrf.mxu3 }
 0x3a9   : > { %v2531_v12 = vadd.f32 %v5320_v2, %v2530_v61 }
 0x3ab   : > { %v5358_v45 = vadd.f32 %v2675_v58, %v2531_v12  ;;  %v2869_v58 = vpop.f32.mrf.mxu1 }
 0x3ad   : > { %2993 = vmatmul.f32.gmra.mxu2 %v5211_v49  ;;  %3082 = vmatmul.f32.gmra.mxu3 %v5220_v7  ;;  %v168_v49 = vld [vmem:[%s5714_s1 + $0xa8] sm:$0xff] }
 0x3ae   : > { %v3203_v57 = vand.u32 4294901760, %v168_v49 }
 0x3b0   : > { %v2538_v27 = vpop.f32.mrf.mxu2  ;;  %v2683_v43 = vpop.f32.mrf.mxu3  ;;  %3204 = vmatpush.msra.mxu0 %v3203_v57  ;;  %v3361_v36 = vsub.f32 %v168_v49, %v3203_v57  ;;  %3559 = vmatpush.msrb.mxu3 %v3203_v57 }
 0x3b1   : > { %v2539_v37 = vadd.f32 %v5320_v2, %v2538_v27 }
 0x3b2   : > { %v3362_v33 = vand.u32 4294901760, %v3361_v36  ;;  %3457 = vmatpush.msrb.mxu2 %v3361_v36  ;;  %3206 = vmatpush.msra.mxu0 %v3205_v18 }
 0x3b3   : > { %v5363_v23 = vadd.f32 %v2679_v63, %v2539_v37  ;;  %3561 = vmatpush.msrb.mxu3 %v3205_v18  ;;  %v2755_v63 = vadd.f32 %v2754_v16, %v5328_v26  ;;  %v2875_v27 = vpop.f32.mrf.mxu1 }
 0x3b4   : > { %v3363_v11 = vsub.f32 %v3361_v36, %v3362_v33  ;;  %3674 = vmatpush.msrb.mxu0 %v3350_v41 }
 0x3b5   : > { %2997 = vmatmul.f32.gmra.mxu2 %v5220_v7  ;;  %3086 = vmatmul.f32.gmra.mxu3 %v5229_v32 }
 0x3b6   : > { %v3364_v47 = vand.u32 4294901760, %v3363_v11  ;;  %3678 = vmatpush.msrb.mxu0 %v3356_v5  ;;  %v2852_v5 = vadd.f32 %v2851_v30, %v2750_v17 }
 0x3b8   : > { %v2546_v8 = vpop.f32.mrf.mxu2  ;;  %v2687_v53 = vpop.f32.mrf.mxu3  ;;  %3365 = vmatpush.msra.mxu1 %v3364_v47  ;;  %3682 = vmatpush.msrb.mxu0 %v3362_v33 }
 0x3b9   : > { %v2547_v35 = vadd.f32 %v5320_v2, %v2546_v8 }
 0x3bb   : > { %v5368_v59 = vadd.f32 %v2683_v43, %v2547_v35 }
 0x3bd   : > { %3001 = vmatmul.f32.gmra.mxu2 %v5229_v32  ;;  %3090 = vmatmul.f32.gmra.mxu3 %v5238_v22 }
 0x3c0   : > { %v2554_v7 = vpop.f32.mrf.mxu2  ;;  %v5375_v38 = vpop.f32.mrf.mxu3 }
 0x3c1   : > { %v2555_v50 = vadd.f32 %v5320_v2, %v2554_v7 }
 0x3c3   : > { %v5378_v3 = vadd.f32 %v2687_v53, %v2555_v50 }
 0x3c5   : > { %3005 = vmatmul.f32.gmra.mxu2 %v5238_v22  ;;  %3094 = vmatmul.f32.gmra.mxu3 %v5247_v55 }
 0x3c8   : > { %v5382_v32 = vpop.f32.mrf.mxu2  ;;  %v5384_v4 = vpop.f32.mrf.mxu3 }
 0x3cd   : > { %3009 = vmatmul.f32.gmra.mxu2 %v5247_v55  ;;  %3098 = vmatmul.f32.gmra.mxu3 %v5256_v19  ;;  %v3367_v55 = vsub.f32 %v167_v9, %v3205_v18 }
 0x3cf   : > { %v3368_v42 = vand.u32 4294901760, %v3367_v55  ;;  %3460 = vmatpush.msrb.mxu2 %v3367_v55 }
 0x3d0   : > { %v5388_v52 = vpop.f32.mrf.mxu2  ;;  %v5390_v56 = vpop.f32.mrf.mxu3 }
 0x3d1   : > { %v3369_v0 = vsub.f32 %v3367_v55, %v3368_v42  ;;  %3686 = vmatpush.msrb.mxu0 %v3368_v42  ;;  %v2881_v42 = vpop.f32.mrf.mxu1 }
 0x3d5   : > { %3013 = vmatmul.f32.gmra.mxu2 %v5256_v19  ;;  %3102 = vmatmul.f32.gmra.mxu3 %v5265_v10 }
 0x3d8   : > { %v5394_v22 = vpop.f32.mrf.mxu2  ;;  %v5396_v51 = vpop.f32.mrf.mxu3 }
 0x3dd   : > { %3017 = vmatmul.f32.gmra.mxu2 %v5265_v10  ;;  %3106 = vmatmul.f32.gmra.mxu3 %v5274_v1  ;;  %v3370_v10 = vand.u32 4294901760, %v3369_v0 }
 0x3df   : > { %3371 = vmatpush.msra.mxu1 %v3370_v10 }
 0x3e0   : > { %v5405_v19 = vpop.f32.mrf.mxu2  ;;  %v5407_v14 = vpop.f32.mrf.mxu3 }
 0x3e1   : > { %3765 = vmatpush.msrb.mxu1 %v5302_v39  ;;  %v2759_v39 = vpop.f32.mrf.mxu0 }
 0x3e3   : > { %3767 = vmatpush.msrb.mxu1 %v5338_v34 }
 0x3e5   : > { %3021 = vmatmul.f32.gmra.mxu2 %v5274_v1  ;;  %3110 = vmatmul.f32.gmra.mxu3 %v5283_v13 }
 0x3e6   : > { %3769 = vmatpush.msrb.mxu1 %v3203_v57  ;;  %v2760_v57 = vadd.f32 %v2759_v39, %v5333_v44 }
 0x3e8   : > { %v5414_v41 = vpop.f32.mrf.mxu2  ;;  %v5416_v60 = vpop.f32.mrf.mxu3  ;;  %3771 = vmatpush.msrb.mxu1 %v3205_v18  ;;  %v2864_v11 = vadd.f32 %v2863_v20, %v2760_v57 }
 0x3e9   : > { %v2764_v29 = vpop.f32.mrf.mxu0 }
 0x3ea   : > { %v2765_v10 = vadd.f32 %v2764_v29, %v5353_v28  ;;  %v2887_v29 = vpop.f32.mrf.mxu1 }
 0x3ed   : > { %3025 = vmatmul.f32.gmra.mxu2 %v5283_v13  ;;  %3114 = vmatmul.f32.gmra.mxu3 %v5289_v46 }
 0x3f0   : > { %v5421_v1 = vpop.f32.mrf.mxu2  ;;  %v5423_v6 = vpop.f32.mrf.mxu3 }
 0x3f1   : > { %v2769_v25 = vpop.f32.mrf.mxu0 }
 0x3f5   : > { %3029 = vmatmul.f32.gmra.mxu2 %v5289_v46  ;;  %3118 = vmatmul.f32.gmra.mxu3 %v5295_v24 }
 0x3f8   : > { %v5427_v40 = vpop.f32.mrf.mxu2  ;;  %v5429_v54 = vpop.f32.mrf.mxu3 }
 0x3f9   : > { %v2774_v26 = vpop.f32.mrf.mxu0 }
 0x3fd   : > { %3033 = vmatmul.f32.gmra.mxu2 %v5295_v24  ;;  %v2858_v24 = vadd.f32 %v2857_v21, %v2755_v63  ;;  %v2770_v63 = vadd.f32 %v2769_v25, %v5358_v45 }
 0x400   : > { %v5432_v13 = vpop.f32.mrf.mxu2  ;;  %v3059_v34 = vpop.f32.mrf.mxu3 }
 0x401   : > { %v2779_v39 = vpop.f32.mrf.mxu0 }
 0x408   : > { %v2974_v62 = vpop.f32.mrf.mxu2  ;;  %v3063_v46 = vpop.f32.mrf.mxu3 }
 0x409   : > { %v2975_v15 = vadd.f32 %v2974_v62, %v2852_v5  ;;  %v2784_v57 = vpop.f32.mrf.mxu0 }
 0x40b   : > { %v3060_v61 = vadd.f32 %v3059_v34, %v2975_v15  ;;  %v2870_v34 = vadd.f32 %v2869_v58, %v2765_v10 }
 0x40d   : > { %v3122_v12 = vmax.f32 %v3060_v61, 0.0 }
 0x40f   : > { %v3140_v43 = vsel %vm2423_vm3, %v3122_v12, 0 }
 0x410   : > { %v5437_v37 = vand.u32 4294901760, %v3140_v43  ;;  %v2978_v8 = vpop.f32.mrf.mxu2  ;;  %v3067_v53 = vpop.f32.mrf.mxu3 }
 0x411   : > { %v2979_v35 = vadd.f32 %v2978_v8, %v2858_v24  ;;  %v2876_v8 = vadd.f32 %v2875_v27, %v2770_v63 }
 0x412   : > { %v3208_v31 = vsub.f32 %v3140_v43, %v5437_v37  ;;  %3373 = vmatmul.f32.vlgmr.msra.gmra.mxu1 %v5437_v37 }
 0x413   : > { %v3064_v49 = vadd.f32 %v3063_v46, %v2979_v35 }
 0x414   : > { %v3209_v36 = vand.u32 4294901760, %v3208_v31  ;;  %3463 = vmatmul.f32.vlgmr.msrb.gmra.mxu2 %v3208_v31 }
 0x415   : > { %v3123_v7 = vmax.f32 %v3064_v49, 0.0 }
 0x416   : > { %v3210_v33 = vsub.f32 %v3208_v31, %v3209_v36  ;;  %3565 = vmatmul.f32.vlgmr.msrb.gmra.mxu3 %v3209_v36 }
 0x417   : > { %v3143_v50 = vsel %vm2423_vm3, %v3123_v7, 0  ;;  %v2775_v7 = vadd.f32 %v2774_v26, %v5363_v23  ;;  %v2789_v26 = vpop.f32.mrf.mxu0 }
 0x418   : > { %v5443_v47 = vand.u32 4294901760, %v3143_v50  ;;  %v2982_v9 = vpop.f32.mrf.mxu2  ;;  %v3071_v18 = vpop.f32.mrf.mxu3  ;;  %v3211_v55 = vand.u32 4294901760, %v3210_v33 }
 0x419   : > { %v2983_v0 = vadd.f32 %v2982_v9, %v2864_v11 }
 0x41a   : > { %3212 = vmatmul.f32.vlgmr.msra.gmra.mxu0 %v3211_v55  ;;  %3377 = vmatmul.f32.gmra.mxu1 %v5443_v47  ;;  %v3216_v44 = vsub.f32 %v3143_v50, %v5443_v47  ;;  %v2893_v50 = vpop.f32.mrf.mxu1 }
 0x41b   : > { %v3068_v48 = vadd.f32 %v3067_v53, %v2983_v0 }
 0x41c   : > { %3468 = vmatmul.f32.gmra.mxu2 %v3216_v44  ;;  %v3217_v30 = vand.u32 4294901760, %v3216_v44 }
 0x41d   : > { %v3124_v16 = vmax.f32 %v3068_v48, 0.0 }
 0x41e   : > { %3571 = vmatmul.f32.gmra.mxu3 %v3217_v30  ;;  %v3218_v21 = vsub.f32 %v3216_v44, %v3217_v30 }
 0x41f   : > { %v3146_v20 = vsel %vm2423_vm3, %v3124_v16, 0  ;;  %v2780_v16 = vadd.f32 %v2779_v39, %v5368_v59  ;;  %v2563_v39 = vadd.f32 %v5320_v2, %v5382_v32 }
 0x420   : > { %v5449_v17 = vand.u32 4294901760, %v3146_v20  ;;  %v2986_v5 = vpop.f32.mrf.mxu2  ;;  %v3075_v62 = vpop.f32.mrf.mxu3  ;;  %v3219_v46 = vand.u32 4294901760, %v3218_v21 }
 0x421   : > { %v2987_v15 = vadd.f32 %v2986_v5, %v2870_v34 }
 0x422   : > { %3220 = vmatmul.f32.gmra.mxu0 %v3219_v46  ;;  %3381 = vmatmul.f32.gmra.mxu1 %v5449_v17  ;;  %v3224_v28 = vsub.f32 %v3146_v20, %v5449_v17  ;;  %v2899_v34 = vpop.f32.mrf.mxu1 }
 0x423   : > { %v3072_v61 = vadd.f32 %v3071_v18, %v2987_v15  ;;  %v2882_v18 = vadd.f32 %v2881_v42, %v2775_v7 }
 0x424   : > { %3473 = vmatmul.f32.gmra.mxu2 %v3224_v28  ;;  %v3225_v12 = vand.u32 4294901760, %v3224_v28 }
 0x425   : > { %v3125_v43 = vmax.f32 %v3072_v61, 0.0 }
 0x426   : > { %3577 = vmatmul.f32.gmra.mxu3 %v3225_v12  ;;  %v3226_v58 = vsub.f32 %v3224_v28, %v3225_v12 }
 0x427   : > { %v3149_v24 = vsel %vm2423_vm3, %v3125_v43, 0  ;;  %v2785_v43 = vadd.f32 %v2784_v57, %v5378_v3  ;;  %v2571_v57 = vadd.f32 %v5320_v2, %v5388_v52 }
 0x428   : > { %v5455_v53 = vand.u32 4294901760, %v3149_v24  ;;  %v2990_v35 = vpop.f32.mrf.mxu2  ;;  %v3079_v31 = vpop.f32.mrf.mxu3  ;;  %v3227_v49 = vand.u32 4294901760, %v3226_v58 }
 0x429   : > { %v2991_v36 = vadd.f32 %v2990_v35, %v2876_v8  ;;  %v2692_v35 = vadd.f32 %v5375_v38, %v2563_v39 }
 0x42a   : > { %3228 = vmatmul.f32.gmra.mxu0 %v3227_v49  ;;  %3385 = vmatmul.f32.gmra.mxu1 %v5455_v53  ;;  %v3232_v45 = vsub.f32 %v3149_v24, %v5455_v53  ;;  %v2894_v49 = vadd.f32 %v2893_v50, %v2785_v43 }
 0x42b   : > { %v3076_v25 = vadd.f32 %v3075_v62, %v2991_v36  ;;  %v2888_v62 = vadd.f32 %v2887_v29, %v2780_v16  ;;  %v2794_v29 = vpop.f32.mrf.mxu0  ;;  %v2790_v38 = vadd.f32 %v2789_v26, %v2692_v35  ;;  %v2579_v26 = vadd.f32 %v5320_v2, %v5394_v22 }
 0x42c   : > { %3478 = vmatmul.f32.gmra.mxu2 %v3232_v45  ;;  %v3233_v33 = vand.u32 4294901760, %v3232_v45 }
 0x42d   : > { %v3126_v11 = vmax.f32 %v3076_v25, 0.0 }
 0x42e   : > { %3583 = vmatmul.f32.gmra.mxu3 %v3233_v33  ;;  %v3234_v27 = vsub.f32 %v3232_v45, %v3233_v33  ;;  %v2905_v33 = vpop.f32.mrf.mxu1 }
 0x42f   : > { %v3152_v9 = vsel %vm2423_vm3, %v3126_v11, 0 }
 0x430   : > { %v5461_v55 = vand.u32 4294901760, %v3152_v9  ;;  %v2994_v0 = vpop.f32.mrf.mxu2  ;;  %v3083_v44 = vpop.f32.mrf.mxu3  ;;  %v3235_v48 = vand.u32 4294901760, %v3234_v27 }
 0x431   : > { %v2995_v10 = vadd.f32 %v2994_v0, %v2882_v18  ;;  %v2696_v0 = vadd.f32 %v5384_v4, %v2571_v57 }
 0x432   : > { %3236 = vmatmul.f32.gmra.mxu0 %v3235_v48  ;;  %3389 = vmatmul.f32.gmra.mxu1 %v5461_v55  ;;  %v3240_v23 = vsub.f32 %v3152_v9, %v5461_v55  ;;  %v2900_v48 = vadd.f32 %v2899_v34, %v2790_v38  ;;  %v2595_v38 = vadd.f32 %v5320_v2, %v5414_v41 }
 0x433   : > { %v3080_v30 = vadd.f32 %v3079_v31, %v2995_v10  ;;  %v2799_v18 = vpop.f32.mrf.mxu0 }
 0x434   : > { %3483 = vmatmul.f32.gmra.mxu2 %v3240_v23  ;;  %v3241_v21 = vand.u32 4294901760, %v3240_v23 }
 0x435   : > { %v3127_v20 = vmax.f32 %v3080_v30, 0.0 }
 0x436   : > { %3589 = vmatmul.f32.gmra.mxu3 %v3241_v21  ;;  %v3242_v42 = vsub.f32 %v3240_v23, %v3241_v21  ;;  %v2911_v4 = vpop.f32.mrf.mxu1 }
 0x437   : > { %v3155_v5 = vsel %vm2423_vm3, %v3127_v20, 0 }
 0x438   : > { %v5467_v46 = vand.u32 4294901760, %v3155_v5  ;;  %v2998_v15 = vpop.f32.mrf.mxu2  ;;  %v3087_v28 = vpop.f32.mrf.mxu3  ;;  %v3243_v61 = vand.u32 4294901760, %v3242_v42  ;;  %v2795_v42 = vadd.f32 %v2794_v29, %v2696_v0  ;;  %v2587_v29 = vadd.f32 %v5320_v2, %v5405_v19 }
 0x439   : > { %v2999_v63 = vadd.f32 %v2998_v15, %v2888_v62  ;;  %v2700_v15 = vadd.f32 %v5390_v56, %v2579_v26 }
 0x43a   : > { %3244 = vmatmul.f32.gmra.mxu0 %v3243_v61  ;;  %3393 = vmatmul.f32.gmra.mxu1 %v5467_v46  ;;  %v3248_v59 = vsub.f32 %v3155_v5, %v5467_v46  ;;  %v2906_v61 = vadd.f32 %v2905_v33, %v2795_v42 }
 0x43b   : > { %v3084_v12 = vadd.f32 %v3083_v44, %v2999_v63  ;;  %v2804_v22 = vpop.f32.mrf.mxu0  ;;  %v2800_v56 = vadd.f32 %v2799_v18, %v2700_v15 }
 0x43c   : > { %3488 = vmatmul.f32.gmra.mxu2 %v3248_v59  ;;  %v3249_v58 = vand.u32 4294901760, %v3248_v59 }
 0x43d   : > { %v3128_v24 = vmax.f32 %v3084_v12, 0.0 }
 0x43e   : > { %3595 = vmatmul.f32.gmra.mxu3 %v3249_v58  ;;  %v3250_v8 = vsub.f32 %v3248_v59, %v3249_v58 }
 0x43f   : > { %v3158_v31 = vsel %vm2423_vm3, %v3128_v24, 0 }
 0x440   : > { %v5476_v36 = vand.u32 4294901760, %v3158_v31  ;;  %v3002_v45 = vpop.f32.mrf.mxu2  ;;  %v3091_v25 = vpop.f32.mrf.mxu3  ;;  %v3251_v7 = vand.u32 4294901760, %v3250_v8 }
 0x441   : > { %v3003_v32 = vadd.f32 %v3002_v45, %v2894_v49  ;;  %v2704_v45 = vadd.f32 %v5396_v51, %v2587_v29  ;;  %v2611_v29 = vadd.f32 %v5320_v2, %v5427_v40 }
 0x442   : > { %3252 = vmatmul.f32.gmra.mxu0 %v3251_v7  ;;  %3397 = vmatmul.f32.gmra.mxu1 %v5476_v36  ;;  %v3256_v3 = vsub.f32 %v3158_v31, %v5476_v36  ;;  %v2917_v31 = vpop.f32.mrf.mxu1  ;;  %v2912_v7 = vadd.f32 %v2911_v4, %v2800_v56 }
 0x443   : > { %v3088_v11 = vadd.f32 %v3087_v28, %v3003_v32  ;;  %v2809_v51 = vpop.f32.mrf.mxu0 }
 0x444   : > { %3493 = vmatmul.f32.gmra.mxu2 %v3256_v3  ;;  %v3257_v27 = vand.u32 4294901760, %v3256_v3 }
 0x445   : > { %v3129_v50 = vmax.f32 %v3088_v11, 0.0 }
 0x446   : > { %3601 = vmatmul.f32.gmra.mxu3 %v3257_v27  ;;  %v3258_v9 = vsub.f32 %v3256_v3, %v3257_v27 }
 0x447   : > { %v3161_v44 = vsel %vm2423_vm3, %v3129_v50, 0  ;;  %v2805_v50 = vadd.f32 %v2804_v22, %v2704_v45 }
 0x448   : > { %v5484_v10 = vand.u32 4294901760, %v3161_v44  ;;  %v3006_v23 = vpop.f32.mrf.mxu2  ;;  %v3095_v30 = vpop.f32.mrf.mxu3  ;;  %v3259_v16 = vand.u32 4294901760, %v3258_v9 }
 0x449   : > { %v3007_v21 = vadd.f32 %v3006_v23, %v2900_v48  ;;  %v2918_v23 = vadd.f32 %v2917_v31, %v2805_v50 }
 0x44a   : > { %3260 = vmatmul.f32.gmra.mxu0 %v3259_v16  ;;  %3401 = vmatmul.f32.gmra.mxu1 %v5484_v10  ;;  %v3264_v52 = vsub.f32 %v3161_v44, %v5484_v10  ;;  %v2708_v44 = vadd.f32 %v5407_v14, %v2595_v38 }
 0x44b   : > { %v3092_v20 = vadd.f32 %v3091_v25, %v3007_v21 }
 0x44c   : > { %3498 = vmatmul.f32.gmra.mxu2 %v3264_v52  ;;  %v3265_v5 = vand.u32 4294901760, %v3264_v52  ;;  %v2810_v4 = vadd.f32 %v2809_v51, %v2708_v44 }
 0x44d   : > { %v3130_v34 = vmax.f32 %v3092_v20, 0.0  ;;  %v2603_v20 = vadd.f32 %v5320_v2, %v5421_v1 }
 0x44e   : > { %3607 = vmatmul.f32.gmra.mxu3 %v3265_v5  ;;  %v3266_v62 = vsub.f32 %v3264_v52, %v3265_v5 }
 0x44f   : > { %v3164_v28 = vsel %vm2423_vm3, %v3130_v34, 0 }
 0x450   : > { %v5492_v63 = vand.u32 4294901760, %v3164_v28  ;;  %v3010_v59 = vpop.f32.mrf.mxu2  ;;  %v3099_v39 = vpop.f32.mrf.mxu3  ;;  %v3267_v12 = vand.u32 4294901760, %v3266_v62 }
 0x451   : > { %v3011_v43 = vadd.f32 %v3010_v59, %v2906_v61  ;;  %v2814_v62 = vpop.f32.mrf.mxu0 }
 0x452   : > { %3268 = vmatmul.f32.gmra.mxu0 %v3267_v12  ;;  %3405 = vmatmul.f32.gmra.mxu1 %v5492_v63  ;;  %v3272_v58 = vsub.f32 %v3164_v28, %v5492_v63  ;;  %v2712_v28 = vadd.f32 %v5416_v60, %v2603_v20 }
 0x453   : > { %v3096_v24 = vadd.f32 %v3095_v30, %v3011_v43  ;;  %v2923_v30 = vpop.f32.mrf.mxu1 }
 0x454   : > { %3503 = vmatmul.f32.gmra.mxu2 %v3272_v58  ;;  %v3273_v8 = vand.u32 4294901760, %v3272_v58  ;;  %v2924_v59 = vadd.f32 %v2923_v30, %v2810_v4  ;;  %v2815_v56 = vadd.f32 %v2814_v62, %v2712_v28 }
 0x455   : > { %v3131_v35 = vmax.f32 %v3096_v24, 0.0 }
 0x456   : > { %3613 = vmatmul.f32.gmra.mxu3 %v3273_v8  ;;  %v3274_v49 = vsub.f32 %v3272_v58, %v3273_v8 }
 0x457   : > { %v3167_v25 = vsel %vm2423_vm3, %v3131_v35, 0 }
 0x458   : > { %v5500_v32 = vand.u32 4294901760, %v3167_v25  ;;  %v3014_v33 = vpop.f32.mrf.mxu2  ;;  %v3275_v3 = vand.u32 4294901760, %v3274_v49  ;;  %v3103_v11 = vpop.f32.mrf.mxu3  ;;  %v2716_v49 = vadd.f32 %v5423_v6, %v2611_v29 }
 0x459   : > { %v3015_v57 = vadd.f32 %v3014_v33, %v2912_v7  ;;  %v2819_v7 = vpop.f32.mrf.mxu0 }
 0x45a   : > { %3276 = vmatmul.f32.gmra.mxu0 %v3275_v3  ;;  %3409 = vmatmul.f32.gmra.mxu1 %v5500_v32  ;;  %v3280_v19 = vsub.f32 %v3167_v25, %v5500_v32 }
 0x45b   : > { %v3100_v27 = vadd.f32 %v3099_v39, %v3015_v57  ;;  %v2929_v1 = vpop.f32.mrf.mxu1 }
 0x45c   : > { %3508 = vmatmul.f32.gmra.mxu2 %v3280_v19  ;;  %v3281_v9 = vand.u32 4294901760, %v3280_v19  ;;  %v2930_v25 = vadd.f32 %v2929_v1, %v2815_v56 }
 0x45d   : > { %v3132_v18 = vmax.f32 %v3100_v27, 0.0  ;;  %v2820_v27 = vadd.f32 %v2819_v7, %v2716_v49 }
 0x45e   : > { %3619 = vmatmul.f32.gmra.mxu3 %v3281_v9  ;;  %v3282_v0 = vsub.f32 %v3280_v19, %v3281_v9  ;;  %v2619_v19 = vadd.f32 %v5320_v2, %v5432_v13 }
 0x45f   : > { %v3170_v48 = vsel %vm2423_vm3, %v3132_v18, 0 }
 0x460   : > { %v5508_v16 = vand.u32 4294901760, %v3170_v48  ;;  %v3018_v21 = vpop.f32.mrf.mxu2  ;;  %v3283_v52 = vand.u32 4294901760, %v3282_v0  ;;  %v3107_v14 = vpop.f32.mrf.mxu3  ;;  %v2720_v18 = vadd.f32 %v5429_v54, %v2619_v19 }
 0x461   : > { %v3019_v26 = vadd.f32 %v3018_v21, %v2918_v23  ;;  %v2824_v2 = vpop.f32.mrf.mxu0 }
 0x462   : > { %3284 = vmatmul.f32.gmra.mxu0 %v3283_v52  ;;  %3413 = vmatmul.f32.gmra.mxu1 %v5508_v16  ;;  %v3288_v41 = vsub.f32 %v3170_v48, %v5508_v16 }
 0x463   : > { %v3104_v42 = vadd.f32 %v3103_v11, %v3019_v26  ;;  %v2935_v6 = vpop.f32.mrf.mxu1 }
 0x464   : > { %3513 = vmatmul.f32.gmra.mxu2 %v3288_v41  ;;  %v3289_v5 = vand.u32 4294901760, %v3288_v41  ;;  %v2936_v44 = vadd.f32 %v2935_v6, %v2820_v27 }
 0x465   : > { %v3133_v34 = vmax.f32 %v3104_v42, 0.0 }
 0x466   : > { %3625 = vmatmul.f32.gmra.mxu3 %v3289_v5  ;;  %v3290_v15 = vsub.f32 %v3288_v41, %v3289_v5  ;;  %v2825_v41 = vadd.f32 %v2824_v2, %v2720_v18 }
 0x467   : > { %v3173_v61 = vsel %vm2423_vm3, %v3133_v34, 0 }
 0x468   : > { %v5516_v39 = vand.u32 4294901760, %v3173_v61  ;;  %v3022_v12 = vpop.f32.mrf.mxu2  ;;  %v3291_v43 = vand.u32 4294901760, %v3290_v15  ;;  %v3111_v35 = vpop.f32.mrf.mxu3 }
 0x469   : > { %v3023_v22 = vadd.f32 %v3022_v12, %v2924_v59 }
 0x46a   : > { %3292 = vmatmul.f32.gmra.mxu0 %v3291_v43  ;;  %3417 = vmatmul.f32.gmra.mxu1 %v5516_v39  ;;  %v3296_v58 = vsub.f32 %v3173_v61, %v5516_v39 }
 0x46b   : > { %v3108_v24 = vadd.f32 %v3107_v14, %v3023_v22  ;;  %v2941_v42 = vpop.f32.mrf.mxu1 }
 0x46c   : > { %3518 = vmatmul.f32.gmra.mxu2 %v3296_v58  ;;  %v3297_v60 = vand.u32 4294901760, %v3296_v58  ;;  %v2942_v5 = vadd.f32 %v2941_v42, %v2825_v41 }
 0x46d   : > { %v3134_v8 = vmax.f32 %v3108_v24, 0.0 }
 0x46e   : > { %3631 = vmatmul.f32.gmra.mxu3 %v3297_v60  ;;  %v3298_v31 = vsub.f32 %v3296_v58, %v3297_v60 }
 0x46f   : > { %v3176_v45 = vsel %vm2423_vm3, %v3134_v8, 0 }
 0x470   : > { %v5524_v33 = vand.u32 4294901760, %v3176_v45  ;;  %v3026_v3 = vpop.f32.mrf.mxu2  ;;  %v3299_v57 = vand.u32 4294901760, %v3298_v31  ;;  %v3115_v23 = vpop.f32.mrf.mxu3 }
 0x471   : > { %v3027_v11 = vadd.f32 %v3026_v3, %v2930_v25 }
 0x472   : > { %3300 = vmatmul.f32.gmra.mxu0 %v3299_v57  ;;  %3421 = vmatmul.f32.gmra.mxu1 %v5524_v33  ;;  %v3304_v40 = vsub.f32 %v3176_v45, %v5524_v33 }
 0x473   : > { %v3112_v38 = vadd.f32 %v3111_v35, %v3027_v11 }
 0x474   : > { %3523 = vmatmul.f32.gmra.mxu2 %v3304_v40  ;;  %v3305_v50 = vand.u32 4294901760, %v3304_v40 }
 0x475   : > { %v3135_v51 = vmax.f32 %v3112_v38, 0.0 }
 0x476   : > { %3637 = vmatmul.f32.gmra.mxu3 %v3305_v50  ;;  %v3306_v9 = vsub.f32 %v3304_v40, %v3305_v50 }
 0x477   : > { %v3179_v0 = vsel %vm2423_vm3, %v3135_v51, 0 }
 0x478   : > { %v5532_v48 = vand.u32 4294901760, %v3179_v0  ;;  %v3030_v30 = vpop.f32.mrf.mxu2  ;;  %v3307_v21 = vand.u32 4294901760, %v3306_v9  ;;  %v3119_v61 = vpop.f32.mrf.mxu3 }
 0x479   : > { %v3031_v52 = vadd.f32 %v3030_v30, %v2936_v44 }
 0x47a   : > { %3308 = vmatmul.f32.gmra.mxu0 %v3307_v21  ;;  %3425 = vmatmul.f32.gmra.mxu1 %v5532_v48  ;;  %v3312_v13 = vsub.f32 %v3179_v0, %v5532_v48 }
 0x47b   : > { %v3116_v26 = vadd.f32 %v3115_v23, %v3031_v52 }
 0x47c   : > { %3528 = vmatmul.f32.gmra.mxu2 %v3312_v13  ;;  %v3313_v20 = vand.u32 4294901760, %v3312_v13 }
 0x47d   : > { %v3136_v54 = vmax.f32 %v3116_v26, 0.0 }
 0x47e   : > { %3643 = vmatmul.f32.gmra.mxu3 %v3313_v20  ;;  %v3314_v4 = vsub.f32 %v3312_v13, %v3313_v20 }
 0x47f   : > { %v3182_v14 = vsel %vm2423_vm3, %v3136_v54, 0 }
 0x480   : > { %v5537_v34 = vand.u32 4294901760, %v3182_v14  ;;  %v3034_v62 = vpop.f32.mrf.mxu2  ;;  %v3315_v15 = vand.u32 4294901760, %v3314_v4 }
 0x481   : > { %v3035_v28 = vadd.f32 %v3034_v62, %v2942_v5 }
 0x482   : > { %3316 = vmatmul.f32.gmra.mxu0 %v3315_v15  ;;  %3429 = vmatmul.f32.gmra.mxu1 %v5537_v34  ;;  %v3320_v59 = vsub.f32 %v3182_v14, %v5537_v34 }
 0x483   : > { %v3120_v12 = vadd.f32 %v3119_v61, %v3035_v28 }
 0x484   : > { %3533 = vmatmul.f32.gmra.mxu2 %v3320_v59  ;;  %v3321_v43 = vand.u32 4294901760, %v3320_v59 }
 0x485   : > { %v3137_v22 = vmax.f32 %v3120_v12, 0.0 }
 0x486   : > { %3649 = vmatmul.f32.gmra.mxu3 %v3321_v43  ;;  %v3322_v1 = vsub.f32 %v3320_v59, %v3321_v43 }
 0x487   : > { %v3185_v58 = vsel %vm2423_vm3, %v3137_v22, 0 }
 0x488   : > { %v5542_v29 = vand.u32 4294901760, %v3185_v58  ;;  %v3323_v24 = vand.u32 4294901760, %v3322_v1 }
 0x48a   : > { %3324 = vmatmul.f32.gmra.mxu0 %v3323_v24  ;;  %3433 = vmatmul.f32.gmra.mxu1 %v5542_v29  ;;  %v3328_v56 = vsub.f32 %v3185_v58, %v5542_v29 }
 0x48c   : > { %3538 = vmatmul.f32.gmra.mxu2 %v3328_v56  ;;  %v3329_v60 = vand.u32 4294901760, %v3328_v56 }
 0x48e   : > { %3655 = vmatmul.f32.gmra.mxu3 %v3329_v60  ;;  %v3330_v8 = vsub.f32 %v3328_v56, %v3329_v60 }
 0x48f   : > { %v5546_v35 = vpop.f32.mrf.mxu1 }
 0x490   : > { %v3331_v31 = vand.u32 4294901760, %v3330_v8 }
 0x492   : > { %3332 = vmatmul.f32.gmra.mxu0 %v3331_v31  ;;  %3773 = vmatmul.f32.vlgmr.msrb.gmra.mxu1 %v5437_v37 }
 0x497   : > { %v5549_v49 = vpop.f32.mrf.mxu0  ;;  %v5551_v45 = vpop.f32.mrf.mxu1 }
 0x498   : > { %v3464_v13 = vpop.f32.mrf.mxu2 }
 0x49a   : > { %3688 = vmatmul.f32.vlgmr.msrb.gmra.mxu0 %v5437_v37  ;;  %3777 = vmatmul.f32.gmra.mxu1 %v5443_v47 }
 0x49f   : > { %v5555_v25 = vpop.f32.mrf.mxu0  ;;  %v5557_v7 = vpop.f32.mrf.mxu1 }
 0x4a2   : > { %3692 = vmatmul.f32.gmra.mxu0 %v5443_v47  ;;  %3781 = vmatmul.f32.gmra.mxu1 %v5449_v17 }
 0x4a7   : > { %v5561_v3 = vpop.f32.mrf.mxu0  ;;  %v5563_v57 = vpop.f32.mrf.mxu1 }
 0x4aa   : > { %3696 = vmatmul.f32.gmra.mxu0 %v5449_v17  ;;  %3785 = vmatmul.f32.gmra.mxu1 %v5455_v53 }
 0x4af   : > { %v5567_v11 = vpop.f32.mrf.mxu0  ;;  %v5569_v37 = vpop.f32.mrf.mxu1 }
 0x4b2   : > { %3700 = vmatmul.f32.gmra.mxu0 %v5455_v53  ;;  %3789 = vmatmul.f32.gmra.mxu1 %v5461_v55 }
 0x4b7   : > { %v5573_v40 = vpop.f32.mrf.mxu0  ;;  %v5575_v47 = vpop.f32.mrf.mxu1 }
 0x4ba   : > { %3704 = vmatmul.f32.gmra.mxu0 %v5461_v55  ;;  %3793 = vmatmul.f32.gmra.mxu1 %v5467_v46 }
 0x4bf   : > { %v5579_v19 = vpop.f32.mrf.mxu0  ;;  %v5581_v17 = vpop.f32.mrf.mxu1 }
 0x4c2   : > { %3708 = vmatmul.f32.gmra.mxu0 %v5467_v46  ;;  %3797 = vmatmul.f32.gmra.mxu1 %v5476_v36  ;;  %v5598_v46 = vld [vmem:[%s5714_s1 + $0xc3] ss:$0 sm:$0xff] }
 0x4c3   : > { %v3222_v60 = vadd.f32 %v5598_v46, %v5555_v25 }
 0x4c7   : > { %v5585_v38 = vpop.f32.mrf.mxu0  ;;  %v5587_v53 = vpop.f32.mrf.mxu1 }
 0x4ca   : > { %3712 = vmatmul.f32.gmra.mxu0 %v5476_v36  ;;  %3801 = vmatmul.f32.gmra.mxu1 %v5484_v10 }
 0x4cf   : > { %v5591_v27 = vpop.f32.mrf.mxu0  ;;  %v3406_v55 = vpop.f32.mrf.mxu1 }
 0x4d2   : > { %3716 = vmatmul.f32.gmra.mxu0 %v5484_v10  ;;  %3805 = vmatmul.f32.gmra.mxu1 %v5492_v63 }
 0x4d7   : > { %v3277_v6 = vpop.f32.mrf.mxu0  ;;  %v3410_v50 = vpop.f32.mrf.mxu1 }
 0x4d8   : > { %v3278_v51 = vadd.f32 %v5598_v46, %v3277_v6 }
 0x4da   : > { %v5601_v9 = vadd.f32 %v3406_v55, %v3278_v51  ;;  %3720 = vmatmul.f32.gmra.mxu0 %v5492_v63  ;;  %3809 = vmatmul.f32.gmra.mxu1 %v5500_v32 }
 0x4df   : > { %v3285_v36 = vpop.f32.mrf.mxu0  ;;  %v3414_v18 = vpop.f32.mrf.mxu1 }
 0x4e0   : > { %v3286_v10 = vadd.f32 %v5598_v46, %v3285_v36 }
 0x4e2   : > { %v5606_v0 = vadd.f32 %v3410_v50, %v3286_v10  ;;  %3724 = vmatmul.f32.gmra.mxu0 %v5500_v32  ;;  %3813 = vmatmul.f32.gmra.mxu1 %v5508_v16  ;;  %v3566_v32 = vpop.f32.mrf.mxu3 }
 0x4e7   : > { %v3293_v44 = vpop.f32.mrf.mxu0  ;;  %v3418_v23 = vpop.f32.mrf.mxu1 }
 0x4e8   : > { %v3294_v30 = vadd.f32 %v5598_v46, %v3293_v44 }
 0x4ea   : > { %v5611_v21 = vadd.f32 %v3414_v18, %v3294_v30  ;;  %3728 = vmatmul.f32.gmra.mxu0 %v5508_v16  ;;  %3817 = vmatmul.f32.gmra.mxu1 %v5516_v39  ;;  %v3469_v16 = vpop.f32.mrf.mxu2  ;;  %v3572_v5 = vpop.f32.mrf.mxu3 }
 0x4ef   : > { %v3301_v63 = vpop.f32.mrf.mxu0  ;;  %v3422_v52 = vpop.f32.mrf.mxu1 }
 0x4f0   : > { %v3302_v2 = vadd.f32 %v5598_v46, %v3301_v63  ;;  %v3238_v63 = vadd.f32 %v5598_v46, %v5567_v11 }
 0x4f2   : > { %v5616_v26 = vadd.f32 %v3418_v23, %v3302_v2  ;;  %3732 = vmatmul.f32.gmra.mxu0 %v5516_v39  ;;  %3821 = vmatmul.f32.gmra.mxu1 %v5524_v33  ;;  %v3474_v15 = vpop.f32.mrf.mxu2  ;;  %v3578_v12 = vpop.f32.mrf.mxu3 }
 0x4f7   : > { %v3309_v41 = vpop.f32.mrf.mxu0  ;;  %v3426_v20 = vpop.f32.mrf.mxu1 }
 0x4f8   : > { %v3310_v54 = vadd.f32 %v5598_v46, %v3309_v41 }
 0x4fa   : > { %v5621_v42 = vadd.f32 %v3422_v52, %v3310_v54  ;;  %3736 = vmatmul.f32.gmra.mxu0 %v5524_v33  ;;  %3825 = vmatmul.f32.gmra.mxu1 %v5532_v48  ;;  %v3214_v33 = vadd.f32 %v5598_v46, %v5549_v49  ;;  %v3479_v58 = vpop.f32.mrf.mxu2  ;;  %v3584_v31 = vpop.f32.mrf.mxu3  ;;  %v3379_v49 = vadd.f32 %v5551_v45, %v3222_v60 }
 0x4fc   : > { %v3470_v25 = vadd.f32 %v3469_v16, %v3379_v49  ;;  %v3246_v16 = vadd.f32 %v5598_v46, %v5573_v40 }
 0x4fe   : > { %v3573_v45 = vadd.f32 %v3572_v5, %v3470_v25 }
 0x4ff   : > { %v3317_v4 = vpop.f32.mrf.mxu0  ;;  %v3430_v14 = vpop.f32.mrf.mxu1 }
 0x500   : > { %v3318_v62 = vadd.f32 %v5598_v46, %v3317_v4 }
 0x502   : > { %v5626_v39 = vadd.f32 %v3426_v20, %v3318_v62  ;;  %3740 = vmatmul.f32.gmra.mxu0 %v5532_v48  ;;  %3829 = vmatmul.f32.gmra.mxu1 %v5537_v34  ;;  %v3375_v48 = vadd.f32 %v5546_v35, %v3214_v33  ;;  %v3484_v50 = vpop.f32.mrf.mxu2  ;;  %v3590_v18 = vpop.f32.mrf.mxu3 }
 0x504   : > { %v3465_v56 = vadd.f32 %v3464_v13, %v3375_v48  ;;  %v3387_v13 = vadd.f32 %v5563_v57, %v3238_v63 }
 0x506   : > { %v3480_v54 = vadd.f32 %v3479_v58, %v3387_v13 }
 0x507   : > { %v3325_v28 = vpop.f32.mrf.mxu0  ;;  %v3434_v61 = vpop.f32.mrf.mxu1 }
 0x508   : > { %v3326_v59 = vadd.f32 %v5598_v46, %v3325_v28  ;;  %v3585_v11 = vadd.f32 %v3584_v31, %v3480_v54 }
 0x50a   : > { %v5633_v43 = vadd.f32 %v3430_v14, %v3326_v59  ;;  %3744 = vmatmul.f32.gmra.mxu0 %v5537_v34  ;;  %3833 = vmatmul.f32.gmra.mxu1 %v5542_v29  ;;  %v3567_v34 = vadd.f32 %v3566_v32, %v3465_v56  ;;  %v3489_v2 = vpop.f32.mrf.mxu2  ;;  %v3596_v20 = vpop.f32.mrf.mxu3  ;;  %v3391_v14 = vadd.f32 %v5569_v37, %v3246_v16 }
 0x50c   : > { %v3485_v57 = vadd.f32 %v3484_v50, %v3391_v14 }
 0x50e   : > { %v3591_v40 = vadd.f32 %v3590_v18, %v3485_v57 }
 0x50f   : > { %v3333_v22 = vpop.f32.mrf.mxu0  ;;  %v3774_v1 = vpop.f32.mrf.mxu1 }
 0x510   : > { %v3334_v24 = vadd.f32 %v5598_v46, %v3333_v22 }
 0x512   : > { %v5641_v8 = vadd.f32 %v3434_v61, %v3334_v24  ;;  %3748 = vmatmul.f32.gmra.mxu0 %v5542_v29  ;;  %v3230_v29 = vadd.f32 %v5598_v46, %v5561_v3  ;;  %v3494_v5 = vpop.f32.mrf.mxu2  ;;  %v3254_v61 = vadd.f32 %v5598_v46, %v5579_v19  ;;  %v3602_v59 = vpop.f32.mrf.mxu3  ;;  %v3262_v24 = vadd.f32 %v5598_v46, %v5585_v38 }
 0x514   : > { %v3383_v36 = vadd.f32 %v5557_v7, %v3230_v29  ;;  %v3399_v31 = vadd.f32 %v5581_v17, %v3262_v24 }
 0x516   : > { %v3475_v30 = vadd.f32 %v3474_v15, %v3383_v36 }
 0x517   : > { %v3689_v55 = vpop.f32.mrf.mxu0  ;;  %v3778_v6 = vpop.f32.mrf.mxu1 }
 0x518   : > { %v3690_v35 = vadd.f32 %v3689_v55, %v3567_v34  ;;  %v3579_v3 = vadd.f32 %v3578_v12, %v3475_v30  ;;  %v3395_v12 = vadd.f32 %v5575_v47, %v3254_v61  ;;  %v3495_v55 = vadd.f32 %v3494_v5, %v3399_v31 }
 0x51a   : > { %v3775_v51 = vadd.f32 %v3774_v1, %v3690_v35  ;;  %v3499_v1 = vpop.f32.mrf.mxu2  ;;  %v3490_v58 = vadd.f32 %v3489_v2, %v3395_v12  ;;  %v3608_v60 = vpop.f32.mrf.mxu3  ;;  %v3603_v38 = vadd.f32 %v3602_v59, %v3495_v55 }
 0x51c   : > { %3838 = vst.msk [vmem:[%s5650_s25] sm:$0xff] %vm3837_vm4, %v3775_v51  ;;  %v3597_v19 = vadd.f32 %v3596_v20, %v3490_v58 }
 0x51f   : > { %v3693_v10 = vpop.f32.mrf.mxu0  ;;  %v3782_v44 = vpop.f32.mrf.mxu1 }
 0x520   : > { %v3694_v23 = vadd.f32 %v3693_v10, %v3573_v45 }
 0x522   : > { %v3779_v52 = vadd.f32 %v3778_v6, %v3694_v23  ;;  %v3270_v6 = vadd.f32 %v5598_v46, %v5591_v27  ;;  %v3504_v35 = vpop.f32.mrf.mxu2  ;;  %v3614_v50 = vpop.f32.mrf.mxu3 }
 0x523   : > { %v3505_v63 = vadd.f32 %v3504_v35, %v5601_v9 }
 0x524   : > { %3839 = vst.msk [vmem:[%s5650_s25 + $0x8] sm:$0xff] %vm3837_vm4, %v3779_v52  ;;  %v3403_v29 = vadd.f32 %v5587_v53, %v3270_v6 }
 0x525   : > { %v3615_v53 = vadd.f32 %v3614_v50, %v3505_v63 }
 0x526   : > { %v3500_v36 = vadd.f32 %v3499_v1, %v3403_v29 }
 0x527   : > { %v3697_v32 = vpop.f32.mrf.mxu0  ;;  %v3786_v41 = vpop.f32.mrf.mxu1 }
 0x528   : > { %v3698_v7 = vadd.f32 %v3697_v32, %v3579_v3 }
 0x52a   : > { %v3783_v4 = vadd.f32 %v3782_v44, %v3698_v7  ;;  %v3509_v10 = vpop.f32.mrf.mxu2  ;;  %v3609_v44 = vadd.f32 %v3608_v60, %v3500_v36  ;;  %v3620_v30 = vpop.f32.mrf.mxu3 }
 0x52c   : > { %3840 = vst.msk [vmem:[%s5650_s25 + $0x10] sm:$0xff] %vm3837_vm4, %v3783_v4 }
 0x52f   : > { %v3701_v62 = vpop.f32.mrf.mxu0  ;;  %v3790_v15 = vpop.f32.mrf.mxu1 }
 0x530   : > { %v3702_v28 = vadd.f32 %v3701_v62, %v3585_v11 }
 0x532   : > { %v3787_v33 = vadd.f32 %v3786_v41, %v3702_v28  ;;  %v3514_v2 = vpop.f32.mrf.mxu2  ;;  %v3510_v41 = vadd.f32 %v3509_v10, %v5606_v0  ;;  %v3626_v7 = vpop.f32.mrf.mxu3 }
 0x533   : > { %v3515_v14 = vadd.f32 %v3514_v2, %v5611_v21 }
 0x534   : > { %3841 = vst.msk [vmem:[%s5650_s25 + $0x18] sm:$0xff] %vm3837_vm4, %v3787_v33  ;;  %v3621_v54 = vadd.f32 %v3620_v30, %v3510_v41 }
 0x537   : > { %v3705_v48 = vpop.f32.mrf.mxu0  ;;  %v3794_v22 = vpop.f32.mrf.mxu1 }
 0x538   : > { %v3706_v37 = vadd.f32 %v3705_v48, %v3591_v40 }
 0x53a   : > { %v3791_v56 = vadd.f32 %v3790_v15, %v3706_v37  ;;  %v3519_v11 = vpop.f32.mrf.mxu2  ;;  %v3632_v62 = vpop.f32.mrf.mxu3  ;;  %v3627_v15 = vadd.f32 %v3626_v7, %v3515_v14 }
 0x53b   : > { %v3520_v61 = vadd.f32 %v3519_v11, %v5616_v26 }
 0x53c   : > { %3842 = vst.msk [vmem:[%s5650_s25 + $0x20] sm:$0xff] %vm3837_vm4, %v3791_v56 }
 0x53d   : > { %v3633_v40 = vadd.f32 %v3632_v62, %v3520_v61 }
 0x53f   : > { %v3709_v34 = vpop.f32.mrf.mxu0  ;;  %v3798_v49 = vpop.f32.mrf.mxu1 }
 0x540   : > { %v3710_v47 = vadd.f32 %v3709_v34, %v3597_v19 }
 0x542   : > { %v3795_v25 = vadd.f32 %v3794_v22, %v3710_v47  ;;  %v3524_v33 = vpop.f32.mrf.mxu2  ;;  %v3638_v12 = vpop.f32.mrf.mxu3 }
 0x543   : > { %v3525_v22 = vadd.f32 %v3524_v33, %v5621_v42 }
 0x544   : > { %3843 = vst.msk [vmem:[%s5650_s25 + $0x28] sm:$0xff] %vm3837_vm4, %v3795_v25 }
 0x545   : > { %v3639_v24 = vadd.f32 %v3638_v12, %v3525_v22 }
 0x547   : > { %v3713_v51 = vpop.f32.mrf.mxu0  ;;  %v3802_v45 = vpop.f32.mrf.mxu1 }
 0x548   : > { %v3714_v17 = vadd.f32 %v3713_v51, %v3603_v38 }
 0x54a   : > { %v3799_v18 = vadd.f32 %v3798_v49, %v3714_v17  ;;  %v3529_v58 = vpop.f32.mrf.mxu2  ;;  %v3644_v60 = vpop.f32.mrf.mxu3 }
 0x54b   : > { %v3530_v19 = vadd.f32 %v3529_v58, %v5626_v39 }
 0x54c   : > { %3844 = vst.msk [vmem:[%s5650_s25 + $0x30] sm:$0xff] %vm3837_vm4, %v3799_v18 }
 0x54d   : > { %v3645_v49 = vadd.f32 %v3644_v60, %v3530_v19 }
 0x54f   : > { %v3717_v27 = vpop.f32.mrf.mxu0  ;;  %v3806_v46 = vpop.f32.mrf.mxu1 }
 0x550   : > { %v3718_v23 = vadd.f32 %v3717_v27, %v3609_v44 }
 0x552   : > { %v3803_v52 = vadd.f32 %v3802_v45, %v3718_v23  ;;  %v3534_v47 = vpop.f32.mrf.mxu2  ;;  %v3650_v25 = vpop.f32.mrf.mxu3 }
 0x553   : > { %v3535_v6 = vadd.f32 %v3534_v47, %v5633_v43 }
 0x554   : > { %3845 = vst.msk [vmem:[%s5650_s25 + $0x38] sm:$0xff] %vm3837_vm4, %v3803_v52 }
 0x555   : > { %v3651_v38 = vadd.f32 %v3650_v25, %v3535_v6 }
 0x557   : > { %v3721_v3 = vpop.f32.mrf.mxu0  ;;  %v3810_v13 = vpop.f32.mrf.mxu1 }
 0x558   : > { %v3722_v32 = vadd.f32 %v3721_v3, %v3615_v53 }
 0x55a   : > { %v3807_v20 = vadd.f32 %v3806_v46, %v3722_v32  ;;  %v3539_v51 = vpop.f32.mrf.mxu2  ;;  %v3656_v36 = vpop.f32.mrf.mxu3 }
 0x55b   : > { %v3540_v45 = vadd.f32 %v3539_v51, %v5641_v8 }
 0x55c   : > { %3846 = vst.msk [vmem:[%s5650_s25 + $0x40] sm:$0xff] %vm3837_vm4, %v3807_v20 }
 0x55d   : > { %v3657_v18 = vadd.f32 %v3656_v36, %v3540_v45 }
 0x55f   : > { %v3725_v16 = vpop.f32.mrf.mxu0  ;;  %v3814_v4 = vpop.f32.mrf.mxu1 }
 0x560   : > { %v3726_v9 = vadd.f32 %v3725_v16, %v3621_v54 }
 0x562   : > { %v3811_v5 = vadd.f32 %v3810_v13, %v3726_v9 }
 0x564   : > { %3847 = vst.msk [vmem:[%s5650_s25 + $0x48] sm:$0xff] %vm3837_vm4, %v3811_v5 }
 0x567   : > { %v3729_v28 = vpop.f32.mrf.mxu0  ;;  %v3818_v57 = vpop.f32.mrf.mxu1 }
 0x568   : > { %v3730_v0 = vadd.f32 %v3729_v28, %v3627_v15 }
 0x56a   : > { %v3815_v59 = vadd.f32 %v3814_v4, %v3730_v0 }
 0x56c   : > { %3848 = vst.msk [vmem:[%s5650_s25 + $0x50] sm:$0xff] %vm3837_vm4, %v3815_v59 }
 0x56f   : > { %v3733_v48 = vpop.f32.mrf.mxu0  ;;  %v3822_v37 = vpop.f32.mrf.mxu1 }
 0x570   : > { %v3734_v21 = vadd.f32 %v3733_v48, %v3633_v40 }
 0x572   : > { %v3819_v1 = vadd.f32 %v3818_v57, %v3734_v21 }
 0x574   : > { %3849 = vst.msk [vmem:[%s5650_s25 + $0x58] sm:$0xff] %vm3837_vm4, %v3819_v1 }
 0x577   : > { %v3737_v56 = vpop.f32.mrf.mxu0  ;;  %v3826_v34 = vpop.f32.mrf.mxu1 }
 0x578   : > { %v3738_v26 = vadd.f32 %v3737_v56, %v3639_v24 }
 0x57a   : > { %v3823_v31 = vadd.f32 %v3822_v37, %v3738_v26 }
 0x57c   : > { %3850 = vst.msk [vmem:[%s5650_s25 + $0x60] sm:$0xff] %vm3837_vm4, %v3823_v31 }
 0x57f   : > { %v3741_v42 = vpop.f32.mrf.mxu0  ;;  %v3830_v29 = vpop.f32.mrf.mxu1 }
 0x580   : > { %v3742_v55 = vadd.f32 %v3741_v42, %v3645_v49 }
 0x582   : > { %v3827_v35 = vadd.f32 %v3826_v34, %v3742_v55 }
 0x584   : > { %3851 = vst.msk [vmem:[%s5650_s25 + $0x68] sm:$0xff] %vm3837_vm4, %v3827_v35 }
 0x587   : > { %v3745_v50 = vpop.f32.mrf.mxu0  ;;  %v3834_v43 = vpop.f32.mrf.mxu1 }
 0x588   : > { %v3746_v39 = vadd.f32 %v3745_v50, %v3651_v38 }
 0x58a   : > { %v3831_v17 = vadd.f32 %v3830_v29, %v3746_v39 }
 0x58c   : > { %3852 = vst.msk [vmem:[%s5650_s25 + $0x70] sm:$0xff] %vm3837_vm4, %v3831_v17 }
 0x58f   : > { %v3749_v10 = vpop.f32.mrf.mxu0 }
 0x590   : > { %v3750_v44 = vadd.f32 %v3749_v10, %v3657_v18 }
 0x592   : > { %v3835_v27 = vadd.f32 %v3834_v43, %v3750_v44 }
 0x594   : > { %3853 = vst.msk [vmem:[%s5650_s25 + $0x78] sm:$0xff] %vm3837_vm4, %v3835_v27 }
 0x595 PF: > { %s12_s9 = sadd.s32 1, %s3950_s9  }
 0x596   : > { %p9_p4 = scmp.ge.s32.totalorder %s12_s9, 4  }
 0x598   :  { %11 = sbr.rel (!%p9_p4) target bundleno = 1 (0x1), region = 58 }

</bundles_post_ra>
